<compile_context>
chip_gen: v7x
topology: tpu7x:2x2x1
jax: 0.10.0
libtpu: 0.0.40
codegen_flags: <defaults>
</compile_context>

<pallas_src>
import functools

import jax
import jax.numpy as jnp
import numpy as np
from jax.experimental import pallas as pl
from jax.experimental.pallas import tpu as pltpu


def _round_up(n, m):
    return ((n + m - 1) // m) * m


def _pick_block_b(batch, seq_pad, target_m=256):
    """Batch rows folded per grid step: M = block_b * seq_pad ~= target_m (fills
    the 256-wide MXU on v6e/v7x, two passes of the 128-wide v5e MXU) while
    keeping >= 2 grid steps so both megacore halves / v7x TensorCores get work."""
    bb = max(1, min(batch, target_m // max(1, seq_pad)))
    if batch >= 2:
        bb = min(bb, -(-batch // 2))          # at least 2 grid steps
    return bb


def _mha_kernel(x_ref, wqkv_ref, bqkv_ref, wo_ref, bo_ref, out_ref, *attn_refs,
                n_heads, d_k, d_v, scale, s_valid, approx_recip):
    """Multi-head attention for one block of `block_b` batch elements.

    x_ref    : (block_b, S_pad, D)         input sequences (compute dtype)
    wqkv_ref : (D, 2*H*dk + H*dv)          fused Q|K|V projection weight
    bqkv_ref : (1, 2*H*dk + H*dv)          fused Q|K|V bias (f32)
    wo_ref   : (H*dv, D)                   output projection weight
    bo_ref   : (1, D)                      output projection bias (f32)
    out_ref  : (block_b, S_pad, D)         attention output
    attn_refs: optionally (block_b, H, S_pad, S_pad) softmax attention weights,
               already in the global (B, H, S, S) layout (no wrapper transpose).
    """
    blk_b, s_pad, d_model = x_ref.shape
    m = blk_b * s_pad
    hdk = n_heads * d_k
    cd = wqkv_ref.dtype                       # MXU compute dtype (bf16 or f32)

    # ---- fused QKV projection: one (M, D) @ (D, 2*hdk+hdv) MXU pass, f32 acc ----
    x2d = x_ref[...].reshape(m, d_model)
    qkv = jnp.dot(x2d, wqkv_ref[...], preferred_element_type=jnp.float32)
    qkv = (qkv + bqkv_ref[...]).astype(cd)    # (m, 2*hdk + hdv)

    # Static key-padding mask (only present when S was padded to a sublane multiple).
    if s_valid < s_pad:
        key_id = jax.lax.broadcasted_iota(jnp.int32, (1, s_pad, s_pad), 2)
        key_ok = key_id < s_valid
    else:
        key_ok = None

    ctx_heads = []
    attn_heads = []
    for h in range(n_heads):                  # static unroll; batch-batched einsums
        qh = qkv[:, h * d_k:(h + 1) * d_k].reshape(blk_b, s_pad, d_k)
        kh = qkv[:, hdk + h * d_k: hdk + (h + 1) * d_k].reshape(blk_b, s_pad, d_k)
        vh = qkv[:, 2 * hdk + h * d_v: 2 * hdk + (h + 1) * d_v].reshape(blk_b, s_pad, d_v)

        scores = jnp.einsum('bqd,bkd->bqk', qh, kh,
                            preferred_element_type=jnp.float32) * scale
        if key_ok is not None:
            scores = jnp.where(key_ok, scores, -1e30)     # mask padded keys
        scores = scores - jnp.max(scores, axis=-1, keepdims=True)
        p = jnp.exp(scores)
        denom = jnp.sum(p, axis=-1, keepdims=True)
        # EUP reciprocal instead of a VALU divide.
        attn = p * pl.reciprocal(denom, approx=approx_recip)   # (blk_b, S, S) f32

        if attn_refs:
            attn_heads.append(attn)

        ctx = jnp.einsum('bqk,bkd->bqd', attn.astype(cd), vh,
                         preferred_element_type=jnp.float32)   # (blk_b, S, dv)
        ctx_heads.append(ctx.reshape(m, d_v))

    if attn_refs:
        # Single full-block store, already in (B, H, S, S) layout.
        attn_refs[0][...] = jnp.stack(attn_heads, axis=1).astype(attn_refs[0].dtype)

    # ---- single concatenated output projection: (m, H*dv) @ (H*dv, D) -----------
    ctx_all = jnp.concatenate(ctx_heads, axis=-1).astype(cd)
    out = jnp.dot(ctx_all, wo_ref[...], preferred_element_type=jnp.float32)
    out = out + bo_ref[...]
    out_ref[...] = out.reshape(blk_b, s_pad, d_model).astype(out_ref.dtype)


def multihead_attention(x, params, *, n_heads, d_k, d_v,
                        block_b=None, target_m=256,
                        compute_dtype=jnp.bfloat16, approx_reciprocal=True,
                        return_attn=False, attn_dtype=None, out_dtype=None):
    """x: (B, S, D) -> output (B, S, D) [, attn_weights (B, H, S, S)]."""
    B, S, D = x.shape
    wq, bq, wk, bk, wv, bv, wo, bo = params
    hdk, hdv = n_heads * d_k, n_heads * d_v
    width = 2 * hdk + hdv
    # PyTorch _ScaledDotProductAttention: scale = (d_model // n_heads) ** -0.5
    # (independent of d_k) -- kept for fidelity with the module.
    scale = float((D // n_heads) ** -0.5)

    out_dtype = x.dtype if out_dtype is None else out_dtype
    if attn_dtype is None:
        attn_dtype = (jnp.float32
                      if jnp.dtype(compute_dtype) == jnp.dtype(jnp.float32)
                      else jnp.bfloat16)

    # Pad S to a sublane multiple (16 for 2-byte compute dtype, else 8); padded
    # keys are masked inside the kernel softmax, padded rows are sliced away.
    sub = 16 if jnp.dtype(compute_dtype).itemsize == 2 else 8
    s_pad = _round_up(S, sub)

    if block_b is None:
        block_b = _pick_block_b(B, s_pad, target_m)
    b_pad = _round_up(B, block_b)             # pad batch instead of block_b=1 fallback
    grid = (b_pad // block_b,)

    # Parameter packing (constant-folded under jit).
    wqkv = jnp.concatenate([wq, wk, wv], axis=1).astype(compute_dtype)   # (D, width)
    bqkv = jnp.concatenate([bq, bk, bv], axis=1).astype(jnp.float32)     # (1, width)
    wo_c = wo.astype(compute_dtype)                                      # (hdv, D)
    bo_c = bo.astype(jnp.float32)                                        # (1, D)

    x_c = x.astype(compute_dtype)
    if b_pad != B or s_pad != S:
        x_c = jnp.pad(x_c, ((0, b_pad - B), (0, s_pad - S), (0, 0)))

    kernel = functools.partial(_mha_kernel, n_heads=n_heads, d_k=d_k, d_v=d_v,
                               scale=scale, s_valid=S,
                               approx_recip=approx_reciprocal)

    # Constant-index weight inputs are not re-DMA'd across grid steps.
    # TODO(synk): consider pipeline_mode=pl.Buffered(1) for them on v7x (64 MiB VMEM).
    in_specs = [
        pl.BlockSpec((block_b, s_pad, D), lambda i: (i, 0, 0)),   # x
        pl.BlockSpec((D, width), lambda i: (0, 0)),               # fused Wqkv
        pl.BlockSpec((1, width), lambda i: (0, 0)),               # fused bqkv
        pl.BlockSpec((hdv, D), lambda i: (0, 0)),                 # Wo
        pl.BlockSpec((1, D), lambda i: (0, 0)),                   # bo
    ]
    out_shapes = [jax.ShapeDtypeStruct((b_pad, s_pad, D), out_dtype)]
    out_specs = [pl.BlockSpec((block_b, s_pad, D), lambda i: (i, 0, 0))]
    if return_attn:
        out_shapes.append(
            jax.ShapeDtypeStruct((b_pad, n_heads, s_pad, s_pad), attn_dtype))
        out_specs.append(pl.BlockSpec((block_b, n_heads, s_pad, s_pad),
                                      lambda i: (i, 0, 0, 0)))

    # Advisory cost estimate so XLA schedules surrounding encoder ops sensibly.
    m_rows = b_pad * s_pad
    flops = 2 * m_rows * D * width                                    # QKV proj
    flops += 2 * b_pad * n_heads * s_pad * s_pad * (d_k + d_v)        # scores + ctx
    flops += 2 * m_rows * hdv * D                                     # output proj
    transcendentals = b_pad * n_heads * s_pad * s_pad                 # exp
    bytes_accessed = (x_c.size * x_c.dtype.itemsize
                      + wqkv.size * wqkv.dtype.itemsize
                      + bqkv.size * bqkv.dtype.itemsize
                      + wo_c.size * wo_c.dtype.itemsize
                      + bo_c.size * bo_c.dtype.itemsize
                      + m_rows * D * jnp.dtype(out_dtype).itemsize)
    if return_attn:
        bytes_accessed += (b_pad * n_heads * s_pad * s_pad
                           * jnp.dtype(attn_dtype).itemsize)
    cost = pl.CostEstimate(flops=int(flops),
                           transcendentals=int(transcendentals),
                           bytes_accessed=int(bytes_accessed))

    grid_spec = pltpu.PrefetchScalarGridSpec(
        num_scalar_prefetch=0,
        grid=grid,
        in_specs=in_specs,
        out_specs=tuple(out_specs),
    )

    outs = pl.pallas_call(
        kernel,
        grid_spec=grid_spec,
        out_shape=tuple(out_shapes),
        compiler_params=pltpu.CompilerParams(
            dimension_semantics=("parallel",),
            vmem_limit_bytes=32 * 1024 * 1024),   # >= default on all gens, <= v7x physical
        cost_estimate=cost,
    )(x_c, wqkv, bqkv, wo_c, bo_c)

    out = outs[0][:B, :S, :]
    if return_attn:
        attn = outs[1][:B, :, :S, :S]
        return out, attn
    return out


# --------------------------- pure-JAX references -----------------------------

def reference_mha_f32(x, params, *, n_heads, d_k, d_v):
    """Faithful f32 mirror of the PyTorch _MultiheadAttention forward."""
    B, S, D = x.shape
    wq, bq, wk, bk, wv, bv, wo, bo = params
    scale = (D // n_heads) ** -0.5

    q = x @ wq + bq[0]
    k = x @ wk + bk[0]
    v = x @ wv + bv[0]

    q = q.reshape(B, S, n_heads, d_k).transpose(0, 2, 1, 3)   # (B,H,S,dk)
    k = k.reshape(B, S, n_heads, d_k).transpose(0, 2, 3, 1)   # (B,H,dk,S)
    v = v.reshape(B, S, n_heads, d_v).transpose(0, 2, 1, 3)   # (B,H,S,dv)

    scores = jnp.einsum('bhqd,bhdk->bhqk', q, k) * scale
    attn = jax.nn.softmax(scores, axis=-1)
    out = jnp.einsum('bhqk,bhkd->bhqd', attn, v)
    out = out.transpose(0, 2, 1, 3).reshape(B, S, n_heads * d_v)
    out = out @ wo + bo[0]
    return out, attn


def reference_mha_mixed(x, params, *, n_heads, d_k, d_v, compute_dtype):
    """Mirrors the kernel's precision policy: bf16 matmul inputs, f32 accumulate,
    f32 softmax, bf16 attention/value contraction."""
    B, S, D = x.shape
    wq, bq, wk, bk, wv, bv, wo, bo = params
    scale = (D // n_heads) ** -0.5
    cd = compute_dtype

    xc = x.astype(cd)
    q = jnp.dot(xc, wq.astype(cd), preferred_element_type=jnp.float32) + bq
    k = jnp.dot(xc, wk.astype(cd), preferred_element_type=jnp.float32) + bk
    v = jnp.dot(xc, wv.astype(cd), preferred_element_type=jnp.float32) + bv

    q = q.astype(cd).reshape(B, S, n_heads, d_k).transpose(0, 2, 1, 3)
    k = k.astype(cd).reshape(B, S, n_heads, d_k).transpose(0, 2, 1, 3)
    v = v.astype(cd).reshape(B, S, n_heads, d_v).transpose(0, 2, 1, 3)

    scores = jnp.einsum('bhqd,bhkd->bhqk', q, k,
                        preferred_element_type=jnp.float32) * scale
    attn = jax.nn.softmax(scores, axis=-1)
    heads = jnp.einsum('bhqk,bhkd->bhqd', attn.astype(cd), v,
                       preferred_element_type=jnp.float32)
    heads = heads.transpose(0, 2, 1, 3).reshape(B, S, n_heads * d_v)
    out = jnp.dot(heads.astype(cd), wo.astype(cd),
                  preferred_element_type=jnp.float32) + bo
    return out, attn


# ----------------------------------- test -------------------------------------

if __name__ == "__main__":
    # Shapes consistent with PCTrm_model: d_model=16, n_heads=4 (d_k=d_v=4);
    # the encoder self-attention sees (batch*n_vars, patch_num, d_model).
    batch, n_vars = 2, 7
    B = batch * n_vars                 # 14 sequences
    S = 10                             # small patch_num; deliberately not 8-aligned
    d_model, n_heads = 16, 4
    d_k = d_v = d_model // n_heads

    key = jax.random.PRNGKey(0)
    ks = jax.random.split(key, 9)
    x = jax.random.normal(ks[0], (B, S, d_model), dtype=jnp.float32)

    def init_w(k, shape):
        return jax.random.normal(k, shape, dtype=jnp.float32) / np.sqrt(shape[0])

    wq = init_w(ks[1], (d_model, n_heads * d_k))
    wk = init_w(ks[2], (d_model, n_heads * d_k))
    wv = init_w(ks[3], (d_model, n_heads * d_v))
    wo = init_w(ks[4], (n_heads * d_v, d_model))
    bq = 0.02 * jax.random.normal(ks[5], (1, n_heads * d_k), dtype=jnp.float32)
    bk = 0.02 * jax.random.normal(ks[6], (1, n_heads * d_k), dtype=jnp.float32)
    bv = 0.02 * jax.random.normal(ks[7], (1, n_heads * d_v), dtype=jnp.float32)
    bo = 0.02 * jax.random.normal(ks[8], (1, d_model), dtype=jnp.float32)
    params = (wq, bq, wk, bk, wv, bv, wo, bo)

    # --- Run A: optimized bf16 path (attn requested) vs precision-matched ref ---
    out_bf, attn_bf = multihead_attention(x, params, n_heads=n_heads, d_k=d_k,
                                          d_v=d_v, return_attn=True)
    out_bf, attn_bf = jax.block_until_ready((out_bf, attn_bf))
    out_mx, attn_mx = reference_mha_mixed(x, params, n_heads=n_heads, d_k=d_k,
                                          d_v=d_v, compute_dtype=jnp.bfloat16)
    np.testing.assert_allclose(np.asarray(out_bf, dtype=np.float32),
                               np.asarray(out_mx, dtype=np.float32),
                               rtol=2e-2, atol=2e-2)
    np.testing.assert_allclose(np.asarray(attn_bf.astype(jnp.float32)),
                               np.asarray(attn_mx, dtype=np.float32),
                               rtol=2e-2, atol=2e-2)

    # --- Run B: f32 / exact-reciprocal path vs PyTorch-faithful f32 reference ---
    out_f, attn_f = multihead_attention(x, params, n_heads=n_heads, d_k=d_k,
                                        d_v=d_v, compute_dtype=jnp.float32,
                                        approx_reciprocal=False, return_attn=True)
    out_f, attn_f = jax.block_until_ready((out_f, attn_f))
    out_ref, attn_ref = reference_mha_f32(x, params, n_heads=n_heads,
                                          d_k=d_k, d_v=d_v)
    np.testing.assert_allclose(np.asarray(out_f), np.asarray(out_ref),
                               rtol=3e-4, atol=3e-4)
    np.testing.assert_allclose(np.asarray(attn_f), np.asarray(attn_ref),
                               rtol=3e-4, atol=3e-4)

    # --- Run C: default fast path (no attention-weights writeback; this is the
    #            encoder's store_attn=False configuration) ---
    out_fast = multihead_attention(x, params, n_heads=n_heads, d_k=d_k, d_v=d_v)
    out_fast = jax.block_until_ready(out_fast)
    np.testing.assert_allclose(np.asarray(out_fast, dtype=np.float32),
                               np.asarray(out_mx, dtype=np.float32),
                               rtol=2e-2, atol=2e-2)

    print("KERNEL_OK")
</pallas_src>

<mosaic_0001>
module attributes {stable_mosaic.version = 11 : i64} {
  func.func @_mha_kernel(%arg0: i32, %arg1: memref<7x16x16xbf16, #tpu.memory_space<vmem>>, %arg2: memref<16x48xbf16, #tpu.memory_space<vmem>>, %arg3: memref<1x48xf32, #tpu.memory_space<vmem>>, %arg4: memref<16x16xbf16, #tpu.memory_space<vmem>>, %arg5: memref<1x16xf32, #tpu.memory_space<vmem>>, %arg6: memref<7x16x16xf32, #tpu.memory_space<vmem>>, %arg7: memref<7x4x16x16xbf16, #tpu.memory_space<vmem>>) attributes {dimension_semantics = [#tpu.dimension_semantics<parallel>], iteration_bounds = array<i64: 2>, scalar_prefetch = 0 : i64, scratch_operands = 0 : i64, tpu.core_type = #tpu.core_type<tc>, window_params = [{transform_indices = @transform_0, window_bounds = array<i64: 7, 16, 16>}, {pipeline_mode = #tpu.pipeline_mode<synchronous>, transform_indices = @transform_1, window_bounds = array<i64: 16, 48>}, {pipeline_mode = #tpu.pipeline_mode<synchronous>, transform_indices = @transform_2, window_bounds = array<i64: 1, 48>}, {pipeline_mode = #tpu.pipeline_mode<synchronous>, transform_indices = @transform_3, window_bounds = array<i64: 16, 16>}, {pipeline_mode = #tpu.pipeline_mode<synchronous>, transform_indices = @transform_4, window_bounds = array<i64: 1, 16>}, {transform_indices = @transform_5, window_bounds = array<i64: 7, 16, 16>}, {transform_indices = @transform_6, window_bounds = array<i64: 7, 4, 16, 16>}]} {
    %c0 = arith.constant 0 : index
    %c0_0 = arith.constant 0 : index
    %c0_1 = arith.constant 0 : index
    %0 = vector.load %arg1[%c0, %c0_0, %c0_1] : memref<7x16x16xbf16, #tpu.memory_space<vmem>>, vector<7x16x16xbf16>
    %1 = vector.shape_cast %0 : vector<7x16x16xbf16> to vector<112x16xbf16>
    %c0_2 = arith.constant 0 : index
    %c0_3 = arith.constant 0 : index
    %2 = vector.load %arg2[%c0_2, %c0_3] : memref<16x48xbf16, #tpu.memory_space<vmem>>, vector<16x48xbf16>
    %cst = arith.constant dense<0.000000e+00> : vector<112x48xf32>
    %3 = tpu.matmul %1, %2, %cst {dimension_numbers = #tpu.dot_dimension_numbers<[1], [0], [0], [1], [0, 0, 1, 1], [], []>} : vector<112x16xbf16>, vector<16x48xbf16>, vector<112x48xf32> -> vector<112x48xf32>
    %c0_4 = arith.constant 0 : index
    %c0_5 = arith.constant 0 : index
    %4 = vector.load %arg3[%c0_4, %c0_5] : memref<1x48xf32, #tpu.memory_space<vmem>>, vector<1x48xf32>
    %5 = vector.broadcast %4 : vector<1x48xf32> to vector<112x48xf32>
    %6 = arith.addf %3, %5 : vector<112x48xf32>
    %7 = arith.truncf %6 : vector<112x48xf32> to vector<112x48xbf16>
    %8 = tpu.iota {dimensions = array<i32: 2>} : vector<1x16x16xi32>
    %c10_i32 = arith.constant 10 : i32
    %9 = vector.broadcast %c10_i32 : i32 to vector<1x16x16xi32>
    %10 = arith.cmpi slt, %8, %9 : vector<1x16x16xi32>
    %11 = vector.extract_strided_slice %7 {offsets = [0, 0], sizes = [112, 4], strides = [1, 1]} : vector<112x48xbf16> to vector<112x4xbf16>
    %12 = vector.shape_cast %11 : vector<112x4xbf16> to vector<7x16x4xbf16>
    %13 = vector.extract_strided_slice %7 {offsets = [0, 16], sizes = [112, 4], strides = [1, 1]} : vector<112x48xbf16> to vector<112x4xbf16>
    %14 = vector.shape_cast %13 : vector<112x4xbf16> to vector<7x16x4xbf16>
    %15 = vector.extract_strided_slice %7 {offsets = [0, 32], sizes = [112, 4], strides = [1, 1]} : vector<112x48xbf16> to vector<112x4xbf16>
    %16 = vector.shape_cast %15 : vector<112x4xbf16> to vector<7x16x4xbf16>
    "tpu.trace_start"() <{level = 10 : i32, message = "bqd,bkd->bqk"}> : () -> ()
    %cst_6 = arith.constant dense<0.000000e+00> : vector<7x16x16xf32>
    %17 = tpu.matmul %12, %14, %cst_6 {dimension_numbers = #tpu.dot_dimension_numbers<[2], [2], [1], [1], [0, 0, 0, 1, 1, 1], [0], [0]>} : vector<7x16x4xbf16>, vector<7x16x4xbf16>, vector<7x16x16xf32> -> vector<7x16x16xf32>
    "tpu.trace_stop"() : () -> ()
    %cst_7 = arith.constant 5.000000e-01 : f32
    %18 = vector.broadcast %cst_7 : f32 to vector<7x16x16xf32>
    %19 = arith.mulf %17, %18 : vector<7x16x16xf32>
    %cst_8 = arith.constant -1.000000e+30 : f32
    %20 = vector.shape_cast %10 : vector<1x16x16xi1> to vector<1x16x16xi1>
    %21 = vector.broadcast %20 : vector<1x16x16xi1> to vector<7x16x16xi1>
    %22 = vector.broadcast %cst_8 : f32 to vector<7x16x16xf32>
    %23 = arith.select %21, %19, %22 : vector<7x16x16xi1>, vector<7x16x16xf32>
    %cst_9 = arith.constant dense<0xFF800000> : vector<7x16xf32>
    %24 = vector.multi_reduction <maximumf>, %23, %cst_9 [2] : vector<7x16x16xf32> to vector<7x16xf32>
    %25 = vector.shape_cast %24 : vector<7x16xf32> to vector<7x16x1xf32>
    %26 = vector.broadcast %25 : vector<7x16x1xf32> to vector<7x16x16xf32>
    %27 = arith.subf %23, %26 : vector<7x16x16xf32>
    %28 = math.exp %27 : vector<7x16x16xf32>
    %cst_10 = arith.constant dense<0.000000e+00> : vector<7x16xf32>
    %29 = vector.multi_reduction <add>, %28, %cst_10 [2] : vector<7x16x16xf32> to vector<7x16xf32>
    %30 = vector.shape_cast %29 : vector<7x16xf32> to vector<7x16x1xf32>
    %31 = tpu.reciprocal %30 {approx = true} : vector<7x16x1xf32> -> vector<7x16x1xf32>
    %32 = vector.broadcast %31 : vector<7x16x1xf32> to vector<7x16x16xf32>
    %33 = arith.mulf %28, %32 : vector<7x16x16xf32>
    %34 = arith.truncf %33 : vector<7x16x16xf32> to vector<7x16x16xbf16>
    "tpu.trace_start"() <{level = 10 : i32, message = "bqk,bkd->bqd"}> : () -> ()
    %cst_11 = arith.constant dense<0.000000e+00> : vector<7x16x4xf32>
    %35 = tpu.matmul %34, %16, %cst_11 {dimension_numbers = #tpu.dot_dimension_numbers<[2], [1], [1], [2], [0, 0, 0, 1, 1, 2], [0], [0]>} : vector<7x16x16xbf16>, vector<7x16x4xbf16>, vector<7x16x4xf32> -> vector<7x16x4xf32>
    "tpu.trace_stop"() : () -> ()
    %36 = vector.shape_cast %35 : vector<7x16x4xf32> to vector<112x4xf32>
    %37 = vector.extract_strided_slice %7 {offsets = [0, 4], sizes = [112, 4], strides = [1, 1]} : vector<112x48xbf16> to vector<112x4xbf16>
    %38 = vector.shape_cast %37 : vector<112x4xbf16> to vector<7x16x4xbf16>
    %39 = vector.extract_strided_slice %7 {offsets = [0, 20], sizes = [112, 4], strides = [1, 1]} : vector<112x48xbf16> to vector<112x4xbf16>
    %40 = vector.shape_cast %39 : vector<112x4xbf16> to vector<7x16x4xbf16>
    %41 = vector.extract_strided_slice %7 {offsets = [0, 36], sizes = [112, 4], strides = [1, 1]} : vector<112x48xbf16> to vector<112x4xbf16>
    %42 = vector.shape_cast %41 : vector<112x4xbf16> to vector<7x16x4xbf16>
    "tpu.trace_start"() <{level = 10 : i32, message = "bqd,bkd->bqk"}> : () -> ()
    %cst_12 = arith.constant dense<0.000000e+00> : vector<7x16x16xf32>
    %43 = tpu.matmul %38, %40, %cst_12 {dimension_numbers = #tpu.dot_dimension_numbers<[2], [2], [1], [1], [0, 0, 0, 1, 1, 1], [0], [0]>} : vector<7x16x4xbf16>, vector<7x16x4xbf16>, vector<7x16x16xf32> -> vector<7x16x16xf32>
    "tpu.trace_stop"() : () -> ()
    %cst_13 = arith.constant 5.000000e-01 : f32
    %44 = vector.broadcast %cst_13 : f32 to vector<7x16x16xf32>
    %45 = arith.mulf %43, %44 : vector<7x16x16xf32>
    %cst_14 = arith.constant -1.000000e+30 : f32
    %46 = vector.shape_cast %10 : vector<1x16x16xi1> to vector<1x16x16xi1>
    %47 = vector.broadcast %46 : vector<1x16x16xi1> to vector<7x16x16xi1>
    %48 = vector.broadcast %cst_14 : f32 to vector<7x16x16xf32>
    %49 = arith.select %47, %45, %48 : vector<7x16x16xi1>, vector<7x16x16xf32>
    %cst_15 = arith.constant dense<0xFF800000> : vector<7x16xf32>
    %50 = vector.multi_reduction <maximumf>, %49, %cst_15 [2] : vector<7x16x16xf32> to vector<7x16xf32>
    %51 = vector.shape_cast %50 : vector<7x16xf32> to vector<7x16x1xf32>
    %52 = vector.broadcast %51 : vector<7x16x1xf32> to vector<7x16x16xf32>
    %53 = arith.subf %49, %52 : vector<7x16x16xf32>
    %54 = math.exp %53 : vector<7x16x16xf32>
    %cst_16 = arith.constant dense<0.000000e+00> : vector<7x16xf32>
    %55 = vector.multi_reduction <add>, %54, %cst_16 [2] : vector<7x16x16xf32> to vector<7x16xf32>
    %56 = vector.shape_cast %55 : vector<7x16xf32> to vector<7x16x1xf32>
    %57 = tpu.reciprocal %56 {approx = true} : vector<7x16x1xf32> -> vector<7x16x1xf32>
    %58 = vector.broadcast %57 : vector<7x16x1xf32> to vector<7x16x16xf32>
    %59 = arith.mulf %54, %58 : vector<7x16x16xf32>
    %60 = arith.truncf %59 : vector<7x16x16xf32> to vector<7x16x16xbf16>
    "tpu.trace_start"() <{level = 10 : i32, message = "bqk,bkd->bqd"}> : () -> ()
    %cst_17 = arith.constant dense<0.000000e+00> : vector<7x16x4xf32>
    %61 = tpu.matmul %60, %42, %cst_17 {dimension_numbers = #tpu.dot_dimension_numbers<[2], [1], [1], [2], [0, 0, 0, 1, 1, 2], [0], [0]>} : vector<7x16x16xbf16>, vector<7x16x4xbf16>, vector<7x16x4xf32> -> vector<7x16x4xf32>
    "tpu.trace_stop"() : () -> ()
    %62 = vector.shape_cast %61 : vector<7x16x4xf32> to vector<112x4xf32>
    %63 = vector.extract_strided_slice %7 {offsets = [0, 8], sizes = [112, 4], strides = [1, 1]} : vector<112x48xbf16> to vector<112x4xbf16>
    %64 = vector.shape_cast %63 : vector<112x4xbf16> to vector<7x16x4xbf16>
    %65 = vector.extract_strided_slice %7 {offsets = [0, 24], sizes = [112, 4], strides = [1, 1]} : vector<112x48xbf16> to vector<112x4xbf16>
    %66 = vector.shape_cast %65 : vector<112x4xbf16> to vector<7x16x4xbf16>
    %67 = vector.extract_strided_slice %7 {offsets = [0, 40], sizes = [112, 4], strides = [1, 1]} : vector<112x48xbf16> to vector<112x4xbf16>
    %68 = vector.shape_cast %67 : vector<112x4xbf16> to vector<7x16x4xbf16>
    "tpu.trace_start"() <{level = 10 : i32, message = "bqd,bkd->bqk"}> : () -> ()
    %cst_18 = arith.constant dense<0.000000e+00> : vector<7x16x16xf32>
    %69 = tpu.matmul %64, %66, %cst_18 {dimension_numbers = #tpu.dot_dimension_numbers<[2], [2], [1], [1], [0, 0, 0, 1, 1, 1], [0], [0]>} : vector<7x16x4xbf16>, vector<7x16x4xbf16>, vector<7x16x16xf32> -> vector<7x16x16xf32>
    "tpu.trace_stop"() : () -> ()
    %cst_19 = arith.constant 5.000000e-01 : f32
    %70 = vector.broadcast %cst_19 : f32 to vector<7x16x16xf32>
    %71 = arith.mulf %69, %70 : vector<7x16x16xf32>
    %cst_20 = arith.constant -1.000000e+30 : f32
    %72 = vector.shape_cast %10 : vector<1x16x16xi1> to vector<1x16x16xi1>
    %73 = vector.broadcast %72 : vector<1x16x16xi1> to vector<7x16x16xi1>
    %74 = vector.broadcast %cst_20 : f32 to vector<7x16x16xf32>
    %75 = arith.select %73, %71, %74 : vector<7x16x16xi1>, vector<7x16x16xf32>
    %cst_21 = arith.constant dense<0xFF800000> : vector<7x16xf32>
    %76 = vector.multi_reduction <maximumf>, %75, %cst_21 [2] : vector<7x16x16xf32> to vector<7x16xf32>
    %77 = vector.shape_cast %76 : vector<7x16xf32> to vector<7x16x1xf32>
    %78 = vector.broadcast %77 : vector<7x16x1xf32> to vector<7x16x16xf32>
    %79 = arith.subf %75, %78 : vector<7x16x16xf32>
    %80 = math.exp %79 : vector<7x16x16xf32>
    %cst_22 = arith.constant dense<0.000000e+00> : vector<7x16xf32>
    %81 = vector.multi_reduction <add>, %80, %cst_22 [2] : vector<7x16x16xf32> to vector<7x16xf32>
    %82 = vector.shape_cast %81 : vector<7x16xf32> to vector<7x16x1xf32>
    %83 = tpu.reciprocal %82 {approx = true} : vector<7x16x1xf32> -> vector<7x16x1xf32>
    %84 = vector.broadcast %83 : vector<7x16x1xf32> to vector<7x16x16xf32>
    %85 = arith.mulf %80, %84 : vector<7x16x16xf32>
    %86 = arith.truncf %85 : vector<7x16x16xf32> to vector<7x16x16xbf16>
    "tpu.trace_start"() <{level = 10 : i32, message = "bqk,bkd->bqd"}> : () -> ()
    %cst_23 = arith.constant dense<0.000000e+00> : vector<7x16x4xf32>
    %87 = tpu.matmul %86, %68, %cst_23 {dimension_numbers = #tpu.dot_dimension_numbers<[2], [1], [1], [2], [0, 0, 0, 1, 1, 2], [0], [0]>} : vector<7x16x16xbf16>, vector<7x16x4xbf16>, vector<7x16x4xf32> -> vector<7x16x4xf32>
    "tpu.trace_stop"() : () -> ()
    %88 = vector.shape_cast %87 : vector<7x16x4xf32> to vector<112x4xf32>
    %89 = vector.extract_strided_slice %7 {offsets = [0, 12], sizes = [112, 4], strides = [1, 1]} : vector<112x48xbf16> to vector<112x4xbf16>
    %90 = vector.shape_cast %89 : vector<112x4xbf16> to vector<7x16x4xbf16>
    %91 = vector.extract_strided_slice %7 {offsets = [0, 28], sizes = [112, 4], strides = [1, 1]} : vector<112x48xbf16> to vector<112x4xbf16>
    %92 = vector.shape_cast %91 : vector<112x4xbf16> to vector<7x16x4xbf16>
    %93 = vector.extract_strided_slice %7 {offsets = [0, 44], sizes = [112, 4], strides = [1, 1]} : vector<112x48xbf16> to vector<112x4xbf16>
    %94 = vector.shape_cast %93 : vector<112x4xbf16> to vector<7x16x4xbf16>
    "tpu.trace_start"() <{level = 10 : i32, message = "bqd,bkd->bqk"}> : () -> ()
    %cst_24 = arith.constant dense<0.000000e+00> : vector<7x16x16xf32>
    %95 = tpu.matmul %90, %92, %cst_24 {dimension_numbers = #tpu.dot_dimension_numbers<[2], [2], [1], [1], [0, 0, 0, 1, 1, 1], [0], [0]>} : vector<7x16x4xbf16>, vector<7x16x4xbf16>, vector<7x16x16xf32> -> vector<7x16x16xf32>
    "tpu.trace_stop"() : () -> ()
    %cst_25 = arith.constant 5.000000e-01 : f32
    %96 = vector.broadcast %cst_25 : f32 to vector<7x16x16xf32>
    %97 = arith.mulf %95, %96 : vector<7x16x16xf32>
    %cst_26 = arith.constant -1.000000e+30 : f32
    %98 = vector.shape_cast %10 : vector<1x16x16xi1> to vector<1x16x16xi1>
    %99 = vector.broadcast %98 : vector<1x16x16xi1> to vector<7x16x16xi1>
    %100 = vector.broadcast %cst_26 : f32 to vector<7x16x16xf32>
    %101 = arith.select %99, %97, %100 : vector<7x16x16xi1>, vector<7x16x16xf32>
    %cst_27 = arith.constant dense<0xFF800000> : vector<7x16xf32>
    %102 = vector.multi_reduction <maximumf>, %101, %cst_27 [2] : vector<7x16x16xf32> to vector<7x16xf32>
    %103 = vector.shape_cast %102 : vector<7x16xf32> to vector<7x16x1xf32>
    %104 = vector.broadcast %103 : vector<7x16x1xf32> to vector<7x16x16xf32>
    %105 = arith.subf %101, %104 : vector<7x16x16xf32>
    %106 = math.exp %105 : vector<7x16x16xf32>
    %cst_28 = arith.constant dense<0.000000e+00> : vector<7x16xf32>
    %107 = vector.multi_reduction <add>, %106, %cst_28 [2] : vector<7x16x16xf32> to vector<7x16xf32>
    %108 = vector.shape_cast %107 : vector<7x16xf32> to vector<7x16x1xf32>
    %109 = tpu.reciprocal %108 {approx = true} : vector<7x16x1xf32> -> vector<7x16x1xf32>
    %110 = vector.broadcast %109 : vector<7x16x1xf32> to vector<7x16x16xf32>
    %111 = arith.mulf %106, %110 : vector<7x16x16xf32>
    %112 = arith.truncf %111 : vector<7x16x16xf32> to vector<7x16x16xbf16>
    "tpu.trace_start"() <{level = 10 : i32, message = "bqk,bkd->bqd"}> : () -> ()
    %cst_29 = arith.constant dense<0.000000e+00> : vector<7x16x4xf32>
    %113 = tpu.matmul %112, %94, %cst_29 {dimension_numbers = #tpu.dot_dimension_numbers<[2], [1], [1], [2], [0, 0, 0, 1, 1, 2], [0], [0]>} : vector<7x16x16xbf16>, vector<7x16x4xbf16>, vector<7x16x4xf32> -> vector<7x16x4xf32>
    "tpu.trace_stop"() : () -> ()
    %114 = vector.shape_cast %113 : vector<7x16x4xf32> to vector<112x4xf32>
    %115 = vector.shape_cast %33 : vector<7x16x16xf32> to vector<7x1x16x16xf32>
    %116 = vector.shape_cast %59 : vector<7x16x16xf32> to vector<7x1x16x16xf32>
    %117 = vector.shape_cast %85 : vector<7x16x16xf32> to vector<7x1x16x16xf32>
    %118 = vector.shape_cast %111 : vector<7x16x16xf32> to vector<7x1x16x16xf32>
    %119 = tpu.concatenate %115, %116, %117, %118 in 1 : vector<7x1x16x16xf32>, vector<7x1x16x16xf32>, vector<7x1x16x16xf32>, vector<7x1x16x16xf32> -> vector<7x4x16x16xf32>
    %120 = arith.truncf %119 : vector<7x4x16x16xf32> to vector<7x4x16x16xbf16>
    %c0_30 = arith.constant 0 : index
    %c0_31 = arith.constant 0 : index
    %c0_32 = arith.constant 0 : index
    %c0_33 = arith.constant 0 : index
    %121 = vector.load %arg7[%c0_30, %c0_31, %c0_32, %c0_33] : memref<7x4x16x16xbf16, #tpu.memory_space<vmem>>, vector<7x4x16x16xbf16>
    tpu.vector_store %arg7[%c0_30, %c0_31, %c0_32, %c0_33], %120 {strides = array<i32>} : memref<7x4x16x16xbf16, #tpu.memory_space<vmem>>, vector<7x4x16x16xbf16>,
    %122 = tpu.concatenate %36, %62, %88, %114 in 1 : vector<112x4xf32>, vector<112x4xf32>, vector<112x4xf32>, vector<112x4xf32> -> vector<112x16xf32>
    %123 = arith.truncf %122 : vector<112x16xf32> to vector<112x16xbf16>
    %c0_34 = arith.constant 0 : index
    %c0_35 = arith.constant 0 : index
    %124 = vector.load %arg4[%c0_34, %c0_35] : memref<16x16xbf16, #tpu.memory_space<vmem>>, vector<16x16xbf16>
    %cst_36 = arith.constant dense<0.000000e+00> : vector<112x16xf32>
    %125 = tpu.matmul %123, %124, %cst_36 {dimension_numbers = #tpu.dot_dimension_numbers<[1], [0], [0], [1], [0, 0, 1, 1], [], []>} : vector<112x16xbf16>, vector<16x16xbf16>, vector<112x16xf32> -> vector<112x16xf32>
    %c0_37 = arith.constant 0 : index
    %c0_38 = arith.constant 0 : index
    %126 = vector.load %arg5[%c0_37, %c0_38] : memref<1x16xf32, #tpu.memory_space<vmem>>, vector<1x16xf32>
    %127 = vector.broadcast %126 : vector<1x16xf32> to vector<112x16xf32>
    %128 = arith.addf %125, %127 : vector<112x16xf32>
    %129 = vector.shape_cast %128 : vector<112x16xf32> to vector<7x16x16xf32>
    %c0_39 = arith.constant 0 : index
    %c0_40 = arith.constant 0 : index
    %c0_41 = arith.constant 0 : index
    %130 = vector.load %arg6[%c0_39, %c0_40, %c0_41] : memref<7x16x16xf32, #tpu.memory_space<vmem>>, vector<7x16x16xf32>
    tpu.vector_store %arg6[%c0_39, %c0_40, %c0_41], %129 {strides = array<i32>} : memref<7x16x16xf32, #tpu.memory_space<vmem>>, vector<7x16x16xf32>,
    return
  }
  func.func @transform_0(%arg0: i32) -> (i32, i32, i32) {
    %c0_i32 = arith.constant 0 : i32
    %c0_i32_0 = arith.constant 0 : i32
    %c0_i32_1 = arith.constant 0 : i32
    return %arg0, %c0_i32, %c0_i32_0 : i32, i32, i32
  }
  func.func @transform_1(%arg0: i32) -> (i32, i32) {
    %c0_i32 = arith.constant 0 : i32
    %c0_i32_0 = arith.constant 0 : i32
    %c0_i32_1 = arith.constant 0 : i32
    return %c0_i32, %c0_i32_0 : i32, i32
  }
  func.func @transform_2(%arg0: i32) -> (i32, i32) {
    %c0_i32 = arith.constant 0 : i32
    %c0_i32_0 = arith.constant 0 : i32
    %c0_i32_1 = arith.constant 0 : i32
    return %c0_i32, %c0_i32_0 : i32, i32
  }
  func.func @transform_3(%arg0: i32) -> (i32, i32) {
    %c0_i32 = arith.constant 0 : i32
    %c0_i32_0 = arith.constant 0 : i32
    %c0_i32_1 = arith.constant 0 : i32
    return %c0_i32, %c0_i32_0 : i32, i32
  }
  func.func @transform_4(%arg0: i32) -> (i32, i32) {
    %c0_i32 = arith.constant 0 : i32
    %c0_i32_0 = arith.constant 0 : i32
    %c0_i32_1 = arith.constant 0 : i32
    return %c0_i32, %c0_i32_0 : i32, i32
  }
  func.func @transform_5(%arg0: i32) -> (i32, i32, i32) {
    %c0_i32 = arith.constant 0 : i32
    %c0_i32_0 = arith.constant 0 : i32
    %c0_i32_1 = arith.constant 0 : i32
    return %arg0, %c0_i32, %c0_i32_0 : i32, i32, i32
  }
  func.func @transform_6(%arg0: i32) -> (i32, i32, i32, i32) {
    %c0_i32 = arith.constant 0 : i32
    %c0_i32_0 = arith.constant 0 : i32
    %c0_i32_1 = arith.constant 0 : i32
    %c0_i32_2 = arith.constant 0 : i32
    return %arg0, %c0_i32, %c0_i32_0, %c0_i32_1 : i32, i32, i32, i32
  }
}

</mosaic_0001>

<bundles_post_ra>
// kernel: tpu_custom_call.1
= control target key start
LH: loop header
LB: loop body
LE: loop exit
PB: predicated region body
PF: predicated region fallthrough
CT: control target
= control target key end

     0   :  { %12 = vsyncpa [#allocation3], 0  ;;  %s7954_s0 = inlined_call_operand.hbm [shape: bf16[14,16,16], index: 0, kind: input, shape index: {}]   ;;  %s7955_s1 = inlined_call_operand.hbm [shape: bf16[16,48], index: 1, kind: input, shape index: {}]   ;;  %s7956_s2 = inlined_call_operand.vmem [shape: f32[1,48], index: 2, kind: input, shape index: {}]   ;;  %s7957_s3 = inlined_call_operand.vmem [shape: bf16[16,16], index: 3, kind: input, shape index: {}]   ;;  %s7958_s4 = inlined_call_operand.vmem [shape: f32[1,16], index: 4, kind: input, shape index: {}]   ;;  %s7959_s5 = inlined_call_operand.hbm [shape: f32[14,16,16], index: 5, kind: output, shape index: {0}]   ;;  %s7960_s6 = inlined_call_operand.hbm [shape: bf16[14,4,16,16], index: 6, kind: output, shape index: {1}]  }
   0x1   :  { %14 = vsyncpa [#allocation3 + $0x1], 0 }
   0x2   :  { %15 = vsyncpa [#allocation6], 0 }
   0x3   :  { %16 = vsyncpa [#allocation4], 0 }
   0x4   :  { %18 = vsyncpa [#allocation4 + $0x1], 0 }
   0x5   :  { %19 = vsyncpa [#allocation9], 0 }
   0x6   :  { %21 = vsyncpa [#allocation9 + $0x1], 0  ;;  %s6132_s21 = smov 0   ;;  %s6134_s22 = smov 0  }
   0x7   :  { %s6136_s23 = smov 0   ;;  %s6138_s24 = smov 0  }
   0x8 LB: > { %s6153_s25 = sadd.s32 4294967295, %s6071_s24   ;;  %s4745_s26 = sadd.s32 4294967294, %s6071_s24   ;;  %s6071_s24 = sphi %s6138_s24, %s8027_s24   ;;  %s6067_s23 = sphi %s6136_s23, %s8026_s23   ;;  %s6063_s22 = sphi %s6134_s22, %s8025_s22   ;;  %s6059_s21 = sphi %s6132_s21, %s8024_s21  }
   0x9   : > { %p47_p0 = scmp.ne.s32.totalorder %s6063_s22, %s6059_s21  ;;  %p7961_p1 = scmp.eq.s32.totalorder %s6153_s25, 0 }
   0xa   : > { %p161_p3 = scmp.eq.s32.totalorder %s4745_s26, 1  ;;  %p4746_p5 = scmp.ge.s32.totalorder %s6071_s24, 1 }
   0xb   : > { %p6162_p4 = por %p7961_p1, %p47_p0  ;;  %p194_p7 = scmp.lt.s32.totalorder %s6071_s24, 3 }
   0xc   : > { %p6167_p6 = por %p161_p3, %p47_p0  ;;  %s6073_s30 = smov [#allocation5]  }
   0xd   : > { %s7970_s27 = scalar_select %p6162_p4, 1, 0 }
   0xe   : > { %s7971_s28 = scalar_select %p6167_p6, 1, 0 }
   0xf   : > { %p6172_p8 = pnand %p4746_p5, %p194_p7  ;;  %s206_s7 = sshll.u32 %s6073_s30, 4  ;;  %s6176_s7 = int_to_ptr.vmem [resolvable:$true] %s206_s7 }
  0x10   : > { %s6188_s9 = sadd.s32 1, %s6071_s24   ;;  %s34_s10 = sadd.s32 1, %s6067_s23 }
  0x11   : > { %s7972_s29 = scalar_select %p6172_p8, 1, 0 }
  0x12   : > { %p5501_p9 = pneg %p6172_p8  ;;  %s31_s11 = ssub.s32 %s6071_s24, %s6188_s9 }
  0x13   : > { %s5911_s14 = scalar_lea.hbm %s7955_s1, 128 }
  0x14   : > { %p6183_p11 = pnand %p5501_p9, %p7961_p1  ;;  %p5912_p12 = scmp.ne.s32.totalorder %s7955_s1, %s5911_s14 }
  0x15   : > { %p5918_p5 = scmp.lt.u32.totalorder %s5911_s14, %s7955_s1 }
  0x16   : > { %p5913_p13 = pneg %p6183_p11 }
  0x18   : > { %p5914_p0 = pnand %p5913_p13, %p5912_p12 }
  0x1a   : > { %p5915_p3 = pneg %p5914_p0 }
  0x1c   : > { %p5920_p7 = pnand %p5918_p5, %p5915_p3 }
  0x1e   : > { %5923 = shalt.err (!%p5920_p7)
}
  0x1f   : > { %s5924_s19 = scalar_lea.vmem %s6176_s7, 128  ;;  %p5932_p2 = scmp.lt.s32.totalorder %s6176_s7, %s6176_s7 }
  0x20   : > { %p5925_p9 = scmp.ne.s32.totalorder %s6176_s7, %s5924_s19  ;;  %p5933_p6 = scmp.lt.s32.totalorder %s5924_s19, %s5924_s19 }
  0x22   : > { %p5927_p10 = pnand %p5925_p9, %p5913_p13  ;;  %p5934_p4 = por %p5933_p6, %p5932_p2 }
  0x24   : > { %p5928_p1 = pneg %p5927_p10 }
  0x26   : > { %p5935_p8 = pnand %p5934_p4, %p5928_p1 }
  0x28   : > { %5938 = shalt.err (!%p5935_p8)
}
  0x29   : > { %s7964_s20 = smov 64   ;;  %s7965_s26 = smov 4  }
  0x2a   : > { %5504 = dma.hbm_to_vmem [thread:$0]  (!%p6183_p11), %s7955_s1, 128, %s6176_s7, [#allocation6], %s7964_s20, %s7964_s20, %s7965_s26  }
  0x2b   : > { %p32_p1 = scmp.eq.s32.totalorder %s31_s11, 0  ;;  %p41_p2 = scmp.ne.s32.totalorder %s6067_s23, %s6063_s22 }
  0x2c   : > { %p42_p4 = scmp.eq.s32.totalorder %s6071_s24, 0  ;;  %p5517_p6 = scmp.lt.s32.totalorder %s6071_s24, 2 }
  0x2d   : > { %s6222_s13 = scalar_select %p32_p1, %s6067_s23, %s34_s10  }
  0x2e   : > { %p43_p8 = por %p42_p4, %p41_p2  ;;  %p7974_p10 = scmp.eq.s32.totalorder %s6153_s25, 1 }
  0x2f   : > { %s229_s8 = sand.u32 1, %s6067_s23   ;;  %s4958_s15 = smul.u32 896, %s6071_s24 }
  0x30   : > { %p6226_p12 = por %p7974_p10, %p41_p2  ;;  %s5487_s16 = smul.u32 56, %s229_s8 }
  0x31   : > { %p6232_p13 = pnand %p5517_p6, %p43_p8  ;;  %s6239_s10 = scalar_lea.hbm %s7954_s0, %s4958_s15 }
  0x32   : > { %s233_s18 = scalar_lea.vmem [#allocation2], %s5487_s16  ;;  %s6243_s30 = scalar_lea.sflag [#allocation3], %s229_s8 }
  0x33   : > { %s241_s19 = sshll.u32 %s233_s18, 4  ;;  %s5939_s12 = scalar_lea.hbm %s6239_s10, 896  ;;  %s6241_s19 = int_to_ptr.vmem [resolvable:$true] %s241_s19 }
  0x34   : > { %p5940_p11 = scmp.ne.s32.totalorder %s6239_s10, %s5939_s12  ;;  %p5941_p0 = pneg %p6232_p13 }
  0x35   : > { %s5944_s11 = scalar_lea.hbm %s7954_s0, 1792  ;;  %p5945_p7 = scmp.lt.u32.totalorder %s6239_s10, %s7954_s0 }
  0x36   : > { %p5942_p3 = pnand %p5941_p0, %p5940_p11  ;;  %p5946_p9 = scmp.lt.u32.totalorder %s5944_s11, %s5939_s12 }
  0x37   : > { %p5948_p2 = scmp.lt.u32.totalorder %s5939_s12, %s6239_s10 }
  0x38   : > { %p5943_p5 = pneg %p5942_p3  ;;  %p5947_p1 = por %p5946_p9, %p5945_p7 }
  0x3a   : > { %p5949_p4 = por %p5948_p2, %p5947_p1 }
  0x3c   : > { %p5950_p6 = pnand %p5949_p4, %p5943_p5 }
  0x3e   : > { %5953 = shalt.err (!%p5950_p6)
}
  0x3f   : > { %s5954_s8 = scalar_lea.vmem %s6241_s19, 896  ;;  %s6076_s16 = smov [#allocation2]  }
  0x40   : > { %p5955_p8 = scmp.ne.s32.totalorder %s6241_s19, %s5954_s8  ;;  %s5959_s18 = sshll.u32 %s6076_s16, 4  ;;  %s5960_s18 = int_to_ptr.vmem [resolvable:$false] %s5959_s18 }
  0x41   : > { %s5961_s20 = scalar_lea.vmem %s5960_s18, 1792  ;;  %p5962_p3 = scmp.lt.s32.totalorder %s6241_s19, %s5960_s18 }
  0x42   : > { %p5957_p10 = pnand %p5955_p8, %p5941_p0  ;;  %p5963_p7 = scmp.lt.s32.totalorder %s5961_s20, %s5954_s8 }
  0x44   : > { %p5958_p11 = pneg %p5957_p10  ;;  %p5964_p9 = por %p5963_p7, %p5962_p3 }
  0x46   : > { %p5965_p1 = pnand %p5964_p9, %p5958_p11 }
  0x48   : > { %5968 = shalt.err (!%p5965_p1)
}
  0x49   : > { %s7977_s26 = smov 4   ;;  %s7978_s12 = smov 64  }
  0x4a   : > { %5508 = dma.hbm_to_vmem [thread:$0]  (!%p6232_p13), %s6239_s10, 896, %s6241_s19, %s6243_s30, %s7978_s12, %s7978_s12, %s7977_s26  }
  0x4b   : > { %p7979_p0 = scmp.ne.s32.totalorder %s7972_s29, 0 }
  0x4d   : > { %253 = sbr.rel (%p7979_p0) target bundleno = 3538 (0xdd2), region = 40 }
  0x54   : > { %s6277_s15 = sand.u32 1, %s6063_s22   ;;  %p7980_p5 = scmp.ne.s32.totalorder %s7970_s27, 0 }
  0x55   : > { %s5488_s7 = smul.u32 56, %s6277_s15  ;;  %s256_s11 = scalar_lea.sflag [#allocation3], %s6277_s15 }
  0x57   : > { %s6281_s8 = scalar_lea.vmem [#allocation2], %s5488_s7 }
  0x58   : > { %6042 = dma.done.wait (%p7980_p5), %s256_s11, 896  }
  0x59   : > { %6044 = vsyncadd (%p7980_p5), %s256_s11, 4294966400  ;;  %p7981_p13 = scmp.eq.s32.totalorder %s6153_s25, 0 }
  0x5b   : > { %6046 = dma.done.wait (%p7981_p13), [#allocation6], 128   ;;  %p7982_p2 = pmov %p7981_p13 }
  0x5c   : > { %v7966_v0 = vmov 0.0   ;;  %vm6078_vm0 = vmmov 0   ;;  %v5678_v1 = vld [vmem:[#allocation5] sm:$0xff]   ;;  %v5679_v2 = vld [vmem:[%s6281_s8] sm:$0xff]   ;;  %vm365_vm1 = vcmask 130048   ;;  %v5680_v3 = vld [vmem:[%s6281_s8 + $0x8] sm:$0xff]  }
  0x5d   : > { %6048 = vsyncadd (%p7982_p2), [#allocation6], 4294967168  ;;  %5089 = vmatprep.subr.bf16.mxu0 %v7966_v0  ;;  %5091 = vmatprep.mubr.msk.bf16.mxu0 %vm6078_vm0, %v7966_v0  ;;  %v5681_v4 = vld [vmem:[%s6281_s8 + $0x10] sm:$0xff]   ;;  %v5682_v5 = vld [vmem:[%s6281_s8 + $0x18] sm:$0xff]   ;;  %s6079_s17 = smov 112   ;;  %vm489_vm2 = vcmask 31744  }
  0x5e   : > { %5119 = vmatprep.subr.bf16.mxu1 %v7966_v0  ;;  %5121 = vmatprep.mubr.msk.bf16.mxu1 %vm6078_vm0, %v7966_v0  ;;  %v5683_v6 = vld [vmem:[%s6281_s8 + $0x20] sm:$0xff]   ;;  %v5684_v7 = vld [vmem:[%s6281_s8 + $0x28] sm:$0xff]   ;;  %v5685_v8 = vld [vmem:[%s6281_s8 + $0x30] sm:$0xff]   ;;  %s6080_s10 = smov 96   ;;  %s6081_s19 = smov 108   ;;  %vm4178_vm4 = vcmask 125952  }
  0x5f   : > { %5090 = vmatpush3.bf16.msra.mxu0 %v5678_v1  ;;  %v4753_v9 = vld [vmem:[%s7956_s2] ss:$0 sm:$0xff]  ;;  %s6082_s30 = smov 124   ;;  %s6083_s16 = smov 92   ;;  %vm4417_vm5 = vcmask 64512   ;;  %vm4432_vm6 = vcmask 97280  }
  0x60   : > { %5161 = vmatprep.subr.bf16.mxu0 %v7966_v0  ;;  %s5490_s18 = smul.u32 224, %s6277_s15  ;;  %s6084_s26 = smov 104  }
  0x61   : > { %s6085_s12 = smov 120   ;;  %s6086_s7 = smov 88  }
  0x62   : > { %5092 = vmatmul.mubr.msk.bf16.vlgmr.msra.gmra.mrb[0].mxu0 %vm365_vm1, %v5679_v2  ;;  %s6594_s20 = scalar_lea.vmem [#allocation8], %s5490_s18  ;;  %s6087_s11 = smov 100  }
  0x63   : > { %5095 = vmatprep.mubr.msk.bf16.mxu0 %vm6078_vm0, %v7966_v0  ;;  %s6088_s8 = smov 116   ;;  %s6089_s27 = smov 84  }
  0x64   : > { %s6090_s29 = smov 4  }
  0x6a   : > { %5096 = vmatmul.mubr.msk.bf16.gmra.mrb[4].mxu0 %vm365_vm1, %v5680_v3 }
  0x6b   : > { %5099 = vmatprep.mubr.msk.bf16.mxu0 %vm6078_vm0, %v7966_v0 }
  0x72   : > { %5100 = vmatmul.mubr.msk.bf16.gmra.mrb[8].mxu0 %vm365_vm1, %v5681_v4 }
  0x73   : > { %5103 = vmatprep.mubr.msk.bf16.mxu0 %vm6078_vm0, %v7966_v0 }
  0x7a   : > { %5104 = vmatmul.mubr.msk.bf16.gmra.mrb[12].mxu0 %vm365_vm1, %v5682_v5 }
  0x7b   : > { %5107 = vmatprep.mubr.msk.bf16.mxu0 %vm6078_vm0, %v7966_v0 }
  0x82   : > { %5108 = vmatmul.mubr.msk.bf16.gmra.mrb[16].mxu0 %vm365_vm1, %v5683_v6 }
  0x83   : > { %5111 = vmatprep.mubr.msk.bf16.mxu0 %vm6078_vm0, %v7966_v0 }
  0x8a   : > { %5112 = vmatmul.mubr.msk.bf16.gmra.mrb[20].mxu0 %vm365_vm1, %v5684_v7 }
  0x8b   : > { %5115 = vmatprep.mubr.msk.bf16.mxu0 %vm6078_vm0, %v7966_v0 }
  0x92   : > { %5116 = vmatmul.mubr.msk.bf16.gmra.mrb[24].mxu0 %vm365_vm1, %v5685_v8 }
  0x93   : > { %5163 = vmatprep.mubr.msk.bf16.mxu0 %vm6078_vm0, %v7966_v0 }
 0x135   : > { %v421_v10 = vpop.f32.mrb[0].mxu0 }
 0x136   : > { %v5093_v11 = vpop.f32.mrb[1].mxu0  ;;  %v422_v13 = vadd.f32 %v4753_v9, %v421_v10  ;;  %v483_v10 = vlaneseq }
 0x137   : > { %v424_v12 = vpop.f32.mrb[2].mxu0 }
 0x138   : > { %v425_v14 = vadd.f32 %v4753_v9, %v424_v12  ;;  %v5094_v15 = vpop.f32.mrb[3].mxu0  ;;  %v6399_v11 = vand.u32 127, %v483_v10 }
 0x13a   : > { %v6329_v16 = vpack.c.bf16 %v425_v14, %v422_v13  ;;  %vm485_vm3 = vcmp.lt.s32.totalorder %v6399_v11, 10 }
 0x13c   : > { %487 = vrot.lane.b32.xlu0 %v6329_v16, %s6079_s17 }
 0x13d   : > { %v429_v17 = vpop.f32.mrb[4].mxu0 }
 0x13e   : > { %v5097_v18 = vpop.f32.mrb[5].mxu0  ;;  %v430_v20 = vadd.f32 %v4753_v9, %v429_v17 }
 0x13f   : > { %v432_v19 = vpop.f32.mrb[6].mxu0 }
 0x140   : > { %v433_v21 = vadd.f32 %v4753_v9, %v432_v19  ;;  %v5098_v22 = vpop.f32.mrb[7].mxu0 }
 0x142   : > { %v6333_v23 = vpack.c.bf16 %v433_v21, %v430_v20 }
 0x144   : > { %538 = vrot.lane.b32.xlu0 %v6333_v23, %s6079_s17 }
 0x145   : > { %v437_v24 = vpop.f32.mrb[8].mxu0 }
 0x146   : > { %v5101_v25 = vpop.f32.mrb[9].mxu0  ;;  %v438_v27 = vadd.f32 %v4753_v9, %v437_v24 }
 0x147   : > { %v440_v26 = vpop.f32.mrb[10].mxu0 }
 0x148   : > { %v441_v28 = vadd.f32 %v4753_v9, %v440_v26  ;;  %v5102_v29 = vpop.f32.mrb[11].mxu0 }
 0x14a   : > { %v6337_v30 = vpack.c.bf16 %v441_v28, %v438_v27 }
 0x14c   : > { %588 = vrot.lane.b32.xlu1 %v6337_v30, %s6079_s17 }
 0x14d   : > { %v445_v31 = vpop.f32.mrb[12].mxu0 }
 0x14e   : > { %v5105_v32 = vpop.f32.mrb[13].mxu0  ;;  %v446_v34 = vadd.f32 %v4753_v9, %v445_v31 }
 0x14f   : > { %v448_v33 = vpop.f32.mrb[14].mxu0 }
 0x150   : > { %v449_v35 = vadd.f32 %v4753_v9, %v448_v33  ;;  %v5106_v36 = vpop.f32.mrb[15].mxu0 }
 0x152   : > { %v6341_v37 = vpack.c.bf16 %v449_v35, %v446_v34 }
 0x154   : > { %638 = vrot.lane.b32.xlu1 %v6341_v37, %s6079_s17 }
 0x155   : > { %v453_v38 = vpop.f32.mrb[16].mxu0 }
 0x156   : > { %v5109_v39 = vpop.f32.mrb[17].mxu0  ;;  %v454_v41 = vadd.f32 %v4753_v9, %v453_v38 }
 0x157   : > { %v456_v40 = vpop.f32.mrb[18].mxu0 }
 0x158   : > { %v457_v42 = vadd.f32 %v4753_v9, %v456_v40  ;;  %v5110_v43 = vpop.f32.mrb[19].mxu0 }
 0x15a   : > { %v6345_v44 = vpack.c.bf16 %v457_v42, %v454_v41 }
 0x15c   : > { %688 = vrot.lane.b32.xlu0 %v6345_v44, %s6079_s17 }
 0x15d   : > { %v461_v45 = vpop.f32.mrb[20].mxu0 }
 0x15e   : > { %v5113_v46 = vpop.f32.mrb[21].mxu0  ;;  %v462_v48 = vadd.f32 %v4753_v9, %v461_v45 }
 0x15f   : > { %v464_v47 = vpop.f32.mrb[22].mxu0 }
 0x160   : > { %v465_v49 = vadd.f32 %v4753_v9, %v464_v47  ;;  %v5114_v50 = vpop.f32.mrb[23].mxu0 }
 0x162   : > { %v6349_v51 = vpack.c.bf16 %v465_v49, %v462_v48 }
 0x164   : > { %738 = vrot.lane.b32.xlu1 %v6349_v51, %s6079_s17 }
 0x165   : > { %v469_v52 = vpop.f32.mrb[24].mxu0 }
 0x166   : > { %v470_v53 = vadd.f32 %v4753_v9, %v469_v52  ;;  %v5117_v54 = vpop.f32.mrb[25].mxu0 }
 0x167   : > { %v472_v55 = vpop.f32.mrb[26].mxu0 }
 0x168   : > { %v473_v56 = vadd.f32 %v4753_v9, %v472_v55  ;;  %v5118_v57 = vpop.f32.mrb[27].mxu0 }
 0x16a   : > { %v6353_v58 = vpack.c.bf16 %v473_v56, %v470_v53 }
 0x16c   : > { %788 = vrot.lane.b32.xlu0 %v6353_v58, %s6079_s17  ;;  %s6091_s17 = smov 8  }
 0x1ae   : > { %v488_v59 = vpop.permute.xlu0 %487 }
 0x1af   : > { %v494_v60 = vsel %vm489_vm2, %v488_v59, 0 }
 0x1b0   : > { %5120 = vmatpush3.bf16.xpose.msra.mxu1 %v494_v60 }
 0x1b1   : > { %5125 = vmatprep.subr.bf16.mxu1 %v7966_v0 }
 0x1b6   : > { %v539_v61 = vpop.permute.xlu0 %538 }
 0x1b7   : > { %v544_v62 = vsel %vm489_vm2, %v539_v61, 0  ;;  %5122 = vmatmul.mubr.msk.bf16.vlgmr.msra.gmra.mrb[0].mxu1 %vm489_vm2, %v6329_v16 }
 0x1b8   : > { %5126 = vmatpush3.bf16.xpose.msra.mxu1 %v544_v62  ;;  %5127 = vmatprep.mubr.msk.bf16.mxu1 %vm6078_vm0, %v7966_v0 }
 0x1b9   : > { %5131 = vmatprep.subr.bf16.mxu1 %v7966_v0 }
 0x1be   : > { %v589_v63 = vpop.permute.xlu1 %588 }
 0x1bf   : > { %v594_v1 = vsel %vm489_vm2, %v589_v63, 0  ;;  %5128 = vmatmul.mubr.msk.bf16.vlgmr.msra.gmra.mrb[4].mxu1 %vm489_vm2, %v6333_v23 }
 0x1c0   : > { %5132 = vmatpush3.bf16.xpose.msra.mxu1 %v594_v1  ;;  %5133 = vmatprep.mubr.msk.bf16.mxu1 %vm6078_vm0, %v7966_v0 }
 0x1c1   : > { %5137 = vmatprep.subr.bf16.mxu1 %v7966_v0 }
 0x1c6   : > { %v639_v2 = vpop.permute.xlu1 %638 }
 0x1c7   : > { %v644_v3 = vsel %vm489_vm2, %v639_v2, 0  ;;  %5134 = vmatmul.mubr.msk.bf16.vlgmr.msra.gmra.mrb[8].mxu1 %vm489_vm2, %v6337_v30 }
 0x1c8   : > { %5138 = vmatpush3.bf16.xpose.msra.mxu1 %v644_v3  ;;  %5139 = vmatprep.mubr.msk.bf16.mxu1 %vm6078_vm0, %v7966_v0 }
 0x1c9   : > { %5143 = vmatprep.subr.bf16.mxu1 %v7966_v0 }
 0x1ce   : > { %v689_v4 = vpop.permute.xlu0 %688 }
 0x1cf   : > { %v694_v5 = vsel %vm489_vm2, %v689_v4, 0  ;;  %5140 = vmatmul.mubr.msk.bf16.vlgmr.msra.gmra.mrb[12].mxu1 %vm489_vm2, %v6341_v37 }
 0x1d0   : > { %5144 = vmatpush3.bf16.xpose.msra.mxu1 %v694_v5  ;;  %5145 = vmatprep.mubr.msk.bf16.mxu1 %vm6078_vm0, %v7966_v0 }
 0x1d1   : > { %5149 = vmatprep.subr.bf16.mxu1 %v7966_v0 }
 0x1d6   : > { %v739_v6 = vpop.permute.xlu1 %738 }
 0x1d7   : > { %v744_v7 = vsel %vm489_vm2, %v739_v6, 0  ;;  %5146 = vmatmul.mubr.msk.bf16.vlgmr.msra.gmra.mrb[16].mxu1 %vm489_vm2, %v6345_v44 }
 0x1d8   : > { %5150 = vmatpush3.bf16.xpose.msra.mxu1 %v744_v7  ;;  %5151 = vmatprep.mubr.msk.bf16.mxu1 %vm6078_vm0, %v7966_v0 }
 0x1d9   : > { %5155 = vmatprep.subr.bf16.mxu1 %v7966_v0 }
 0x1de   : > { %v789_v8 = vpop.permute.xlu0 %788 }
 0x1df   : > { %v794_v9 = vsel %vm489_vm2, %v789_v8, 0  ;;  %5152 = vmatmul.mubr.msk.bf16.vlgmr.msra.gmra.mrb[20].mxu1 %vm489_vm2, %v6349_v51 }
 0x1e0   : > { %5156 = vmatpush3.bf16.xpose.msra.mxu1 %v794_v9  ;;  %5157 = vmatprep.mubr.msk.bf16.mxu1 %vm6078_vm0, %v7966_v0 }
 0x1e1   : > { %5167 = vmatprep.subr.bf16.mxu1 %v7966_v0 }
 0x1e7   : > { %5158 = vmatmul.mubr.msk.bf16.vlgmr.msra.gmra.mrb[24].mxu1 %vm489_vm2, %v6353_v58 }
 0x1e8   : > { %5169 = vmatprep.mubr.msk.bf16.mxu1 %vm6078_vm0, %v7966_v0 }
 0x28a   : > { %v530_v12 = vpop.f32.mrb[0].mxu1 }
 0x28b   : > { %v837_v13 = vmul.f32 0.5, %v530_v12  ;;  %v5123_v14 = vpop.f32.mrb[1].mxu1 }
 0x28c   : > { %v533_v15 = vpop.f32.mrb[2].mxu1 }
 0x28d   : > { %v838_v17 = vmul.f32 0.5, %v533_v15  ;;  %v5124_v18 = vpop.f32.mrb[3].mxu1  ;;  %v6404_v19 = vsel %vm485_vm3, %v837_v13, -1e+30 }
 0x28e   : > { %v867_v20 = vsel %vm365_vm1, %v6404_v19, -inf }
 0x28f   : > { %868 = vmax.xlane.f32.xlu1 %v867_v20  ;;  %v6410_v21 = vsel %vm485_vm3, %v838_v17, -1e+30 }
 0x290   : > { %v870_v22 = vsel %vm365_vm1, %v6410_v21, -inf }
 0x291   : > { %871 = vmax.xlane.f32.xlu0 %v870_v22 }
 0x292   : > { %v580_v24 = vpop.f32.mrb[4].mxu1 }
 0x293   : > { %v839_v25 = vmul.f32 0.5, %v580_v24  ;;  %v5129_v26 = vpop.f32.mrb[5].mxu1 }
 0x294   : > { %v583_v27 = vpop.f32.mrb[6].mxu1 }
 0x295   : > { %v840_v28 = vmul.f32 0.5, %v583_v27  ;;  %v5130_v29 = vpop.f32.mrb[7].mxu1  ;;  %v6416_v31 = vsel %vm485_vm3, %v839_v25, -1e+30 }
 0x296   : > { %v873_v32 = vsel %vm365_vm1, %v6416_v31, -inf }
 0x297   : > { %874 = vmax.xlane.f32.xlu0 %v873_v32  ;;  %v6422_v33 = vsel %vm485_vm3, %v840_v28, -1e+30 }
 0x298   : > { %v876_v34 = vsel %vm365_vm1, %v6422_v33, -inf }
 0x299   : > { %877 = vmax.xlane.f32.xlu1 %v876_v34 }
 0x29a   : > { %v630_v35 = vpop.f32.mrb[8].mxu1 }
 0x29b   : > { %v841_v36 = vmul.f32 0.5, %v630_v35  ;;  %v5135_v38 = vpop.f32.mrb[9].mxu1 }
 0x29c   : > { %v633_v39 = vpop.f32.mrb[10].mxu1 }
 0x29d   : > { %v842_v40 = vmul.f32 0.5, %v633_v39  ;;  %v5136_v41 = vpop.f32.mrb[11].mxu1  ;;  %v6428_v42 = vsel %vm485_vm3, %v841_v36, -1e+30 }
 0x29e   : > { %v879_v43 = vsel %vm365_vm1, %v6428_v42, -inf }
 0x29f   : > { %880 = vmax.xlane.f32.xlu0 %v879_v43  ;;  %v6434_v45 = vsel %vm485_vm3, %v842_v40, -1e+30 }
 0x2a0   : > { %v882_v46 = vsel %vm365_vm1, %v6434_v45, -inf }
 0x2a1   : > { %883 = vmax.xlane.f32.xlu1 %v882_v46 }
 0x2a2   : > { %v680_v47 = vpop.f32.mrb[12].mxu1 }
 0x2a3   : > { %v843_v48 = vmul.f32 0.5, %v680_v47  ;;  %v5141_v49 = vpop.f32.mrb[13].mxu1 }
 0x2a4   : > { %v683_v50 = vpop.f32.mrb[14].mxu1 }
 0x2a5   : > { %v844_v52 = vmul.f32 0.5, %v683_v50  ;;  %v5142_v53 = vpop.f32.mrb[15].mxu1  ;;  %v6440_v54 = vsel %vm485_vm3, %v843_v48, -1e+30 }
 0x2a6   : > { %v885_v55 = vsel %vm365_vm1, %v6440_v54, -inf }
 0x2a7   : > { %886 = vmax.xlane.f32.xlu0 %v885_v55  ;;  %v6446_v56 = vsel %vm485_vm3, %v844_v52, -1e+30 }
 0x2a8   : > { %v888_v57 = vsel %vm365_vm1, %v6446_v56, -inf }
 0x2a9   : > { %889 = vmax.xlane.f32.xlu1 %v888_v57 }
 0x2aa   : > { %v730_v59 = vpop.f32.mrb[16].mxu1 }
 0x2ab   : > { %v845_v60 = vmul.f32 0.5, %v730_v59  ;;  %v5147_v61 = vpop.f32.mrb[17].mxu1 }
 0x2ac   : > { %v733_v62 = vpop.f32.mrb[18].mxu1 }
 0x2ad   : > { %v846_v63 = vmul.f32 0.5, %v733_v62  ;;  %v5148_v1 = vpop.f32.mrb[19].mxu1  ;;  %v6452_v2 = vsel %vm485_vm3, %v845_v60, -1e+30 }
 0x2ae   : > { %v891_v3 = vsel %vm365_vm1, %v6452_v2, -inf }
 0x2af   : > { %892 = vmax.xlane.f32.xlu0 %v891_v3  ;;  %v6458_v4 = vsel %vm485_vm3, %v846_v63, -1e+30 }
 0x2b0   : > { %v894_v5 = vsel %vm365_vm1, %v6458_v4, -inf }
 0x2b1   : > { %895 = vmax.xlane.f32.xlu1 %v894_v5 }
 0x2b2   : > { %v780_v6 = vpop.f32.mrb[20].mxu1 }
 0x2b3   : > { %v847_v7 = vmul.f32 0.5, %v780_v6  ;;  %v5153_v8 = vpop.f32.mrb[21].mxu1 }
 0x2b4   : > { %v783_v9 = vpop.f32.mrb[22].mxu1 }
 0x2b5   : > { %v848_v10 = vmul.f32 0.5, %v783_v9  ;;  %v5154_v12 = vpop.f32.mrb[23].mxu1  ;;  %v6464_v13 = vsel %vm485_vm3, %v847_v7, -1e+30 }
 0x2b6   : > { %v897_v14 = vsel %vm365_vm1, %v6464_v13, -inf }
 0x2b7   : > { %898 = vmax.xlane.f32.xlu0 %v897_v14  ;;  %v6470_v15 = vsel %vm485_vm3, %v848_v10, -1e+30 }
 0x2b8   : > { %v900_v17 = vsel %vm365_vm1, %v6470_v15, -inf }
 0x2b9   : > { %901 = vmax.xlane.f32.xlu1 %v900_v17 }
 0x2ba   : > { %v830_v18 = vpop.f32.mrb[24].mxu1 }
 0x2bb   : > { %v849_v20 = vmul.f32 0.5, %v830_v18  ;;  %v5159_v22 = vpop.f32.mrb[25].mxu1 }
 0x2bc   : > { %v833_v24 = vpop.f32.mrb[26].mxu1 }
 0x2bd   : > { %v5160_v25 = vpop.f32.mrb[27].mxu1  ;;  %v6476_v26 = vsel %vm485_vm3, %v849_v20, -1e+30  ;;  %v850_v28 = vmul.f32 0.5, %v833_v24 }
 0x2be   : > { %v903_v27 = vsel %vm365_vm1, %v6476_v26, -inf }
 0x2bf   : > { %904 = vmax.xlane.f32.xlu0 %v903_v27  ;;  %v6488_v29 = vsel %vm485_vm3, %v850_v28, -1e+30 }
 0x2c0   : > { %v906_v32 = vsel %vm365_vm1, %v6488_v29, -inf }
 0x2ca   : > { %1075 = vrot.lane.b32.xlu1 %v6333_v23, %s6080_s10 }
 0x2ce   : > { %1122 = vrot.lane.b32.xlu1 %v6337_v30, %s6080_s10 }
 0x2d2   : > { %1216 = vrot.lane.b32.xlu1 %v6345_v44, %s6080_s10 }
 0x2d5   : > { %1028 = vrot.lane.b32.xlu0 %v6329_v16, %s6080_s10 }
 0x2d9   : > { %1169 = vrot.lane.b32.xlu0 %v6341_v37, %s6080_s10 }
 0x2dd   : > { %1263 = vrot.lane.b32.xlu0 %v6349_v51, %s6080_s10 }
 0x2f6   : > { %907 = vmax.xlane.f32.xlu1 %v906_v32 }
 0x307   : > { %1310 = vrot.lane.b32.xlu1 %v6353_v58, %s6080_s10  ;;  %s4630_s10 = sshll.u32 %s6594_s20, 4  ;;  %s7839_s10 = int_to_ptr.vmem [resolvable:$true] %s4630_s10 }
 0x31c   : > { %v869_v34 = vpop.xlane.xlu1 %868 }
 0x31d   : > { %v909_v35 = vsub.f32 %v6404_v19, %v869_v34 }
 0x31e   : > { %v872_v36 = vpop.xlane.xlu0 %871 }
 0x31f   : > { %v923_v38 = vmul.f32 1.442695, %v909_v35  ;;  %v910_v39 = vsub.f32 %v6410_v21, %v872_v36 }
 0x321   : > { %5687 = vpow2.f32 %v923_v38  ;;  %v925_v40 = vmul.f32 1.442695, %v910_v39 }
 0x323   : > { %5689 = vpow2.f32 %v925_v40 }
 0x324   : > { %v875_v41 = vpop.xlane.xlu0 %874 }
 0x325   : > { %v911_v43 = vsub.f32 %v6416_v31, %v875_v41 }
 0x326   : > { %v878_v46 = vpop.xlane.xlu1 %877 }
 0x327   : > { %v927_v47 = vmul.f32 1.442695, %v911_v43  ;;  %v912_v48 = vsub.f32 %v6422_v33, %v878_v46 }
 0x329   : > { %5691 = vpow2.f32 %v927_v47  ;;  %v929_v49 = vmul.f32 1.442695, %v912_v48 }
 0x32b   : > { %v6497_v50 = vpop.eup %5687  ;;  %5693 = vpow2.f32 %v929_v49 }
 0x32c   : > { %v881_v19 = vpop.xlane.xlu0 %880  ;;  %v951_v52 = vsel %vm365_vm1, %v6497_v50, 0.0 }
 0x32d   : > { %v6501_v21 = vpop.eup %5689  ;;  %v913_v53 = vsub.f32 %v6428_v42, %v881_v19  ;;  %952 = vadd.xlane.f32.xlu0 %v951_v52 }
 0x32e   : > { %v884_v55 = vpop.xlane.xlu1 %883  ;;  %v954_v31 = vsel %vm365_vm1, %v6501_v21, 0.0 }
 0x32f   : > { %v931_v57 = vmul.f32 1.442695, %v913_v53  ;;  %v914_v33 = vsub.f32 %v6434_v45, %v884_v55  ;;  %955 = vadd.xlane.f32.xlu1 %v954_v31 }
 0x331   : > { %5695 = vpow2.f32 %v931_v57  ;;  %v933_v59 = vmul.f32 1.442695, %v914_v33 }
 0x333   : > { %v6507_v60 = vpop.eup %5691  ;;  %5697 = vpow2.f32 %v933_v59 }
 0x334   : > { %v887_v61 = vpop.xlane.xlu0 %886  ;;  %v957_v62 = vsel %vm365_vm1, %v6507_v60, 0.0 }
 0x335   : > { %v6511_v63 = vpop.eup %5693  ;;  %v915_v42 = vsub.f32 %v6440_v54, %v887_v61  ;;  %958 = vadd.xlane.f32.xlu0 %v957_v62 }
 0x336   : > { %v890_v1 = vpop.xlane.xlu1 %889  ;;  %v960_v3 = vsel %vm365_vm1, %v6511_v63, 0.0 }
 0x337   : > { %v935_v45 = vmul.f32 1.442695, %v915_v42  ;;  %v916_v5 = vsub.f32 %v6446_v56, %v890_v1  ;;  %961 = vadd.xlane.f32.xlu1 %v960_v3 }
 0x339   : > { %5699 = vpow2.f32 %v935_v45  ;;  %v937_v6 = vmul.f32 1.442695, %v916_v5 }
 0x33b   : > { %v6517_v7 = vpop.eup %5695  ;;  %5701 = vpow2.f32 %v937_v6 }
 0x33c   : > { %v893_v8 = vpop.xlane.xlu0 %892  ;;  %v963_v9 = vsel %vm365_vm1, %v6517_v7, 0.0 }
 0x33d   : > { %v6521_v10 = vpop.eup %5697  ;;  %v917_v54 = vsub.f32 %v6452_v2, %v893_v8  ;;  %964 = vadd.xlane.f32.xlu0 %v963_v9 }
 0x33e   : > { %v896_v12 = vpop.xlane.xlu1 %895  ;;  %v966_v14 = vsel %vm365_vm1, %v6521_v10, 0.0 }
 0x33f   : > { %v939_v56 = vmul.f32 1.442695, %v917_v54  ;;  %v918_v17 = vsub.f32 %v6458_v4, %v896_v12  ;;  %967 = vadd.xlane.f32.xlu1 %v966_v14 }
 0x341   : > { %5703 = vpow2.f32 %v939_v56  ;;  %v941_v18 = vmul.f32 1.442695, %v918_v17 }
 0x343   : > { %v6527_v20 = vpop.eup %5699  ;;  %5705 = vpow2.f32 %v941_v18 }
 0x344   : > { %v899_v22 = vpop.xlane.xlu0 %898  ;;  %v969_v24 = vsel %vm365_vm1, %v6527_v20, 0.0 }
 0x345   : > { %v6531_v25 = vpop.eup %5701  ;;  %v919_v2 = vsub.f32 %v6464_v13, %v899_v22  ;;  %970 = vadd.xlane.f32.xlu0 %v969_v24 }
 0x346   : > { %v902_v27 = vpop.xlane.xlu1 %901  ;;  %v972_v28 = vsel %vm365_vm1, %v6531_v25, 0.0 }
 0x347   : > { %v943_v4 = vmul.f32 1.442695, %v919_v2  ;;  %v920_v32 = vsub.f32 %v6470_v15, %v902_v27  ;;  %973 = vadd.xlane.f32.xlu1 %v972_v28 }
 0x349   : > { %5707 = vpow2.f32 %v943_v4  ;;  %v945_v34 = vmul.f32 1.442695, %v920_v32 }
 0x34a   : > { %v1076_v35 = vpop.permute.xlu1 %1075 }
 0x34b   : > { %v6537_v36 = vpop.eup %5703  ;;  %5709 = vpow2.f32 %v945_v34  ;;  %5168 = vmatpush3.bf16.msra.mxu1 %v1076_v35 }
 0x34c   : > { %v905_v38 = vpop.xlane.xlu0 %904  ;;  %v975_v13 = vsel %vm365_vm1, %v6537_v36, 0.0  ;;  %5179 = vmatprep.subr.bf16.mxu1 %v7966_v0 }
 0x34d   : > { %v6542_v39 = vpop.eup %5705  ;;  %v921_v40 = vsub.f32 %v6476_v26, %v905_v38  ;;  %976 = vadd.xlane.f32.xlu0 %v975_v13 }
 0x34e   : > { %v978_v15 = vsel %vm365_vm1, %v6542_v39, 0.0  ;;  %v1123_v52 = vpop.permute.xlu1 %1122 }
 0x34f   : > { %v947_v41 = vmul.f32 1.442695, %v921_v40  ;;  %979 = vadd.xlane.f32.xlu1 %v978_v15 }
 0x350   : > { %v1029_v43 = vpop.permute.xlu0 %1028 }
 0x351   : > { %5711 = vpow2.f32 %v947_v41  ;;  %5162 = vmatpush3.bf16.msra.mxu0 %v1029_v43 }
 0x352   : > { %5173 = vmatprep.subr.bf16.mxu0 %v7966_v0  ;;  %v6564_v53 = vpop.permute.xlu1 %1216 }
 0x353   : > { %v6548_v46 = vpop.eup %5707 }
 0x354   : > { %v981_v47 = vsel %vm365_vm1, %v6548_v46, 0.0 }
 0x355   : > { %v6552_v48 = vpop.eup %5709  ;;  %982 = vadd.xlane.f32.xlu0 %v981_v47 }
 0x356   : > { %v984_v26 = vsel %vm365_vm1, %v6552_v48, 0.0 }
 0x357   : > { %985 = vadd.xlane.f32.xlu1 %v984_v26 }
 0x35b   : > { %v6556_v49 = vpop.eup %5711 }
 0x35c   : > { %v987_v19 = vsel %vm365_vm1, %v6556_v49, 0.0 }
 0x35d   : > { %988 = vadd.xlane.f32.xlu0 %v987_v19 }
 0x368   : > { %1410 = vrot.lane.b32.xlu1 %v6333_v23, %s6081_s19 }
 0x373   : > { %1359 = vrot.lane.b32.xlu0 %v6329_v16, %s6081_s19 }
 0x377   : > { %1357 = vrot.lane.b32.xlu0 %v6329_v16, %s6082_s30 }
 0x37b   : > { %1461 = vrot.lane.b32.xlu0 %v6337_v30, %s6081_s19 }
 0x37f   : > { %1459 = vrot.lane.b32.xlu0 %v6337_v30, %s6082_s30 }
 0x383   : > { %v908_v55 = vpop.xlane.xlu1 %907  ;;  %1563 = vrot.lane.b32.xlu0 %v6345_v44, %s6081_s19 }
 0x384   : > { %v922_v31 = vsub.f32 %v6488_v29, %v908_v55  ;;  %v1170_v29 = vpop.permute.xlu0 %1169 }
 0x386   : > { %v949_v57 = vmul.f32 1.442695, %v922_v31 }
 0x387   : > { %1561 = vrot.lane.b32.xlu0 %v6345_v44, %s6082_s30  ;;  %v6584_v62 = vpop.permute.xlu1 %1310 }
 0x388   : > { %5713 = vpow2.f32 %v949_v57  ;;  %v6582_v61 = vpop.permute.xlu0 %1263 }
 0x38b   : > { %1665 = vrot.lane.b32.xlu0 %v6353_v58, %s6081_s19 }
 0x38f   : > { %1950 = vrot.lane.b32.xlu0 %v6333_v23, %s6083_s16 }
 0x392   : > { %v6573_v33 = vpop.eup %5713 }
 0x393   : > { %v990_v59 = vsel %vm365_vm1, %v6573_v33, 0.0 }
 0x394   : > { %991 = vadd.xlane.f32.xlu1 %v990_v59 }
 0x3a5   : > { %1408 = vrot.lane.b32.xlu1 %v6333_v23, %s6082_s30 }
 0x3a9   : > { %1512 = vrot.lane.b32.xlu1 %v6341_v37, %s6081_s19 }
 0x3ad   : > { %1510 = vrot.lane.b32.xlu1 %v6341_v37, %s6082_s30 }
 0x3b1   : > { %1614 = vrot.lane.b32.xlu1 %v6349_v51, %s6081_s19  ;;  %s4599_s19 = scalar_lea.sflag [#allocation9], %s6277_s15 }
 0x3b5   : > { %1612 = vrot.lane.b32.xlu1 %v6349_v51, %s6082_s30 }
 0x3b9   : > { %1663 = vrot.lane.b32.xlu1 %v6353_v58, %s6082_s30  ;;  %s6092_s30 = smov 12  }
 0x3ba   : > { %v953_v42 = vpop.xlane.xlu0 %952 }
 0x3bb   : > { %5715 = vrcp.f32 %v953_v42 }
 0x3bc   : > { %v956_v1 = vpop.xlane.xlu1 %955 }
 0x3bd   : > { %5717 = vrcp.f32 %v956_v1  ;;  %1903 = vrot.lane.b32.xlu1 %v6329_v16, %s6083_s16 }
 0x3c1   : > { %2044 = vrot.lane.b32.xlu1 %v6341_v37, %s6083_s16 }
 0x3c2   : > { %v959_v3 = vpop.xlane.xlu0 %958 }
 0x3c3   : > { %5719 = vrcp.f32 %v959_v3 }
 0x3c4   : > { %v962_v45 = vpop.xlane.xlu1 %961 }
 0x3c5   : > { %v5716_v5 = vpop.eup %5715  ;;  %5721 = vrcp.f32 %v962_v45 }
 0x3c6   : > { %v1007_v6 = vmul.f32 %v5716_v5, %v6497_v50 }
 0x3c7   : > { %v5718_v8 = vpop.eup %5717 }
 0x3c8   : > { %v4898_v9 = vpack.c.bf16 %v1007_v6, %v1007_v6  ;;  %v1008_v54 = vmul.f32 %v5718_v8, %v6501_v21 }
 0x3ca   : > { %4179 = vst.msk [vmem:[%s6594_s20] sm:$0xf] %vm4178_vm4, %v4898_v9  ;;  %v1021_v12 = vpack.c.bf16 %v1008_v54, %v1007_v6  ;;  %v4899_v14 = vpack.c.bf16 %v1008_v54, %v1008_v54  ;;  %v965_v56 = vpop.xlane.xlu0 %964 }
 0x3cb   : > { %5723 = vrcp.f32 %v965_v56 }
 0x3cc   : > { %4180 = vst.msk [vmem:[%s6594_s20 + $0x4] sm:$0xf] %vm4178_vm4, %v4899_v14  ;;  %v968_v17 = vpop.xlane.xlu1 %967  ;;  %5164 = vmatmul.mubr.msk.bf16.vlgmr.msra.gmra.mrb[28].mxu0 %vm365_vm1, %v1021_v12 }
 0x3cd   : > { %v5720_v50 = vpop.eup %5719  ;;  %5725 = vrcp.f32 %v968_v17  ;;  %5174 = vmatpush3.bf16.msra.mxu0 %v1123_v52  ;;  %5175 = vmatprep.mubr.msk.bf16.mxu0 %vm6078_vm0, %v7966_v0 }
 0x3ce   : > { %v1009_v21 = vmul.f32 %v5720_v50, %v6507_v60  ;;  %5185 = vmatprep.subr.bf16.mxu0 %v7966_v0 }
 0x3cf   : > { %v5722_v18 = vpop.eup %5721 }
 0x3d0   : > { %v4906_v22 = vpack.c.bf16 %v1009_v21, %v1009_v21  ;;  %v1010_v24 = vmul.f32 %v5722_v18, %v6511_v63 }
 0x3d2   : > { %4187 = vst.msk [vmem:[%s6594_s20 + $0x20] sm:$0xf] %vm4178_vm4, %v4906_v22  ;;  %v4907_v2 = vpack.c.bf16 %v1010_v24, %v1010_v24  ;;  %v971_v27 = vpop.xlane.xlu0 %970  ;;  %v1022_v28 = vpack.c.bf16 %v1010_v24, %v1009_v21 }
 0x3d3   : > { %5727 = vrcp.f32 %v971_v27 }
 0x3d4   : > { %4188 = vst.msk [vmem:[%s6594_s20 + $0x24] sm:$0xf] %vm4178_vm4, %v4907_v2  ;;  %v974_v4 = vpop.xlane.xlu1 %973  ;;  %5170 = vmatmul.mubr.msk.bf16.vlgmr.msra.gmra.mrb[28].mxu1 %vm365_vm1, %v1022_v28 }
 0x3d5   : > { %v5724_v60 = vpop.eup %5723  ;;  %5729 = vrcp.f32 %v974_v4  ;;  %5180 = vmatpush3.bf16.msra.mxu1 %v1170_v29  ;;  %5181 = vmatprep.mubr.msk.bf16.mxu1 %vm6078_vm0, %v7966_v0 }
 0x3d6   : > { %v1011_v63 = vmul.f32 %v5724_v60, %v6517_v7  ;;  %5191 = vmatprep.subr.bf16.mxu1 %v7966_v0 }
 0x3d7   : > { %v5726_v32 = vpop.eup %5725 }
 0x3d8   : > { %v4914_v34 = vpack.c.bf16 %v1011_v63, %v1011_v63  ;;  %v1012_v35 = vmul.f32 %v5726_v32, %v6521_v10 }
 0x3da   : > { %4195 = vst.msk [vmem:[%s6594_s20 + $0x40] sm:$0xf] %vm4178_vm4, %v4914_v34  ;;  %v4915_v38 = vpack.c.bf16 %v1012_v35, %v1012_v35  ;;  %v977_v13 = vpop.xlane.xlu0 %976  ;;  %v1023_v40 = vpack.c.bf16 %v1012_v35, %v1011_v63 }
 0x3db   : > { %5731 = vrcp.f32 %v977_v13 }
 0x3dc   : > { %4196 = vst.msk [vmem:[%s6594_s20 + $0x44] sm:$0xf] %vm4178_vm4, %v4915_v38  ;;  %v980_v15 = vpop.xlane.xlu1 %979  ;;  %5176 = vmatmul.mubr.msk.bf16.vlgmr.msra.gmra.mrb[32].mxu0 %vm365_vm1, %v1023_v40 }
 0x3dd   : > { %v5728_v7 = vpop.eup %5727  ;;  %5733 = vrcp.f32 %v980_v15  ;;  %5186 = vmatpush3.bf16.msra.mxu0 %v6564_v53  ;;  %5187 = vmatprep.mubr.msk.bf16.mxu0 %vm6078_vm0, %v7966_v0 }
 0x3de   : > { %v1013_v10 = vmul.f32 %v5728_v7, %v6527_v20  ;;  %5197 = vmatprep.subr.bf16.mxu0 %v7966_v0 }
 0x3df   : > { %v5730_v41 = vpop.eup %5729 }
 0x3e0   : > { %v4922_v43 = vpack.c.bf16 %v1013_v10, %v1013_v10  ;;  %v1014_v47 = vmul.f32 %v5730_v41, %v6531_v25 }
 0x3e2   : > { %4203 = vst.msk [vmem:[%s6594_s20 + $0x60] sm:$0xf] %vm4178_vm4, %v4922_v43  ;;  %v4923_v26 = vpack.c.bf16 %v1014_v47, %v1014_v47  ;;  %v983_v19 = vpop.xlane.xlu0 %982  ;;  %v1024_v52 = vpack.c.bf16 %v1014_v47, %v1013_v10 }
 0x3e3   : > { %5735 = vrcp.f32 %v983_v19 }
 0x3e4   : > { %4204 = vst.msk [vmem:[%s6594_s20 + $0x64] sm:$0xf] %vm4178_vm4, %v4923_v26  ;;  %v986_v53 = vpop.xlane.xlu1 %985  ;;  %5182 = vmatmul.mubr.msk.bf16.vlgmr.msra.gmra.mrb[32].mxu1 %vm365_vm1, %v1024_v52 }
 0x3e5   : > { %v5732_v20 = vpop.eup %5731  ;;  %5737 = vrcp.f32 %v986_v53  ;;  %5192 = vmatpush3.bf16.msra.mxu1 %v6582_v61  ;;  %5193 = vmatprep.mubr.msk.bf16.mxu1 %vm6078_vm0, %v7966_v0 }
 0x3e6   : > { %v1015_v25 = vmul.f32 %v5732_v20, %v6537_v36  ;;  %5203 = vmatprep.subr.bf16.mxu1 %v7966_v0 }
 0x3e7   : > { %v5734_v55 = vpop.eup %5733 }
 0x3e8   : > { %v4930_v31 = vpack.c.bf16 %v1015_v25, %v1015_v25  ;;  %v1016_v57 = vmul.f32 %v5734_v55, %v6542_v39  ;;  %v1411_v18 = vpop.permute.xlu1 %1410 }
 0x3e9   : > { %v1416_v32 = vsel %vm489_vm2, %v1411_v18, 0 }
 0x3ea   : > { %4211 = vst.msk [vmem:[%s6594_s20 + $0x80] sm:$0xf] %vm4178_vm4, %v4930_v31  ;;  %v4931_v59 = vpack.c.bf16 %v1016_v57, %v1016_v57  ;;  %v989_v29 = vpop.xlane.xlu0 %988  ;;  %v1025_v42 = vpack.c.bf16 %v1016_v57, %v1015_v25 }
 0x3eb   : > { %5739 = vrcp.f32 %v989_v29 }
 0x3ec   : > { %4212 = vst.msk [vmem:[%s6594_s20 + $0x84] sm:$0xf] %vm4178_vm4, %v4931_v59  ;;  %5188 = vmatmul.mubr.msk.bf16.vlgmr.msra.gmra.mrb[36].mxu0 %vm365_vm1, %v1025_v42 }
 0x3ed   : > { %v5736_v61 = vpop.eup %5735  ;;  %5198 = vmatpush3.bf16.msra.mxu0 %v6584_v62  ;;  %5199 = vmatprep.mubr.msk.bf16.mxu0 %vm6078_vm0, %v7966_v0 }
 0x3ee   : > { %v1017_v36 = vmul.f32 %v5736_v61, %v6548_v46  ;;  %v1360_v39 = vpop.permute.xlu0 %1359  ;;  %5209 = vmatprep.subr.bf16.mxu0 %v7966_v0 }
 0x3ef   : > { %v5738_v1 = vpop.eup %5737  ;;  %v1365_v62 = vsel %vm489_vm2, %v1360_v39, 0 }
 0x3f0   : > { %v4938_v3 = vpack.c.bf16 %v1017_v36, %v1017_v36  ;;  %v1018_v45 = vmul.f32 %v5738_v1, %v6552_v48 }
 0x3f2   : > { %4219 = vst.msk [vmem:[%s6594_s20 + $0xa0] sm:$0xf] %vm4178_vm4, %v4938_v3  ;;  %v4939_v5 = vpack.c.bf16 %v1018_v45, %v1018_v45  ;;  %v1358_v6 = vpop.permute.xlu0 %1357  ;;  %v1026_v8 = vpack.c.bf16 %v1018_v45, %v1017_v36 }
 0x3f4   : > { %4220 = vst.msk [vmem:[%s6594_s20 + $0xa4] sm:$0xf] %vm4178_vm4, %v4939_v5  ;;  %5194 = vmatmul.mubr.msk.bf16.vlgmr.msra.gmra.mrb[36].mxu1 %vm365_vm1, %v1026_v8 }
 0x3f5   : > { %v5740_v46 = vpop.eup %5739  ;;  %5204 = vmatpush3.bf16.xpose.msra.mxu1 %v1365_v62  ;;  %5205 = vmatprep.mubr.msk.bf16.mxu1 %vm6078_vm0, %v7966_v0 }
 0x3f6   : > { %v1019_v9 = vmul.f32 %v5740_v46, %v6556_v49  ;;  %v1462_v54 = vpop.permute.xlu0 %1461  ;;  %5215 = vmatprep.subr.bf16.mxu1 %v7966_v0 }
 0x3f7   : > { %v1467_v14 = vsel %vm489_vm2, %v1462_v54, 0 }
 0x3f8   : > { %v4946_v48 = vpack.c.bf16 %v1019_v9, %v1019_v9 }
 0x3fa   : > { %4227 = vst.msk [vmem:[%s6594_s20 + $0xc0] sm:$0xf] %vm4178_vm4, %v4946_v48  ;;  %v1460_v12 = vpop.permute.xlu0 %1459 }
 0x3fc   : > { %5206 = vmatmul.mubr.msk.bf16.vlgmr.msra.gmra.mrb[40].mxu1 %vm489_vm2, %v1358_v6 }
 0x3fd   : > { %5216 = vmatpush3.bf16.xpose.msra.mxu1 %v1467_v14  ;;  %5217 = vmatprep.mubr.msk.bf16.mxu1 %vm6078_vm0, %v7966_v0 }
 0x3fe   : > { %v1564_v56 = vpop.permute.xlu0 %1563  ;;  %5227 = vmatprep.subr.bf16.mxu1 %v7966_v0 }
 0x3ff   : > { %v1569_v49 = vsel %vm489_vm2, %v1564_v56, 0 }
 0x402   : > { %v1562_v17 = vpop.permute.xlu0 %1561 }
 0x404   : > { %5218 = vmatmul.mubr.msk.bf16.vlgmr.msra.gmra.mrb[44].mxu1 %vm489_vm2, %v1460_v12 }
 0x405   : > { %5228 = vmatpush3.bf16.xpose.msra.mxu1 %v1569_v49  ;;  %5229 = vmatprep.mubr.msk.bf16.mxu1 %vm6078_vm0, %v7966_v0 }
 0x406   : > { %5239 = vmatprep.subr.bf16.mxu1 %v7966_v0  ;;  %v1666_v50 = vpop.permute.xlu0 %1665 }
 0x407   : > { %v1671_v21 = vsel %vm489_vm2, %v1666_v50, 0 }
 0x40a   : > { %v1951_v13 = vpop.permute.xlu0 %1950 }
 0x40c   : > { %5230 = vmatmul.mubr.msk.bf16.vlgmr.msra.gmra.mrb[48].mxu1 %vm489_vm2, %v1562_v17 }
 0x40d   : > { %5240 = vmatpush3.bf16.xpose.msra.mxu1 %v1671_v21  ;;  %5241 = vmatprep.mubr.msk.bf16.mxu1 %vm6078_vm0, %v7966_v0 }
 0x40e   : > { %5251 = vmatprep.subr.bf16.mxu1 %v7966_v0 }
 0x421   : > { %v992_v22 = vpop.xlane.xlu1 %991 }
 0x422   : > { %5741 = vrcp.f32 %v992_v22 }
 0x425   : > { %v1409_v24 = vpop.permute.xlu1 %1408 }
 0x429   : > { %v1513_v2 = vpop.permute.xlu1 %1512 }
 0x42a   : > { %v1518_v38 = vsel %vm489_vm2, %v1513_v2, 0 }
 0x42c   : > { %v5742_v27 = vpop.eup %5741 }
 0x42d   : > { %v1020_v28 = vmul.f32 %v5742_v27, %v6573_v33  ;;  %v1511_v4 = vpop.permute.xlu1 %1510 }
 0x42f   : > { %v4947_v60 = vpack.c.bf16 %v1020_v28, %v1020_v28  ;;  %v1027_v63 = vpack.c.bf16 %v1020_v28, %v1019_v9 }
 0x431   : > { %4228 = vst.msk [vmem:[%s6594_s20 + $0xc4] sm:$0xf] %vm4178_vm4, %v4947_v60  ;;  %v1615_v34 = vpop.permute.xlu1 %1614  ;;  %5200 = vmatmul.mubr.msk.bf16.vlgmr.msra.gmra.mrb[40].mxu0 %vm365_vm1, %v1027_v63 }
 0x432   : > { %5210 = vmatpush3.bf16.xpose.msra.mxu0 %v1416_v32  ;;  %5211 = vmatprep.mubr.msk.bf16.mxu0 %vm6078_vm0, %v7966_v0  ;;  %v1620_v40 = vsel %vm489_vm2, %v1615_v34, 0 }
 0x433   : > { %5221 = vmatprep.subr.bf16.mxu0 %v7966_v0 }
 0x435   : > { %v1613_v35 = vpop.permute.xlu1 %1612 }
 0x439   : > { %v1664_v33 = vpop.permute.xlu1 %1663  ;;  %5212 = vmatmul.mubr.msk.bf16.vlgmr.msra.gmra.mrb[44].mxu0 %vm489_vm2, %v1409_v24 }
 0x43a   : > { %5222 = vmatpush3.bf16.xpose.msra.mxu0 %v1518_v38  ;;  %5242 = vmatmul.mubr.msk.bf16.vlgmr.msra.gmra.mrb[52].mxu1 %vm489_vm2, %v1664_v33 }
 0x43b   : > { %5252 = vmatpush3.bf16.msra.mxu1 %v1951_v13  ;;  %5223 = vmatprep.mubr.msk.bf16.mxu0 %vm6078_vm0, %v7966_v0 }
 0x43c   : > { %5233 = vmatprep.subr.bf16.mxu0 %v7966_v0  ;;  %5253 = vmatprep.mubr.msk.bf16.mxu1 %vm6078_vm0, %v7966_v0 }
 0x43d   : > { %5263 = vmatprep.subr.bf16.mxu1 %v7966_v0  ;;  %v1904_v15 = vpop.permute.xlu1 %1903 }
 0x441   : > { %5224 = vmatmul.mubr.msk.bf16.vlgmr.msra.gmra.mrb[48].mxu0 %vm489_vm2, %v1511_v4 }
 0x442   : > { %5234 = vmatpush3.bf16.xpose.msra.mxu0 %v1620_v40  ;;  %5235 = vmatprep.mubr.msk.bf16.mxu0 %vm6078_vm0, %v7966_v0 }
 0x443   : > { %5245 = vmatprep.subr.bf16.mxu0 %v7966_v0 }
 0x449   : > { %5236 = vmatmul.mubr.msk.bf16.vlgmr.msra.gmra.mrb[52].mxu0 %vm489_vm2, %v1613_v35 }
 0x44a   : > { %5246 = vmatpush3.bf16.msra.mxu0 %v1904_v15  ;;  %5247 = vmatprep.mubr.msk.bf16.mxu0 %vm6078_vm0, %v7966_v0 }
 0x44b   : > { %5257 = vmatprep.subr.bf16.mxu0 %v7966_v0 }
 0x49f   : > { %v6702_v7 = vpop.f32.mrb[28].mxu0 }
 0x4a0   : > { %7983 = vst [vmem:[#allocation14_spill] sm:$0xff] %v6702_v7  ;;  %v5165_v10 = vpop.f32.mrb[29].mxu0 }
 0x4a1   : > { %v6704_v41 = vpop.f32.mrb[30].mxu0 }
 0x4a2   : > { %7984 = vst [vmem:[#allocation15_spill] sm:$0xff] %v6704_v41  ;;  %v5166_v43 = vpop.f32.mrb[31].mxu0 }
 0x4a7   : > { %v6706_v47 = vpop.f32.mrb[28].mxu1 }
 0x4a8   : > { %v5171_v26 = vpop.f32.mrb[29].mxu1 }
 0x4a9   : > { %v6708_v19 = vpop.f32.mrb[30].mxu1 }
 0x4aa   : > { %v5172_v52 = vpop.f32.mrb[31].mxu1 }
 0x4af   : > { %v6710_v53 = vpop.f32.mrb[32].mxu0 }
 0x4b0   : > { %7985 = vst [vmem:[#allocation16_spill] sm:$0xff] %v6710_v53  ;;  %v5177_v20 = vpop.f32.mrb[33].mxu0 }
 0x4b1   : > { %v6712_v25 = vpop.f32.mrb[34].mxu0 }
 0x4b2   : > { %7986 = vst [vmem:[#allocation17_spill] sm:$0xff] %v6712_v25  ;;  %v5178_v55 = vpop.f32.mrb[35].mxu0 }
 0x4b7   : > { %v6714_v31 = vpop.f32.mrb[32].mxu1 }
 0x4b8   : > { %v5183_v57 = vpop.f32.mrb[33].mxu1 }
 0x4b9   : > { %v6716_v59 = vpop.f32.mrb[34].mxu1 }
 0x4ba   : > { %v5184_v29 = vpop.f32.mrb[35].mxu1 }
 0x4bf   : > { %v6718_v42 = vpop.f32.mrb[36].mxu0 }
 0x4c0   : > { %7987 = vst [vmem:[#allocation18_spill] sm:$0xff] %v6718_v42  ;;  %v5189_v61 = vpop.f32.mrb[37].mxu0 }
 0x4c1   : > { %v6720_v36 = vpop.f32.mrb[38].mxu0 }
 0x4c2   : > { %7988 = vst [vmem:[#allocation19_spill] sm:$0xff] %v6720_v36  ;;  %v5190_v39 = vpop.f32.mrb[39].mxu0 }
 0x4c7   : > { %v6722_v1 = vpop.f32.mrb[36].mxu1 }
 0x4c8   : > { %7989 = vst [vmem:[#allocation20_spill] sm:$0xff] %v6722_v1  ;;  %v5195_v3 = vpop.f32.mrb[37].mxu1 }
 0x4c9   : > { %v6724_v45 = vpop.f32.mrb[38].mxu1 }
 0x4ca   : > { %7990 = vst [vmem:[#allocation21_spill] sm:$0xff] %v6724_v45  ;;  %v5196_v5 = vpop.f32.mrb[39].mxu1 }
 0x4cf   : > { %v1401_v6 = vpop.f32.mrb[40].mxu1 }
 0x4d0   : > { %v1714_v8 = vmul.f32 0.5, %v1401_v6  ;;  %v5207_v62 = vpop.f32.mrb[41].mxu1 }
 0x4d1   : > { %v1404_v46 = vpop.f32.mrb[42].mxu1 }
 0x4d2   : > { %v1715_v9 = vmul.f32 0.5, %v1404_v46  ;;  %v5208_v54 = vpop.f32.mrb[43].mxu1  ;;  %v6728_v48 = vsel %vm485_vm3, %v1714_v8, -1e+30 }
 0x4d3   : > { %v1742_v12 = vsel %vm365_vm1, %v6728_v48, -inf }
 0x4d4   : > { %1743 = vmax.xlane.f32.xlu0 %v1742_v12  ;;  %v6734_v14 = vsel %vm485_vm3, %v1715_v9, -1e+30 }
 0x4d5   : > { %v1745_v56 = vsel %vm365_vm1, %v6734_v14, -inf }
 0x4d6   : > { %1746 = vmax.xlane.f32.xlu1 %v1745_v56 }
 0x4d7   : > { %v1503_v17 = vpop.f32.mrb[44].mxu1 }
 0x4d8   : > { %v1718_v49 = vmul.f32 0.5, %v1503_v17  ;;  %v5219_v50 = vpop.f32.mrb[45].mxu1 }
 0x4d9   : > { %v1506_v21 = vpop.f32.mrb[46].mxu1 }
 0x4da   : > { %v5220_v18 = vpop.f32.mrb[47].mxu1  ;;  %v6740_v22 = vsel %vm485_vm3, %v1718_v49, -1e+30  ;;  %v1719_v57 = vmul.f32 0.5, %v1506_v21 }
 0x4db   : > { %v1754_v24 = vsel %vm365_vm1, %v6740_v22, -inf }
 0x4dc   : > { %1755 = vmax.xlane.f32.xlu1 %v1754_v24  ;;  %v6762_v8 = vsel %vm485_vm3, %v1719_v57, -1e+30  ;;  %v6824_v57 = vpop.permute.xlu1 %2044 }
 0x4dd   : > { %v1757_v12 = vsel %vm365_vm1, %v6762_v8, -inf }
 0x4df   : > { %v1605_v2 = vpop.f32.mrb[48].mxu1 }
 0x4e0   : > { %v5231_v27 = vpop.f32.mrb[49].mxu1  ;;  %v1722_v3 = vmul.f32 0.5, %v1605_v2 }
 0x4e1   : > { %v1608_v28 = vpop.f32.mrb[50].mxu1 }
 0x4e2   : > { %v5232_v4 = vpop.f32.mrb[51].mxu1  ;;  %v1723_v17 = vmul.f32 0.5, %v1608_v28  ;;  %v6774_v49 = vsel %vm485_vm3, %v1722_v3, -1e+30 }
 0x4e3   : > { %v1766_v18 = vsel %vm365_vm1, %v6774_v49, -inf }
 0x4e4   : > { %v6786_v28 = vsel %vm485_vm3, %v1723_v17, -1e+30 }
 0x504   : > { %v6744_v60 = vpop.f32.mrb[40].mxu0 }
 0x505   : > { %7991 = vst [vmem:[#allocation22_spill] sm:$0xff] %v6744_v60  ;;  %v5201_v63 = vpop.f32.mrb[41].mxu0 }
 0x506   : > { %v6746_v32 = vpop.f32.mrb[42].mxu0 }
 0x507   : > { %7992 = vst [vmem:[#allocation23_spill] sm:$0xff] %v6746_v32  ;;  %v5202_v34 = vpop.f32.mrb[43].mxu0 }
 0x50c   : > { %v1452_v35 = vpop.f32.mrb[44].mxu0 }
 0x50d   : > { %v1716_v38 = vmul.f32 0.5, %v1452_v35  ;;  %v5213_v33 = vpop.f32.mrb[45].mxu0  ;;  %v1707_v13 = vpop.f32.mrb[52].mxu1  ;;  %v1769_v35 = vsel %vm365_vm1, %v6786_v28, -inf }
 0x50e   : > { %v1455_v40 = vpop.f32.mrb[46].mxu0  ;;  %v5243_v15 = vpop.f32.mrb[53].mxu1  ;;  %v1726_v33 = vmul.f32 0.5, %v1707_v13 }
 0x50f   : > { %v1717_v10 = vmul.f32 0.5, %v1455_v40  ;;  %v5214_v43 = vpop.f32.mrb[47].mxu0  ;;  %v1710_v26 = vpop.f32.mrb[54].mxu1  ;;  %v6750_v52 = vsel %vm485_vm3, %v1716_v38, -1e+30 }
 0x510   : > { %v5244_v20 = vpop.f32.mrb[55].mxu1  ;;  %v1748_v55 = vsel %vm365_vm1, %v6750_v52, -inf  ;;  %v1727_v15 = vmul.f32 0.5, %v1710_v26 }
 0x511   : > { %1749 = vmax.xlane.f32.xlu0 %v1748_v55  ;;  %v6756_v29 = vsel %vm485_vm3, %v1717_v10, -1e+30  ;;  %v6802_v10 = vsel %vm485_vm3, %v1726_v33, -1e+30 }
 0x512   : > { %v1751_v39 = vsel %vm365_vm1, %v6756_v29, -inf  ;;  %v1778_v20 = vsel %vm365_vm1, %v6802_v10, -inf  ;;  %v6814_v13 = vsel %vm485_vm3, %v1727_v15, -1e+30 }
 0x513   : > { %v1781_v26 = vsel %vm365_vm1, %v6814_v13, -inf }
 0x514   : > { %v1554_v61 = vpop.f32.mrb[48].mxu0 }
 0x515   : > { %v1720_v5 = vmul.f32 0.5, %v1554_v61  ;;  %1752 = vmax.xlane.f32.xlu0 %v1751_v39  ;;  %v5225_v6 = vpop.f32.mrb[49].mxu0 }
 0x516   : > { %v1557_v62 = vpop.f32.mrb[50].mxu0 }
 0x517   : > { %v1721_v46 = vmul.f32 0.5, %v1557_v62  ;;  %v5226_v9 = vpop.f32.mrb[51].mxu0  ;;  %v6766_v54 = vsel %vm485_vm3, %v1720_v5, -1e+30 }
 0x518   : > { %v1760_v56 = vsel %vm365_vm1, %v6766_v54, -inf }
 0x519   : > { %1758 = vmax.xlane.f32.xlu0 %v1757_v12  ;;  %1761 = vmax.xlane.f32.xlu1 %v1760_v56  ;;  %v6778_v50 = vsel %vm485_vm3, %v1721_v46, -1e+30 }
 0x51a   : > { %v1763_v24 = vsel %vm365_vm1, %v6778_v50, -inf }
 0x51c   : > { %v1656_v21 = vpop.f32.mrb[52].mxu0 }
 0x51d   : > { %v1724_v2 = vmul.f32 0.5, %v1656_v21  ;;  %1767 = vmax.xlane.f32.xlu1 %v1766_v18  ;;  %1764 = vmax.xlane.f32.xlu0 %v1763_v24  ;;  %v5237_v27 = vpop.f32.mrb[53].mxu0 }
 0x51e   : > { %v1659_v4 = vpop.f32.mrb[54].mxu0 }
 0x51f   : > { %v5238_v63 = vpop.f32.mrb[55].mxu0  ;;  %v6790_v34 = vsel %vm485_vm3, %v1724_v2, -1e+30  ;;  %v1725_v40 = vmul.f32 0.5, %v1659_v4 }
 0x520   : > { %v1772_v38 = vsel %vm365_vm1, %v6790_v34, -inf }
 0x521   : > { %1770 = vmax.xlane.f32.xlu0 %v1769_v35  ;;  %1773 = vmax.xlane.f32.xlu1 %v1772_v38  ;;  %v6806_v43 = vsel %vm485_vm3, %v1725_v40, -1e+30 }
 0x522   : > { %v1775_v55 = vsel %vm365_vm1, %v6806_v43, -inf }
 0x532   : > { %1997 = vrot.lane.b32.xlu1 %v6337_v30, %s6083_s16 }
 0x537   : > { %2138 = vrot.lane.b32.xlu0 %v6349_v51, %s6083_s16 }
 0x556   : > { %1779 = vmax.xlane.f32.xlu1 %v1778_v20  ;;  %1776 = vmax.xlane.f32.xlu0 %v1775_v55 }
 0x55a   : > { %1782 = vmax.xlane.f32.xlu0 %v1781_v26 }
 0x561   : > { %v1744_v61 = vpop.xlane.xlu0 %1743 }
 0x562   : > { %v1784_v3 = vsub.f32 %v6728_v48, %v1744_v61 }
 0x563   : > { %v1747_v39 = vpop.xlane.xlu1 %1746 }
 0x564   : > { %v1785_v5 = vsub.f32 %v6734_v14, %v1747_v39  ;;  %v1798_v6 = vmul.f32 1.442695, %v1784_v3 }
 0x566   : > { %v1800_v62 = vmul.f32 1.442695, %v1785_v5  ;;  %5743 = vpow2.f32 %v1798_v6 }
 0x567   : > { %2091 = vrot.lane.b32.xlu1 %v6345_v44, %s6083_s16 }
 0x568   : > { %5745 = vpow2.f32 %v1800_v62 }
 0x569   : > { %v1756_v17 = vpop.xlane.xlu1 %1755 }
 0x56a   : > { %v1788_v48 = vsub.f32 %v6740_v22, %v1756_v17 }
 0x56b   : > { %2234 = vrot.lane.b32.xlu1 %v6329_v16, %s6084_s26 }
 0x56c   : > { %v1806_v18 = vmul.f32 1.442695, %v1788_v48 }
 0x570   : > { %2185 = vrot.lane.b32.xlu0 %v6353_v58, %s6083_s16  ;;  %v6828_v46 = vpop.eup %5743  ;;  %s5489_s16 = smul.u32 112, %s6277_s15 }
 0x571   : > { %v1826_v12 = vsel %vm365_vm1, %v6828_v46, 0.0 }
 0x572   : > { %v6830_v9 = vpop.eup %5745 }
 0x573   : > { %v1829_v56 = vsel %vm365_vm1, %v6830_v9, 0.0 }
 0x58f   : > { %1827 = vadd.xlane.f32.xlu1 %v1826_v12  ;;  %1830 = vadd.xlane.f32.xlu0 %v1829_v56 }
 0x59e   : > { %v1750_v14 = vpop.xlane.xlu0 %1749 }
 0x59f   : > { %v1786_v21 = vsub.f32 %v6750_v52, %v1750_v14 }
 0x5a1   : > { %v1802_v24 = vmul.f32 1.442695, %v1786_v21 }
 0x5a2   : > { %v1753_v2 = vpop.xlane.xlu0 %1752 }
 0x5a3   : > { %5747 = vpow2.f32 %v1802_v24  ;;  %v1787_v27 = vsub.f32 %v6756_v29, %v1753_v2 }
 0x5a4   : > { %5749 = vpow2.f32 %v1806_v18 }
 0x5a5   : > { %v1804_v4 = vmul.f32 1.442695, %v1787_v27 }
 0x5a6   : > { %v1759_v63 = vpop.xlane.xlu0 %1758  ;;  %v1762_v35 = vpop.xlane.xlu1 %1761 }
 0x5a7   : > { %5751 = vpow2.f32 %v1804_v4  ;;  %v1789_v38 = vsub.f32 %v6762_v8, %v1759_v63  ;;  %v1790_v33 = vsub.f32 %v6766_v54, %v1762_v35 }
 0x5a9   : > { %v1808_v40 = vmul.f32 1.442695, %v1789_v38  ;;  %v1810_v22 = vmul.f32 1.442695, %v1790_v33 }
 0x5aa   : > { %v1768_v15 = vpop.xlane.xlu1 %1767  ;;  %v1765_v20 = vpop.xlane.xlu0 %1764 }
 0x5ab   : > { %5753 = vpow2.f32 %v1808_v40  ;;  %v1792_v52 = vsub.f32 %v6774_v49, %v1768_v15  ;;  %v1791_v55 = vsub.f32 %v6778_v50, %v1765_v20 }
 0x5ac   : > { %5755 = vpow2.f32 %v1810_v22 }
 0x5ad   : > { %v6843_v29 = vpop.eup %5747  ;;  %v1814_v26 = vmul.f32 1.442695, %v1792_v52  ;;  %v1812_v61 = vmul.f32 1.442695, %v1791_v55 }
 0x5ae   : > { %v1771_v39 = vpop.xlane.xlu0 %1770  ;;  %v1774_v3 = vpop.xlane.xlu1 %1773  ;;  %v1832_v8 = vsel %vm365_vm1, %v6843_v29, 0.0 }
 0x5af   : > { %v6847_v54 = vpop.eup %5749  ;;  %5757 = vpow2.f32 %v1814_v26  ;;  %v1793_v5 = vsub.f32 %v6786_v28, %v1771_v39  ;;  %v1794_v6 = vsub.f32 %v6790_v34, %v1774_v3  ;;  %1833 = vadd.xlane.f32.xlu1 %v1832_v8 }
 0x5b0   : > { %5759 = vpow2.f32 %v1812_v61  ;;  %v1838_v12 = vsel %vm365_vm1, %v6847_v54, 0.0 }
 0x5b1   : > { %v6851_v49 = vpop.eup %5751  ;;  %v1816_v50 = vmul.f32 1.442695, %v1793_v5  ;;  %v1818_v62 = vmul.f32 1.442695, %v1794_v6 }
 0x5b2   : > { %v1835_v56 = vsel %vm365_vm1, %v6851_v49, 0.0  ;;  %v6881_v35 = vpop.permute.xlu0 %2138  ;;  %v1998_v38 = vpop.permute.xlu1 %1997 }
 0x5b3   : > { %5761 = vpow2.f32 %v1816_v50  ;;  %1839 = vadd.xlane.f32.xlu1 %v1838_v12  ;;  %1836 = vadd.xlane.f32.xlu0 %v1835_v56 }
 0x5b4   : > { %5763 = vpow2.f32 %v1818_v62 }
 0x5b5   : > { %v6857_v17 = vpop.eup %5753 }
 0x5b6   : > { %v6859_v28 = vpop.eup %5755  ;;  %v1841_v34 = vsel %vm365_vm1, %v6857_v17, 0.0 }
 0x5b7   : > { %v1844_v48 = vsel %vm365_vm1, %v6859_v28, 0.0  ;;  %1842 = vadd.xlane.f32.xlu0 %v1841_v34 }
 0x5b8   : > { %1845 = vadd.xlane.f32.xlu1 %v1844_v48 }
 0x5b9   : > { %v6865_v14 = vpop.eup %5757 }
 0x5ba   : > { %v6867_v21 = vpop.eup %5759  ;;  %v1850_v18 = vsel %vm365_vm1, %v6865_v14, 0.0 }
 0x5bb   : > { %v1847_v24 = vsel %vm365_vm1, %v6867_v21, 0.0 }
 0x5bc   : > { %1851 = vadd.xlane.f32.xlu1 %v1850_v18  ;;  %1848 = vadd.xlane.f32.xlu0 %v1847_v24 }
 0x5bd   : > { %v6873_v2 = vpop.eup %5761 }
 0x5be   : > { %v6875_v27 = vpop.eup %5763  ;;  %v1853_v4 = vsel %vm365_vm1, %v6873_v2, 0.0 }
 0x5bf   : > { %v1856_v63 = vsel %vm365_vm1, %v6875_v27, 0.0 }
 0x5c0   : > { %1857 = vadd.xlane.f32.xlu1 %v1856_v63  ;;  %1854 = vadd.xlane.f32.xlu0 %v1853_v4 }
 0x5e3   : > { %v1780_v33 = vpop.xlane.xlu1 %1779  ;;  %v1777_v40 = vpop.xlane.xlu0 %1776 }
 0x5e4   : > { %v1796_v22 = vsub.f32 %v6802_v10, %v1780_v33  ;;  %v1795_v15 = vsub.f32 %v6806_v43, %v1777_v40 }
 0x5e6   : > { %v1822_v20 = vmul.f32 1.442695, %v1796_v22  ;;  %v1820_v52 = vmul.f32 1.442695, %v1795_v15 }
 0x5e7   : > { %v1783_v10 = vpop.xlane.xlu0 %1782  ;;  %v6903_v43 = vpop.permute.xlu1 %2091 }
 0x5e8   : > { %5765 = vpow2.f32 %v1822_v20  ;;  %v1797_v3 = vsub.f32 %v6814_v13, %v1783_v10 }
 0x5e9   : > { %5767 = vpow2.f32 %v1820_v52 }
 0x5ea   : > { %v1824_v8 = vmul.f32 1.442695, %v1797_v3 }
 0x5eb   : > { %v6908_v5 = vpop.permute.xlu1 %2234  ;;  %v6910_v6 = vpop.permute.xlu0 %2185 }
 0x5ec   : > { %5769 = vpow2.f32 %v1824_v8 }
 0x5f2   : > { %v6885_v55 = vpop.eup %5765 }
 0x5f3   : > { %v6887_v26 = vpop.eup %5767  ;;  %v1862_v61 = vsel %vm365_vm1, %v6885_v55, 0.0 }
 0x5f4   : > { %1863 = vadd.xlane.f32.xlu1 %v1862_v61  ;;  %v1859_v39 = vsel %vm365_vm1, %v6887_v26, 0.0 }
 0x5f5   : > { %1860 = vadd.xlane.f32.xlu0 %v1859_v39 }
 0x5f6   : > { %v6914_v12 = vpop.eup %5769 }
 0x5f7   : > { %v1865_v18 = vsel %vm365_vm1, %v6914_v12, 0.0 }
 0x605   : > { %2285 = vrot.lane.b32.xlu1 %v6333_v23, %s6084_s26 }
 0x609   : > { %2283 = vrot.lane.b32.xlu1 %v6333_v23, %s6085_s12 }
 0x60b   : > { %2232 = vrot.lane.b32.xlu0 %v6329_v16, %s6085_s12 }
 0x60d   : > { %2387 = vrot.lane.b32.xlu1 %v6341_v37, %s6084_s26 }
 0x611   : > { %2385 = vrot.lane.b32.xlu1 %v6341_v37, %s6085_s12 }
 0x615   : > { %2489 = vrot.lane.b32.xlu1 %v6349_v51, %s6084_s26 }
 0x619   : > { %2487 = vrot.lane.b32.xlu1 %v6349_v51, %s6085_s12 }
 0x61c   : > { %v1828_v50 = vpop.xlane.xlu1 %1827  ;;  %v1831_v62 = vpop.xlane.xlu0 %1830 }
 0x61d   : > { %5771 = vrcp.f32 %v1828_v50 }
 0x61e   : > { %5773 = vrcp.f32 %v1831_v62 }
 0x627   : > { %v5772_v13 = vpop.eup %5771 }
 0x628   : > { %v5774_v56 = vpop.eup %5773  ;;  %v1882_v34 = vmul.f32 %v5772_v13, %v6828_v46 }
 0x629   : > { %v1883_v48 = vmul.f32 %v5774_v56, %v6830_v9 }
 0x62a   : > { %v4900_v24 = vpack.c.bf16 %v1882_v34, %v1882_v34  ;;  %1866 = vadd.xlane.f32.xlu0 %v1865_v18 }
 0x62b   : > { %v4901_v4 = vpack.c.bf16 %v1883_v48, %v1883_v48  ;;  %v1896_v63 = vpack.c.bf16 %v1883_v48, %v1882_v34 }
 0x62c   : > { %4181 = vst.msk [vmem:[%s6594_s20 + $0x8] sm:$0xf] %vm4178_vm4, %v4900_v24 }
 0x62d   : > { %4182 = vst.msk [vmem:[%s6594_s20 + $0xc] sm:$0xf] %vm4178_vm4, %v4901_v4  ;;  %5248 = vmatmul.mubr.msk.bf16.vlgmr.msra.gmra.mrb[56].mxu0 %vm365_vm1, %v1896_v63 }
 0x62e   : > { %5258 = vmatpush3.bf16.msra.mxu0 %v1998_v38  ;;  %5259 = vmatprep.mubr.msk.bf16.mxu0 %vm6078_vm0, %v7966_v0 }
 0x62f   : > { %5269 = vmatprep.subr.bf16.mxu0 %v7966_v0 }
 0x63c   : > { %v1834_v46 = vpop.xlane.xlu1 %1833 }
 0x63d   : > { %5775 = vrcp.f32 %v1834_v46 }
 0x640   : > { %2336 = vrot.lane.b32.xlu0 %v6337_v30, %s6084_s26  ;;  %v1840_v9 = vpop.xlane.xlu1 %1839  ;;  %v1837_v33 = vpop.xlane.xlu0 %1836 }
 0x641   : > { %5777 = vrcp.f32 %v1840_v9 }
 0x642   : > { %5779 = vrcp.f32 %v1837_v33 }
 0x644   : > { %2334 = vrot.lane.b32.xlu0 %v6337_v30, %s6085_s12  ;;  %v1843_v40 = vpop.xlane.xlu0 %1842 }
 0x645   : > { %v1846_v38 = vpop.xlane.xlu1 %1845  ;;  %5781 = vrcp.f32 %v1843_v40 }
 0x646   : > { %5783 = vrcp.f32 %v1846_v38 }
 0x647   : > { %v5776_v22 = vpop.eup %5775 }
 0x648   : > { %v1884_v15 = vmul.f32 %v5776_v22, %v6843_v29  ;;  %2438 = vrot.lane.b32.xlu0 %v6345_v44, %s6084_s26 }
 0x649   : > { %v1852_v20 = vpop.xlane.xlu1 %1851  ;;  %v1849_v52 = vpop.xlane.xlu0 %1848 }
 0x64a   : > { %v4908_v61 = vpack.c.bf16 %v1884_v15, %v1884_v15  ;;  %5785 = vrcp.f32 %v1852_v20 }
 0x64b   : > { %v5778_v39 = vpop.eup %5777  ;;  %5787 = vrcp.f32 %v1849_v52 }
 0x64c   : > { %v5780_v10 = vpop.eup %5779  ;;  %4189 = vst.msk [vmem:[%s6594_s20 + $0x28] sm:$0xf] %vm4178_vm4, %v4908_v61  ;;  %v1886_v3 = vmul.f32 %v5778_v39, %v6847_v54  ;;  %2436 = vrot.lane.b32.xlu0 %v6345_v44, %s6085_s12 }
 0x64d   : > { %v1885_v29 = vmul.f32 %v5780_v10, %v6851_v49  ;;  %v1858_v8 = vpop.xlane.xlu1 %1857  ;;  %v1855_v50 = vpop.xlane.xlu0 %1854 }
 0x64e   : > { %v4916_v62 = vpack.c.bf16 %v1886_v3, %v1886_v3  ;;  %5789 = vrcp.f32 %v1858_v8 }
 0x64f   : > { %v5782_v13 = vpop.eup %5781  ;;  %v4909_v56 = vpack.c.bf16 %v1885_v29, %v1885_v29  ;;  %5791 = vrcp.f32 %v1855_v50  ;;  %v1897_v34 = vpack.c.bf16 %v1885_v29, %v1884_v15 }
 0x650   : > { %v5784_v48 = vpop.eup %5783  ;;  %4197 = vst.msk [vmem:[%s6594_s20 + $0x48] sm:$0xf] %vm4178_vm4, %v4916_v62  ;;  %v1887_v18 = vmul.f32 %v5782_v13, %v6857_v17  ;;  %2540 = vrot.lane.b32.xlu0 %v6353_v58, %s6084_s26 }
 0x651   : > { %4190 = vst.msk [vmem:[%s6594_s20 + $0x2c] sm:$0xf] %vm4178_vm4, %v4909_v56  ;;  %v1888_v54 = vmul.f32 %v5784_v48, %v6859_v28  ;;  %5254 = vmatmul.mubr.msk.bf16.vlgmr.msra.gmra.mrb[56].mxu1 %vm365_vm1, %v1897_v34 }
 0x652   : > { %v4917_v49 = vpack.c.bf16 %v1887_v18, %v1887_v18  ;;  %5264 = vmatpush3.bf16.msra.mxu1 %v6824_v57  ;;  %v1898_v24 = vpack.c.bf16 %v1887_v18, %v1886_v3  ;;  %5265 = vmatprep.mubr.msk.bf16.mxu1 %vm6078_vm0, %v7966_v0 }
 0x653   : > { %v4924_v4 = vpack.c.bf16 %v1888_v54, %v1888_v54  ;;  %5275 = vmatprep.subr.bf16.mxu1 %v7966_v0 }
 0x654   : > { %v5786_v17 = vpop.eup %5785  ;;  %4198 = vst.msk [vmem:[%s6594_s20 + $0x4c] sm:$0xf] %vm4178_vm4, %v4917_v49  ;;  %2538 = vrot.lane.b32.xlu0 %v6353_v58, %s6085_s12  ;;  %5260 = vmatmul.mubr.msk.bf16.vlgmr.msra.gmra.mrb[60].mxu0 %vm365_vm1, %v1898_v24  ;;  %s7825_s12 = scalar_lea.vmem [#allocation7], %s5489_s16  ;;  %s6093_s16 = smov [#allocation8]  }
 0x655   : > { %v5788_v28 = vpop.eup %5787  ;;  %4205 = vst.msk [vmem:[%s6594_s20 + $0x68] sm:$0xf] %vm4178_vm4, %v4924_v4  ;;  %v1890_v57 = vmul.f32 %v5786_v17, %v6865_v14  ;;  %5270 = vmatpush3.bf16.msra.mxu0 %v6903_v43  ;;  %5271 = vmatprep.mubr.msk.bf16.mxu0 %vm6078_vm0, %v7966_v0  ;;  %s5973_s18 = sshll.u32 %s6093_s16, 4  ;;  %s5974_s18 = int_to_ptr.vmem [resolvable:$false] %s5973_s18 }
 0x656   : > { %v1889_v63 = vmul.f32 %v5788_v28, %v6867_v21  ;;  %5281 = vmatprep.subr.bf16.mxu0 %v7966_v0  ;;  %s5975_s26 = scalar_lea.vmem %s5974_s18, 7168  ;;  %p5976_p10 = scmp.lt.s32.totalorder %s7839_s10, %s5974_s18 }
 0x657   : > { %v4932_v46 = vpack.c.bf16 %v1890_v57, %v1890_v57 }
 0x658   : > { %v5790_v9 = vpop.eup %5789  ;;  %v4925_v33 = vpack.c.bf16 %v1889_v63, %v1889_v63  ;;  %v1899_v40 = vpack.c.bf16 %v1889_v63, %v1888_v54 }
 0x659   : > { %v5792_v38 = vpop.eup %5791  ;;  %4213 = vst.msk [vmem:[%s6594_s20 + $0x88] sm:$0xf] %vm4178_vm4, %v4932_v46  ;;  %v1892_v14 = vmul.f32 %v5790_v9, %v6875_v27 }
 0x65a   : > { %4206 = vst.msk [vmem:[%s6594_s20 + $0x6c] sm:$0xf] %vm4178_vm4, %v4925_v33  ;;  %v1891_v43 = vmul.f32 %v5792_v38, %v6873_v2  ;;  %5266 = vmatmul.mubr.msk.bf16.vlgmr.msra.gmra.mrb[60].mxu1 %vm365_vm1, %v1899_v40 }
 0x65b   : > { %v4940_v21 = vpack.c.bf16 %v1892_v14, %v1892_v14  ;;  %5276 = vmatpush3.bf16.msra.mxu1 %v6881_v35  ;;  %5277 = vmatprep.mubr.msk.bf16.mxu1 %vm6078_vm0, %v7966_v0 }
 0x65c   : > { %v4933_v22 = vpack.c.bf16 %v1891_v43, %v1891_v43  ;;  %v1900_v15 = vpack.c.bf16 %v1891_v43, %v1890_v57  ;;  %5287 = vmatprep.subr.bf16.mxu1 %v7966_v0 }
 0x65d   : > { %4221 = vst.msk [vmem:[%s6594_s20 + $0xa8] sm:$0xf] %vm4178_vm4, %v4940_v21 }
 0x65e   : > { %4214 = vst.msk [vmem:[%s6594_s20 + $0x8c] sm:$0xf] %vm4178_vm4, %v4933_v22  ;;  %5272 = vmatmul.mubr.msk.bf16.vlgmr.msra.gmra.mrb[64].mxu0 %vm365_vm1, %v1900_v15 }
 0x65f   : > { %5282 = vmatpush3.bf16.msra.mxu0 %v6910_v6  ;;  %5283 = vmatprep.mubr.msk.bf16.mxu0 %vm6078_vm0, %v7966_v0  ;;  %v2240_v6 = vsel %vm489_vm2, %v6908_v5, 0 }
 0x660   : > { %5293 = vmatprep.subr.bf16.mxu0 %v7966_v0 }
 0x681   : > { %v1864_v2 = vpop.xlane.xlu1 %1863 }
 0x682   : > { %5793 = vrcp.f32 %v1864_v2  ;;  %v1861_v27 = vpop.xlane.xlu0 %1860 }
 0x683   : > { %5795 = vrcp.f32 %v1861_v27 }
 0x685   : > { %v2286_v5 = vpop.permute.xlu1 %2285 }
 0x686   : > { %v2291_v49 = vsel %vm489_vm2, %v2286_v5, 0 }
 0x689   : > { %v2284_v13 = vpop.permute.xlu1 %2283 }
 0x68c   : > { %v5794_v35 = vpop.eup %5793 }
 0x68d   : > { %v5796_v20 = vpop.eup %5795  ;;  %v1894_v52 = vmul.f32 %v5794_v35, %v6885_v55  ;;  %v2233_v55 = vpop.permute.xlu0 %2232 }
 0x68e   : > { %v1893_v61 = vmul.f32 %v5796_v20, %v6887_v26  ;;  %v2388_v24 = vpop.permute.xlu1 %2387 }
 0x68f   : > { %v4948_v39 = vpack.c.bf16 %v1894_v52, %v1894_v52  ;;  %v2393_v57 = vsel %vm489_vm2, %v2388_v24, 0 }
 0x690   : > { %v4941_v10 = vpack.c.bf16 %v1893_v61, %v1893_v61  ;;  %v1901_v3 = vpack.c.bf16 %v1893_v61, %v1892_v14 }
 0x691   : > { %4229 = vst.msk [vmem:[%s6594_s20 + $0xc8] sm:$0xf] %vm4178_vm4, %v4948_v39 }
 0x692   : > { %4222 = vst.msk [vmem:[%s6594_s20 + $0xac] sm:$0xf] %vm4178_vm4, %v4941_v10  ;;  %5278 = vmatmul.mubr.msk.bf16.vlgmr.msra.gmra.mrb[64].mxu1 %vm365_vm1, %v1901_v3  ;;  %v2386_v28 = vpop.permute.xlu1 %2385 }
 0x693   : > { %5288 = vmatpush3.bf16.xpose.msra.mxu1 %v2240_v6  ;;  %5289 = vmatprep.mubr.msk.bf16.mxu1 %vm6078_vm0, %v7966_v0 }
 0x694   : > { %5299 = vmatprep.subr.bf16.mxu1 %v7966_v0 }
 0x696   : > { %v2490_v46 = vpop.permute.xlu1 %2489 }
 0x697   : > { %v2495_v9 = vsel %vm489_vm2, %v2490_v46, 0 }
 0x69a   : > { %5290 = vmatmul.mubr.msk.bf16.vlgmr.msra.gmra.mrb[68].mxu1 %vm489_vm2, %v2233_v55  ;;  %v2488_v33 = vpop.permute.xlu1 %2487 }
 0x69b   : > { %5301 = vmatprep.mubr.msk.bf16.mxu1 %vm6078_vm0, %v7966_v0 }
 0x6b7   : > { %v1867_v26 = vpop.xlane.xlu0 %1866 }
 0x6b8   : > { %5797 = vrcp.f32 %v1867_v26 }
 0x6bb   : > { %v2337_v29 = vpop.permute.xlu0 %2336 }
 0x6bc   : > { %v2342_v8 = vsel %vm489_vm2, %v2337_v29, 0 }
 0x6bd   : > { %5300 = vmatpush3.bf16.xpose.msra.mxu1 %v2342_v8 }
 0x6be   : > { %5311 = vmatprep.subr.bf16.mxu1 %v7966_v0 }
 0x6bf   : > { %v2335_v50 = vpop.permute.xlu0 %2334 }
 0x6c2   : > { %v5798_v62 = vpop.eup %5797 }
 0x6c3   : > { %v1895_v56 = vmul.f32 %v5798_v62, %v6914_v12  ;;  %v2439_v34 = vpop.permute.xlu0 %2438 }
 0x6c4   : > { %v2444_v48 = vsel %vm489_vm2, %v2439_v34, 0  ;;  %5302 = vmatmul.mubr.msk.bf16.vlgmr.msra.gmra.mrb[72].mxu1 %vm489_vm2, %v2335_v50 }
 0x6c5   : > { %v4949_v18 = vpack.c.bf16 %v1895_v56, %v1895_v56  ;;  %5312 = vmatpush3.bf16.xpose.msra.mxu1 %v2444_v48  ;;  %v1902_v54 = vpack.c.bf16 %v1895_v56, %v1894_v52  ;;  %5313 = vmatprep.mubr.msk.bf16.mxu1 %vm6078_vm0, %v7966_v0 }
 0x6c6   : > { %5323 = vmatprep.subr.bf16.mxu1 %v7966_v0 }
 0x6c7   : > { %4230 = vst.msk [vmem:[%s6594_s20 + $0xcc] sm:$0xf] %vm4178_vm4, %v4949_v18  ;;  %5284 = vmatmul.mubr.msk.bf16.vlgmr.msra.gmra.mrb[68].mxu0 %vm365_vm1, %v1902_v54  ;;  %v2437_v12 = vpop.permute.xlu0 %2436 }
 0x6c8   : > { %5294 = vmatpush3.bf16.xpose.msra.mxu0 %v2291_v49  ;;  %5295 = vmatprep.mubr.msk.bf16.mxu0 %vm6078_vm0, %v7966_v0 }
 0x6c9   : > { %5305 = vmatprep.subr.bf16.mxu0 %v7966_v0 }
 0x6cb   : > { %v2541_v4 = vpop.permute.xlu0 %2540 }
 0x6cc   : > { %v2546_v17 = vsel %vm489_vm2, %v2541_v4, 0  ;;  %5314 = vmatmul.mubr.msk.bf16.vlgmr.msra.gmra.mrb[76].mxu1 %vm489_vm2, %v2437_v12 }
 0x6cd   : > { %5324 = vmatpush3.bf16.xpose.msra.mxu1 %v2546_v17  ;;  %5325 = vmatprep.mubr.msk.bf16.mxu1 %vm6078_vm0, %v7966_v0 }
 0x6ce   : > { %5335 = vmatprep.subr.bf16.mxu1 %v7966_v0 }
 0x6cf   : > { %5296 = vmatmul.mubr.msk.bf16.vlgmr.msra.gmra.mrb[72].mxu0 %vm489_vm2, %v2284_v13  ;;  %v2539_v63 = vpop.permute.xlu0 %2538 }
 0x6d0   : > { %5306 = vmatpush3.bf16.xpose.msra.mxu0 %v2393_v57  ;;  %5307 = vmatprep.mubr.msk.bf16.mxu0 %vm6078_vm0, %v7966_v0 }
 0x6d1   : > { %5317 = vmatprep.subr.bf16.mxu0 %v7966_v0 }
 0x6d4   : > { %5326 = vmatmul.mubr.msk.bf16.vlgmr.msra.gmra.mrb[80].mxu1 %vm489_vm2, %v2539_v63 }
 0x6d5   : > { %5337 = vmatprep.mubr.msk.bf16.mxu1 %vm6078_vm0, %v7966_v0 }
 0x6d7   : > { %5308 = vmatmul.mubr.msk.bf16.vlgmr.msra.gmra.mrb[76].mxu0 %vm489_vm2, %v2386_v28 }
 0x6d8   : > { %5318 = vmatpush3.bf16.xpose.msra.mxu0 %v2495_v9  ;;  %5319 = vmatprep.mubr.msk.bf16.mxu0 %vm6078_vm0, %v7966_v0 }
 0x6d9   : > { %5329 = vmatprep.subr.bf16.mxu0 %v7966_v0 }
 0x6df   : > { %5320 = vmatmul.mubr.msk.bf16.vlgmr.msra.gmra.mrb[80].mxu0 %vm489_vm2, %v2488_v33 }
 0x6e0   : > { %5331 = vmatprep.mubr.msk.bf16.mxu0 %vm6078_vm0, %v7966_v0 }
 0x700   : > { %v7038_v40 = vpop.f32.mrb[56].mxu0 }
 0x701   : > { %v5249_v38 = vpop.f32.mrb[57].mxu0 }
 0x702   : > { %v7040_v14 = vpop.f32.mrb[58].mxu0 }
 0x703   : > { %v5250_v21 = vpop.f32.mrb[59].mxu0 }
 0x724   : > { %v7044_v22 = vpop.f32.mrb[56].mxu1 }
 0x725   : > { %v5255_v15 = vpop.f32.mrb[57].mxu1 }
 0x726   : > { %v7046_v2 = vpop.f32.mrb[58].mxu1 }
 0x727   : > { %v5256_v35 = vpop.f32.mrb[59].mxu1  ;;  %v7050_v20 = vpop.f32.mrb[60].mxu0 }
 0x728   : > { %v5261_v52 = vpop.f32.mrb[61].mxu0 }
 0x729   : > { %v7052_v61 = vpop.f32.mrb[62].mxu0 }
 0x72a   : > { %v5262_v10 = vpop.f32.mrb[63].mxu0 }
 0x72d   : > { %v7056_v3 = vpop.f32.mrb[60].mxu1 }
 0x72e   : > { %v5267_v6 = vpop.f32.mrb[61].mxu1 }
 0x72f   : > { %v7058_v55 = vpop.f32.mrb[62].mxu1 }
 0x730   : > { %v5268_v29 = vpop.f32.mrb[63].mxu1 }
 0x731   : > { %v7062_v5 = vpop.f32.mrb[64].mxu0 }
 0x732   : > { %v5273_v8 = vpop.f32.mrb[65].mxu0 }
 0x733   : > { %v7064_v50 = vpop.f32.mrb[66].mxu0 }
 0x734   : > { %v5274_v13 = vpop.f32.mrb[67].mxu0 }
 0x765   : > { %v7068_v56 = vpop.f32.mrb[64].mxu1 }
 0x766   : > { %v5279_v34 = vpop.f32.mrb[65].mxu1 }
 0x767   : > { %v7070_v48 = vpop.f32.mrb[66].mxu1 }
 0x768   : > { %v5280_v54 = vpop.f32.mrb[67].mxu1 }
 0x76d   : > { %v2276_v49 = vpop.f32.mrb[68].mxu1 }
 0x76e   : > { %v2589_v12 = vmul.f32 0.5, %v2276_v49  ;;  %v5291_v24 = vpop.f32.mrb[69].mxu1 }
 0x76f   : > { %v2279_v4 = vpop.f32.mrb[70].mxu1 }
 0x770   : > { %v7076_v17 = vsel %vm485_vm3, %v2589_v12, -1e+30  ;;  %v2590_v28 = vmul.f32 0.5, %v2279_v4  ;;  %v5292_v57 = vpop.f32.mrb[71].mxu1 }
 0x771   : > { %v2617_v63 = vsel %vm365_vm1, %v7076_v17, -inf }
 0x772   : > { %v7082_v46 = vsel %vm485_vm3, %v2590_v28, -1e+30  ;;  %2618 = vmax.xlane.f32.xlu1 %v2617_v63 }
 0x773   : > { %v2620_v9 = vsel %vm365_vm1, %v7082_v46, -inf }
 0x774   : > { %2621 = vmax.xlane.f32.xlu0 %v2620_v9 }
 0x797   : > { %v2378_v33 = vpop.f32.mrb[72].mxu1 }
 0x798   : > { %v5303_v38 = vpop.f32.mrb[73].mxu1  ;;  %v2593_v12 = vmul.f32 0.5, %v2378_v33 }
 0x799   : > { %v2381_v21 = vpop.f32.mrb[74].mxu1 }
 0x79a   : > { %v7086_v15 = vpop.f32.mrb[68].mxu0  ;;  %v5304_v35 = vpop.f32.mrb[75].mxu1  ;;  %v2594_v57 = vmul.f32 0.5, %v2381_v21 }
 0x79b   : > { %v5285_v52 = vpop.f32.mrb[69].mxu0 }
 0x79c   : > { %v7088_v10 = vpop.f32.mrb[70].mxu0  ;;  %v7100_v52 = vsel %vm485_vm3, %v2593_v12, -1e+30 }
 0x79d   : > { %v5286_v29 = vpop.f32.mrb[71].mxu0  ;;  %v2629_v12 = vsel %vm365_vm1, %v7100_v52, -inf }
 0x79f   : > { %v2480_v8 = vpop.f32.mrb[76].mxu1 }
 0x7a0   : > { %v5315_v13 = vpop.f32.mrb[77].mxu1 }
 0x7a1   : > { %v2483_v34 = vpop.f32.mrb[78].mxu1 }
 0x7a2   : > { %v2327_v54 = vpop.f32.mrb[72].mxu0  ;;  %v5316_v49 = vpop.f32.mrb[79].mxu1  ;;  %v2598_v6 = vmul.f32 0.5, %v2483_v34 }
 0x7a3   : > { %v2591_v24 = vmul.f32 0.5, %v2327_v54  ;;  %v5297_v4 = vpop.f32.mrb[73].mxu0  ;;  %v7110_v54 = vsel %vm485_vm3, %v2594_v57, -1e+30 }
 0x7a4   : > { %v2330_v28 = vpop.f32.mrb[74].mxu0 }
 0x7a5   : > { %v7094_v63 = vsel %vm485_vm3, %v2591_v24, -1e+30  ;;  %v2592_v9 = vmul.f32 0.5, %v2330_v28  ;;  %v5298_v38 = vpop.f32.mrb[75].mxu0  ;;  %v2597_v28 = vmul.f32 0.5, %v2480_v8 }
 0x7a6   : > { %v2623_v35 = vsel %vm365_vm1, %v7094_v63, -inf }
 0x7a7   : > { %v7104_v33 = vsel %vm485_vm3, %v2592_v9, -1e+30  ;;  %v2582_v29 = vpop.f32.mrb[80].mxu1  ;;  %2624 = vmax.xlane.f32.xlu0 %v2623_v35  ;;  %v7124_v8 = vsel %vm485_vm3, %v2597_v28, -1e+30 }
 0x7a8   : > { %v5327_v21 = vpop.f32.mrb[81].mxu1  ;;  %v2626_v13 = vsel %vm365_vm1, %v7104_v33, -inf }
 0x7a9   : > { %v2585_v49 = vpop.f32.mrb[82].mxu1  ;;  %2627 = vmax.xlane.f32.xlu1 %v2626_v13  ;;  %v2632_v21 = vsel %vm365_vm1, %v7110_v54, -inf }
 0x7aa   : > { %v2429_v24 = vpop.f32.mrb[76].mxu0  ;;  %v5328_v4 = vpop.f32.mrb[83].mxu1 }
 0x7ab   : > { %v2595_v9 = vmul.f32 0.5, %v2429_v24  ;;  %2630 = vmax.xlane.f32.xlu0 %v2629_v12  ;;  %v5309_v38 = vpop.f32.mrb[77].mxu0  ;;  %v7134_v12 = vsel %vm485_vm3, %v2598_v6, -1e+30 }
 0x7ac   : > { %v2432_v35 = vpop.f32.mrb[78].mxu0  ;;  %v2641_v38 = vsel %vm365_vm1, %v7124_v8, -inf }
 0x7ad   : > { %v7118_v57 = vsel %vm485_vm3, %v2595_v9, -1e+30  ;;  %v2596_v39 = vmul.f32 0.5, %v2432_v35  ;;  %2633 = vmax.xlane.f32.xlu1 %v2632_v21  ;;  %v5310_v13 = vpop.f32.mrb[79].mxu0  ;;  %v2601_v35 = vmul.f32 0.5, %v2582_v29 }
 0x7ae   : > { %v2635_v4 = vsel %vm365_vm1, %v7118_v57, -inf }
 0x7af   : > { %v7128_v24 = vsel %vm485_vm3, %v2596_v39, -1e+30  ;;  %2636 = vmax.xlane.f32.xlu0 %v2635_v4  ;;  %v2644_v39 = vsel %vm365_vm1, %v7134_v12, -inf  ;;  %v7148_v29 = vsel %vm485_vm3, %v2601_v35, -1e+30 }
 0x7b0   : > { %v2638_v34 = vsel %vm365_vm1, %v7128_v24, -inf }
 0x7b1   : > { %2639 = vmax.xlane.f32.xlu1 %v2638_v34 }
 0x7b2   : > { %v2531_v9 = vpop.f32.mrb[80].mxu0 }
 0x7b3   : > { %v2599_v28 = vmul.f32 0.5, %v2531_v9  ;;  %2642 = vmax.xlane.f32.xlu0 %v2641_v38  ;;  %v5321_v21 = vpop.f32.mrb[81].mxu0 }
 0x7b4   : > { %v2534_v13 = vpop.f32.mrb[82].mxu0 }
 0x7b5   : > { %v7142_v4 = vsel %vm485_vm3, %v2599_v28, -1e+30  ;;  %v2600_v27 = vmul.f32 0.5, %v2534_v13  ;;  %2645 = vmax.xlane.f32.xlu1 %v2644_v39  ;;  %v5322_v6 = vpop.f32.mrb[83].mxu0  ;;  %v2653_v28 = vsel %vm365_vm1, %v7148_v29, -inf }
 0x7b6   : > { %v2647_v34 = vsel %vm365_vm1, %v7142_v4, -inf }
 0x7b7   : > { %v7152_v9 = vsel %vm485_vm3, %v2600_v27, -1e+30  ;;  %2648 = vmax.xlane.f32.xlu0 %v2647_v34  ;;  %v2602_v27 = vmul.f32 0.5, %v2585_v49 }
 0x7b8   : > { %v2650_v38 = vsel %vm365_vm1, %v7152_v9, -inf }
 0x7b9   : > { %2651 = vmax.xlane.f32.xlu1 %v2650_v38  ;;  %v7166_v35 = vsel %vm485_vm3, %v2602_v27, -1e+30 }
 0x7ba   : > { %v2656_v21 = vsel %vm365_vm1, %v7166_v35, -inf }
 0x7bb   : > { %2654 = vmax.xlane.f32.xlu0 %v2653_v28 }
 0x7ca   : > { %2825 = vrot.lane.b32.xlu1 %v6333_v23, %s6086_s7 }
 0x7ce   : > { %2872 = vrot.lane.b32.xlu1 %v6337_v30, %s6086_s7 }
 0x7d1   : > { %2778 = vrot.lane.b32.xlu0 %v6329_v16, %s6086_s7 }
 0x7d2   : > { %2966 = vrot.lane.b32.xlu1 %v6345_v44, %s6086_s7 }
 0x7d5   : > { %2919 = vrot.lane.b32.xlu0 %v6341_v37, %s6086_s7 }
 0x7d9   : > { %3013 = vrot.lane.b32.xlu0 %v6349_v51, %s6086_s7 }
 0x7f6   : > { %2657 = vmax.xlane.f32.xlu1 %v2656_v21 }
 0x7ff   : > { %v2619_v13 = vpop.xlane.xlu1 %2618 }
 0x800   : > { %v2659_v39 = vsub.f32 %v7076_v17, %v2619_v13 }
 0x801   : > { %v2622_v38 = vpop.xlane.xlu0 %2621 }
 0x802   : > { %v2673_v6 = vmul.f32 1.442695, %v2659_v39  ;;  %v2660_v28 = vsub.f32 %v7082_v46, %v2622_v38 }
 0x804   : > { %5799 = vpow2.f32 %v2673_v6  ;;  %v2675_v27 = vmul.f32 1.442695, %v2660_v28 }
 0x806   : > { %5801 = vpow2.f32 %v2675_v27 }
 0x807   : > { %3060 = vrot.lane.b32.xlu1 %v6353_v58, %s6086_s7  ;;  %s4960_s7 = smul.u32 3584, %s6153_s25 }
 0x80e   : > { %v7172_v34 = vpop.eup %5799 }
 0x80f   : > { %v2701_v49 = vsel %vm365_vm1, %v7172_v34, 0.0 }
 0x810   : > { %2702 = vadd.xlane.f32.xlu0 %v2701_v49  ;;  %v7177_v43 = vpop.eup %5801 }
 0x811   : > { %v2704_v17 = vsel %vm365_vm1, %v7177_v43, 0.0 }
 0x82b   : > { %2705 = vadd.xlane.f32.xlu1 %v2704_v17 }
 0x834   : > { %v2625_v21 = vpop.xlane.xlu0 %2624 }
 0x835   : > { %v2661_v13 = vsub.f32 %v7094_v63, %v2625_v21 }
 0x836   : > { %v2628_v39 = vpop.xlane.xlu1 %2627 }
 0x837   : > { %v2677_v6 = vmul.f32 1.442695, %v2661_v13  ;;  %v2662_v18 = vsub.f32 %v7104_v33, %v2628_v39 }
 0x838   : > { %v2631_v62 = vpop.xlane.xlu0 %2630 }
 0x839   : > { %5803 = vpow2.f32 %v2677_v6  ;;  %v2679_v49 = vmul.f32 1.442695, %v2662_v18  ;;  %v2663_v46 = vsub.f32 %v7100_v52, %v2631_v62 }
 0x83a   : > { %v2634_v38 = vpop.xlane.xlu1 %2633 }
 0x83b   : > { %5805 = vpow2.f32 %v2679_v49  ;;  %v2681_v28 = vmul.f32 1.442695, %v2663_v46  ;;  %v2664_v27 = vsub.f32 %v7110_v54, %v2634_v38 }
 0x83c   : > { %v2637_v26 = vpop.xlane.xlu0 %2636 }
 0x83d   : > { %5807 = vpow2.f32 %v2681_v28  ;;  %v2683_v17 = vmul.f32 1.442695, %v2664_v27  ;;  %v2665_v0 = vsub.f32 %v7118_v57, %v2637_v26 }
 0x83e   : > { %v2640_v63 = vpop.xlane.xlu1 %2639 }
 0x83f   : > { %5809 = vpow2.f32 %v2683_v17  ;;  %v2685_v21 = vmul.f32 1.442695, %v2665_v0  ;;  %v2666_v33 = vsub.f32 %v7128_v24, %v2640_v63 }
 0x840   : > { %v2643_v13 = vpop.xlane.xlu0 %2642 }
 0x841   : > { %5811 = vpow2.f32 %v2685_v21  ;;  %v2687_v18 = vmul.f32 1.442695, %v2666_v33  ;;  %v2667_v62 = vsub.f32 %v7124_v8, %v2643_v13 }
 0x842   : > { %v2646_v52 = vpop.xlane.xlu1 %2645 }
 0x843   : > { %v7188_v39 = vpop.eup %5803  ;;  %5813 = vpow2.f32 %v2687_v18  ;;  %v2689_v54 = vmul.f32 1.442695, %v2667_v62  ;;  %v2668_v6 = vsub.f32 %v7134_v12, %v2646_v52 }
 0x844   : > { %v2649_v49 = vpop.xlane.xlu0 %2648  ;;  %v2707_v26 = vsel %vm365_vm1, %v7188_v39, 0.0 }
 0x845   : > { %v7193_v57 = vpop.eup %5805  ;;  %5815 = vpow2.f32 %v2689_v54  ;;  %v2691_v0 = vmul.f32 1.442695, %v2668_v6  ;;  %v2669_v24 = vsub.f32 %v7142_v4, %v2649_v49  ;;  %2708 = vadd.xlane.f32.xlu0 %v2707_v26  ;;  %v7993_v54 = vmov 0.0  }
 0x846   : > { %v2652_v46 = vpop.xlane.xlu1 %2651  ;;  %v2710_v8 = vsel %vm365_vm1, %v7193_v57, 0.0 }
 0x847   : > { %v7198_v38 = vpop.eup %5807  ;;  %5817 = vpow2.f32 %v2691_v0  ;;  %v2693_v28 = vmul.f32 1.442695, %v2669_v24  ;;  %v2670_v12 = vsub.f32 %v7152_v9, %v2652_v46  ;;  %2711 = vadd.xlane.f32.xlu1 %v2710_v8 }
 0x848   : > { %v2655_v27 = vpop.xlane.xlu0 %2654  ;;  %v2713_v17 = vsel %vm365_vm1, %v7198_v38, 0.0 }
 0x849   : > { %v7203_v63 = vpop.eup %5809  ;;  %5819 = vpow2.f32 %v2693_v28  ;;  %v2695_v4 = vmul.f32 1.442695, %v2670_v12  ;;  %v2671_v21 = vsub.f32 %v7148_v29, %v2655_v27  ;;  %2714 = vadd.xlane.f32.xlu0 %v2713_v17 }
 0x84a   : > { %v2826_v33 = vpop.permute.xlu1 %2825  ;;  %v2716_v13 = vsel %vm365_vm1, %v7203_v63, 0.0 }
 0x84b   : > { %v7208_v18 = vpop.eup %5811  ;;  %5821 = vpow2.f32 %v2695_v4  ;;  %v2697_v9 = vmul.f32 1.442695, %v2671_v21  ;;  %2717 = vadd.xlane.f32.xlu1 %v2716_v13  ;;  %5336 = vmatpush3.bf16.msra.mxu1 %v2826_v33 }
 0x84c   : > { %v2779_v62 = vpop.permute.xlu0 %2778  ;;  %v2719_v52 = vsel %vm365_vm1, %v7208_v18, 0.0  ;;  %5347 = vmatprep.subr.bf16.mxu1 %v7993_v54 }
 0x84d   : > { %v7213_v6 = vpop.eup %5813  ;;  %5823 = vpow2.f32 %v2697_v9  ;;  %2720 = vadd.xlane.f32.xlu0 %v2719_v52  ;;  %5330 = vmatpush3.bf16.msra.mxu0 %v2779_v62 }
 0x84e   : > { %v2722_v29 = vsel %vm365_vm1, %v7213_v6, 0.0  ;;  %5341 = vmatprep.subr.bf16.mxu0 %v7993_v54  ;;  %v2873_v4 = vpop.permute.xlu1 %2872 }
 0x84f   : > { %v7218_v49 = vpop.eup %5815  ;;  %2723 = vadd.xlane.f32.xlu1 %v2722_v29 }
 0x850   : > { %v2725_v26 = vsel %vm365_vm1, %v7218_v49, 0.0  ;;  %v7253_v52 = vpop.permute.xlu0 %2919 }
 0x851   : > { %v7222_v0 = vpop.eup %5817  ;;  %2726 = vadd.xlane.f32.xlu0 %v2725_v26 }
 0x852   : > { %v2728_v24 = vsel %vm365_vm1, %v7222_v0, 0.0  ;;  %v7245_v21 = vpop.permute.xlu1 %2966 }
 0x853   : > { %v7226_v46 = vpop.eup %5819  ;;  %2729 = vadd.xlane.f32.xlu1 %v2728_v24 }
 0x854   : > { %v2731_v8 = vsel %vm365_vm1, %v7226_v46, 0.0  ;;  %v7257_v26 = vpop.permute.xlu0 %3013 }
 0x855   : > { %v7230_v28 = vpop.eup %5821  ;;  %2732 = vadd.xlane.f32.xlu0 %v2731_v8 }
 0x856   : > { %v2734_v12 = vsel %vm365_vm1, %v7230_v28, 0.0 }
 0x857   : > { %v7234_v27 = vpop.eup %5823  ;;  %2735 = vadd.xlane.f32.xlu1 %v2734_v12 }
 0x858   : > { %v2737_v17 = vsel %vm365_vm1, %v7234_v27, 0.0 }
 0x859   : > { %2738 = vadd.xlane.f32.xlu0 %v2737_v17 }
 0x868   : > { %3160 = vrot.lane.b32.xlu1 %v6333_v23, %s6087_s11 }
 0x86f   : > { %3109 = vrot.lane.b32.xlu0 %v6329_v16, %s6087_s11 }
 0x873   : > { %3107 = vrot.lane.b32.xlu0 %v6329_v16, %s6088_s8 }
 0x877   : > { %3211 = vrot.lane.b32.xlu0 %v6337_v30, %s6087_s11 }
 0x87b   : > { %3209 = vrot.lane.b32.xlu0 %v6337_v30, %s6088_s8 }
 0x87f   : > { %3313 = vrot.lane.b32.xlu0 %v6345_v44, %s6087_s11 }
 0x883   : > { %3364 = vrot.lane.b32.xlu0 %v6349_v51, %s6087_s11  ;;  %v2658_v33 = vpop.xlane.xlu1 %2657 }
 0x884   : > { %v2672_v13 = vsub.f32 %v7166_v35, %v2658_v33 }
 0x886   : > { %v2699_v9 = vmul.f32 1.442695, %v2672_v13 }
 0x887   : > { %3415 = vrot.lane.b32.xlu0 %v6353_v58, %s6087_s11  ;;  %v7269_v17 = vpop.permute.xlu1 %3060 }
 0x888   : > { %5825 = vpow2.f32 %v2699_v9 }
 0x892   : > { %v7251_v62 = vpop.eup %5825 }
 0x893   : > { %v2740_v29 = vsel %vm365_vm1, %v7251_v62, 0.0 }
 0x894   : > { %2741 = vadd.xlane.f32.xlu1 %v2740_v29 }
 0x89d   : > { %v2703_v24 = vpop.xlane.xlu0 %2702 }
 0x89e   : > { %5827 = vrcp.f32 %v2703_v24 }
 0x8a5   : > { %3158 = vrot.lane.b32.xlu1 %v6333_v23, %s6088_s8 }
 0x8a8   : > { %v5828_v35 = vpop.eup %5827 }
 0x8a9   : > { %v2757_v8 = vmul.f32 %v5828_v35, %v7172_v34  ;;  %3262 = vrot.lane.b32.xlu1 %v6341_v37, %s6087_s11 }
 0x8ab   : > { %v4902_v12 = vpack.c.bf16 %v2757_v8, %v2757_v8 }
 0x8ad   : > { %4183 = vst.msk [vmem:[%s6594_s20 + $0x10] sm:$0xf] %vm4178_vm4, %v4902_v12  ;;  %3260 = vrot.lane.b32.xlu1 %v6341_v37, %s6088_s8 }
 0x8b1   : > { %3311 = vrot.lane.b32.xlu1 %v6345_v44, %s6088_s8 }
 0x8b5   : > { %3362 = vrot.lane.b32.xlu1 %v6349_v51, %s6088_s8 }
 0x8b8   : > { %v2706_v33 = vpop.xlane.xlu1 %2705 }
 0x8b9   : > { %5829 = vrcp.f32 %v2706_v33  ;;  %3413 = vrot.lane.b32.xlu1 %v6353_v58, %s6088_s8 }
 0x8bd   : > { %3653 = vrot.lane.b32.xlu1 %v6329_v16, %s6089_s27 }
 0x8c3   : > { %v5830_v34 = vpop.eup %5829 }
 0x8c4   : > { %v2758_v13 = vmul.f32 %v5830_v34, %v7177_v43 }
 0x8c6   : > { %v4903_v9 = vpack.c.bf16 %v2758_v13, %v2758_v13  ;;  %v2771_v29 = vpack.c.bf16 %v2758_v13, %v2757_v8 }
 0x8c8   : > { %4184 = vst.msk [vmem:[%s6594_s20 + $0x14] sm:$0xf] %vm4178_vm4, %v4903_v9  ;;  %5332 = vmatmul.mubr.msk.bf16.vlgmr.msra.gmra.mrb[84].mxu0 %vm365_vm1, %v2771_v29 }
 0x8c9   : > { %5342 = vmatpush3.bf16.msra.mxu0 %v2873_v4  ;;  %5343 = vmatprep.mubr.msk.bf16.mxu0 %vm6078_vm0, %v7993_v54 }
 0x8ca   : > { %5353 = vmatprep.subr.bf16.mxu0 %v7993_v54 }
 0x8d2   : > { %v2709_v24 = vpop.xlane.xlu0 %2708 }
 0x8d3   : > { %5831 = vrcp.f32 %v2709_v24 }
 0x8d4   : > { %v2712_v35 = vpop.xlane.xlu1 %2711 }
 0x8d5   : > { %5833 = vrcp.f32 %v2712_v35 }
 0x8d6   : > { %v2715_v16 = vpop.xlane.xlu0 %2714 }
 0x8d7   : > { %5835 = vrcp.f32 %v2715_v16 }
 0x8d8   : > { %v2718_v12 = vpop.xlane.xlu1 %2717 }
 0x8d9   : > { %5837 = vrcp.f32 %v2718_v12 }
 0x8da   : > { %v2721_v43 = vpop.xlane.xlu0 %2720 }
 0x8db   : > { %5839 = vrcp.f32 %v2721_v43 }
 0x8dc   : > { %v2724_v8 = vpop.xlane.xlu1 %2723 }
 0x8dd   : > { %v5832_v33 = vpop.eup %5831  ;;  %5841 = vrcp.f32 %v2724_v8 }
 0x8de   : > { %v2759_v4 = vmul.f32 %v5832_v33, %v7188_v39  ;;  %v2727_v34 = vpop.xlane.xlu0 %2726 }
 0x8df   : > { %v5834_v13 = vpop.eup %5833  ;;  %5843 = vrcp.f32 %v2727_v34 }
 0x8e0   : > { %v4910_v9 = vpack.c.bf16 %v2759_v4, %v2759_v4  ;;  %v2760_v29 = vmul.f32 %v5834_v13, %v7193_v57  ;;  %v2730_v24 = vpop.xlane.xlu1 %2729 }
 0x8e1   : > { %v5836_v35 = vpop.eup %5835  ;;  %5845 = vrcp.f32 %v2730_v24 }
 0x8e2   : > { %4191 = vst.msk [vmem:[%s6594_s20 + $0x30] sm:$0xf] %vm4178_vm4, %v4910_v9  ;;  %v4911_v16 = vpack.c.bf16 %v2760_v29, %v2760_v29  ;;  %v2761_v12 = vmul.f32 %v5836_v35, %v7198_v38  ;;  %v2733_v43 = vpop.xlane.xlu0 %2732  ;;  %v2772_v8 = vpack.c.bf16 %v2760_v29, %v2759_v4 }
 0x8e3   : > { %v5838_v60 = vpop.eup %5837  ;;  %5847 = vrcp.f32 %v2733_v43 }
 0x8e4   : > { %4192 = vst.msk [vmem:[%s6594_s20 + $0x34] sm:$0xf] %vm4178_vm4, %v4911_v16  ;;  %v4918_v39 = vpack.c.bf16 %v2761_v12, %v2761_v12  ;;  %v2762_v33 = vmul.f32 %v5838_v60, %v7203_v63  ;;  %5338 = vmatmul.mubr.msk.bf16.vlgmr.msra.gmra.mrb[84].mxu1 %vm365_vm1, %v2772_v8  ;;  %v2736_v57 = vpop.xlane.xlu1 %2735 }
 0x8e5   : > { %v5840_v34 = vpop.eup %5839  ;;  %5348 = vmatpush3.bf16.msra.mxu1 %v7253_v52  ;;  %5849 = vrcp.f32 %v2736_v57  ;;  %5349 = vmatprep.mubr.msk.bf16.mxu1 %vm6078_vm0, %v7993_v54 }
 0x8e6   : > { %4199 = vst.msk [vmem:[%s6594_s20 + $0x50] sm:$0xf] %vm4178_vm4, %v4918_v39  ;;  %v4919_v38 = vpack.c.bf16 %v2762_v33, %v2762_v33  ;;  %v2763_v4 = vmul.f32 %v5840_v34, %v7208_v18  ;;  %v2739_v13 = vpop.xlane.xlu0 %2738  ;;  %v2773_v9 = vpack.c.bf16 %v2762_v33, %v2761_v12  ;;  %5359 = vmatprep.subr.bf16.mxu1 %v7993_v54 }
 0x8e7   : > { %v5842_v60 = vpop.eup %5841  ;;  %5851 = vrcp.f32 %v2739_v13 }
 0x8e8   : > { %4200 = vst.msk [vmem:[%s6594_s20 + $0x54] sm:$0xf] %vm4178_vm4, %v4919_v38  ;;  %v4926_v63 = vpack.c.bf16 %v2763_v4, %v2763_v4  ;;  %v2764_v52 = vmul.f32 %v5842_v60, %v7213_v6  ;;  %5344 = vmatmul.mubr.msk.bf16.vlgmr.msra.gmra.mrb[88].mxu0 %vm365_vm1, %v2773_v9 }
 0x8e9   : > { %v5844_v29 = vpop.eup %5843  ;;  %5354 = vmatpush3.bf16.msra.mxu0 %v7245_v21  ;;  %5355 = vmatprep.mubr.msk.bf16.mxu0 %vm6078_vm0, %v7993_v54 }
 0x8ea   : > { %4207 = vst.msk [vmem:[%s6594_s20 + $0x70] sm:$0xf] %vm4178_vm4, %v4926_v63  ;;  %v4927_v18 = vpack.c.bf16 %v2764_v52, %v2764_v52  ;;  %v2765_v24 = vmul.f32 %v5844_v29, %v7218_v49  ;;  %v3110_v35 = vpop.permute.xlu0 %3109  ;;  %v2774_v16 = vpack.c.bf16 %v2764_v52, %v2763_v4  ;;  %5365 = vmatprep.subr.bf16.mxu0 %v7993_v54  ;;  %v3161_v52 = vpop.permute.xlu1 %3160 }
 0x8eb   : > { %v5846_v6 = vpop.eup %5845  ;;  %v3115_v13 = vsel %vm489_vm2, %v3110_v35, 0 }
 0x8ec   : > { %4208 = vst.msk [vmem:[%s6594_s20 + $0x74] sm:$0xf] %vm4178_vm4, %v4927_v18  ;;  %v4934_v12 = vpack.c.bf16 %v2765_v24, %v2765_v24  ;;  %v2766_v21 = vmul.f32 %v5846_v6, %v7222_v0  ;;  %5350 = vmatmul.mubr.msk.bf16.vlgmr.msra.gmra.mrb[88].mxu1 %vm365_vm1, %v2774_v16 }
 0x8ed   : > { %v5848_v43 = vpop.eup %5847  ;;  %5360 = vmatpush3.bf16.msra.mxu1 %v7257_v26  ;;  %5361 = vmatprep.mubr.msk.bf16.mxu1 %vm6078_vm0, %v7993_v54 }
 0x8ee   : > { %4215 = vst.msk [vmem:[%s6594_s20 + $0x90] sm:$0xf] %vm4178_vm4, %v4934_v12  ;;  %v4935_v49 = vpack.c.bf16 %v2766_v21, %v2766_v21  ;;  %v2767_v8 = vmul.f32 %v5848_v43, %v7226_v46  ;;  %v2775_v39 = vpack.c.bf16 %v2766_v21, %v2765_v24  ;;  %5371 = vmatprep.subr.bf16.mxu1 %v7993_v54  ;;  %v3108_v26 = vpop.permute.xlu0 %3107 }
 0x8ef   : > { %v5850_v33 = vpop.eup %5849 }
 0x8f0   : > { %4216 = vst.msk [vmem:[%s6594_s20 + $0x94] sm:$0xf] %vm4178_vm4, %v4935_v49  ;;  %v4942_v0 = vpack.c.bf16 %v2767_v8, %v2767_v8  ;;  %v2768_v57 = vmul.f32 %v5850_v33, %v7230_v28  ;;  %5356 = vmatmul.mubr.msk.bf16.vlgmr.msra.gmra.mrb[92].mxu0 %vm365_vm1, %v2775_v39 }
 0x8f1   : > { %v5852_v34 = vpop.eup %5851  ;;  %5366 = vmatpush3.bf16.msra.mxu0 %v7269_v17  ;;  %5367 = vmatprep.mubr.msk.bf16.mxu0 %vm6078_vm0, %v7993_v54 }
 0x8f2   : > { %4223 = vst.msk [vmem:[%s6594_s20 + $0xb0] sm:$0xf] %vm4178_vm4, %v4942_v0  ;;  %v4943_v46 = vpack.c.bf16 %v2768_v57, %v2768_v57  ;;  %v2769_v38 = vmul.f32 %v5852_v34, %v7234_v27  ;;  %v2776_v4 = vpack.c.bf16 %v2768_v57, %v2767_v8  ;;  %5377 = vmatprep.subr.bf16.mxu0 %v7993_v54  ;;  %v3212_v17 = vpop.permute.xlu0 %3211  ;;  %v3166_v8 = vsel %vm489_vm2, %v3161_v52, 0 }
 0x8f3   : > { %v3217_v9 = vsel %vm489_vm2, %v3212_v17, 0 }
 0x8f4   : > { %4224 = vst.msk [vmem:[%s6594_s20 + $0xb4] sm:$0xf] %vm4178_vm4, %v4943_v46  ;;  %v4950_v28 = vpack.c.bf16 %v2769_v38, %v2769_v38  ;;  %5362 = vmatmul.mubr.msk.bf16.vlgmr.msra.gmra.mrb[92].mxu1 %vm365_vm1, %v2776_v4 }
 0x8f5   : > { %5373 = vmatprep.mubr.msk.bf16.mxu1 %vm6078_vm0, %v7993_v54 }
 0x8f6   : > { %4231 = vst.msk [vmem:[%s6594_s20 + $0xd0] sm:$0xf] %vm4178_vm4, %v4950_v28  ;;  %5372 = vmatpush3.bf16.xpose.msra.mxu1 %v3115_v13  ;;  %v3210_v27 = vpop.permute.xlu0 %3209 }
 0x8f7   : > { %5383 = vmatprep.subr.bf16.mxu1 %v7993_v54 }
 0x8fa   : > { %v3314_v60 = vpop.permute.xlu0 %3313 }
 0x8fb   : > { %v3319_v63 = vsel %vm489_vm2, %v3314_v60, 0 }
 0x8fd   : > { %5374 = vmatmul.mubr.msk.bf16.vlgmr.msra.gmra.mrb[96].mxu1 %vm489_vm2, %v3108_v26 }
 0x8fe   : > { %5384 = vmatpush3.bf16.xpose.msra.mxu1 %v3217_v9  ;;  %5385 = vmatprep.mubr.msk.bf16.mxu1 %vm6078_vm0, %v7993_v54  ;;  %v3365_v24 = vpop.permute.xlu0 %3364 }
 0x8ff   : > { %5395 = vmatprep.subr.bf16.mxu1 %v7993_v54  ;;  %v3370_v26 = vsel %vm489_vm2, %v3365_v24, 0 }
 0x902   : > { %v3416_v21 = vpop.permute.xlu0 %3415 }
 0x903   : > { %v3421_v33 = vsel %vm489_vm2, %v3416_v21, 0 }
 0x905   : > { %5386 = vmatmul.mubr.msk.bf16.vlgmr.msra.gmra.mrb[100].mxu1 %vm489_vm2, %v3210_v27 }
 0x906   : > { %5396 = vmatpush3.bf16.xpose.msra.mxu1 %v3319_v63  ;;  %5397 = vmatprep.mubr.msk.bf16.mxu1 %vm6078_vm0, %v7993_v54 }
 0x907   : > { %5407 = vmatprep.subr.bf16.mxu1 %v7993_v54 }
 0x921   : > { %v2742_v29 = vpop.xlane.xlu1 %2741 }
 0x922   : > { %5853 = vrcp.f32 %v2742_v29 }
 0x925   : > { %v3159_v18 = vpop.permute.xlu1 %3158 }
 0x929   : > { %v3263_v35 = vpop.permute.xlu1 %3262 }
 0x92a   : > { %v3268_v0 = vsel %vm489_vm2, %v3263_v35, 0 }
 0x92c   : > { %v5854_v16 = vpop.eup %5853 }
 0x92d   : > { %v2770_v6 = vmul.f32 %v5854_v16, %v7251_v62  ;;  %v3261_v12 = vpop.permute.xlu1 %3260 }
 0x92f   : > { %v4951_v43 = vpack.c.bf16 %v2770_v6, %v2770_v6  ;;  %v2777_v49 = vpack.c.bf16 %v2770_v6, %v2769_v38 }
 0x931   : > { %4232 = vst.msk [vmem:[%s6594_s20 + $0xd4] sm:$0xf] %vm4178_vm4, %v4951_v43  ;;  %5368 = vmatmul.mubr.msk.bf16.vlgmr.msra.gmra.mrb[96].mxu0 %vm365_vm1, %v2777_v49  ;;  %v3312_v39 = vpop.permute.xlu1 %3311 }
 0x932   : > { %5378 = vmatpush3.bf16.xpose.msra.mxu0 %v3166_v8  ;;  %5398 = vmatmul.mubr.msk.bf16.vlgmr.msra.gmra.mrb[104].mxu1 %vm489_vm2, %v3312_v39 }
 0x933   : > { %5408 = vmatpush3.bf16.xpose.msra.mxu1 %v3421_v33  ;;  %5379 = vmatprep.mubr.msk.bf16.mxu0 %vm6078_vm0, %v7993_v54 }
 0x934   : > { %5389 = vmatprep.subr.bf16.mxu0 %v7993_v54  ;;  %5409 = vmatprep.mubr.msk.bf16.mxu1 %vm6078_vm0, %v7993_v54 }
 0x935   : > { %v3363_v62 = vpop.permute.xlu1 %3362  ;;  %5419 = vmatprep.subr.bf16.mxu1 %v7993_v54 }
 0x939   : > { %5380 = vmatmul.mubr.msk.bf16.vlgmr.msra.gmra.mrb[100].mxu0 %vm489_vm2, %v3159_v18  ;;  %v3414_v57 = vpop.permute.xlu1 %3413 }
 0x93a   : > { %5390 = vmatpush3.bf16.xpose.msra.mxu0 %v3268_v0  ;;  %5410 = vmatmul.mubr.msk.bf16.vlgmr.msra.gmra.mrb[108].mxu1 %vm489_vm2, %v3414_v57 }
 0x93b   : > { %5391 = vmatprep.mubr.msk.bf16.mxu0 %vm6078_vm0, %v7993_v54  ;;  %5401 = vmatprep.subr.bf16.mxu0 %v7993_v54 }
 0x93c   : > { %5421 = vmatprep.mubr.msk.bf16.mxu1 %vm6078_vm0, %v7993_v54 }
 0x93d   : > { %v3654_v34 = vpop.permute.xlu1 %3653 }
 0x941   : > { %5392 = vmatmul.mubr.msk.bf16.vlgmr.msra.gmra.mrb[104].mxu0 %vm489_vm2, %v3261_v12 }
 0x942   : > { %5402 = vmatpush3.bf16.xpose.msra.mxu0 %v3370_v26  ;;  %5403 = vmatprep.mubr.msk.bf16.mxu0 %vm6078_vm0, %v7993_v54 }
 0x943   : > { %5413 = vmatprep.subr.bf16.mxu0 %v7993_v54 }
 0x949   : > { %5404 = vmatmul.mubr.msk.bf16.vlgmr.msra.gmra.mrb[108].mxu0 %vm489_vm2, %v3363_v62 }
 0x94a   : > { %5414 = vmatpush3.bf16.msra.mxu0 %v3654_v34  ;;  %5415 = vmatprep.mubr.msk.bf16.mxu0 %vm6078_vm0, %v7993_v54 }
 0x94b   : > { %5425 = vmatprep.subr.bf16.mxu0 %v7993_v54 }
 0x99b   : > { %v7382_v46 = vpop.f32.mrb[84].mxu0 }
 0x99c   : > { %v5333_v38 = vpop.f32.mrb[85].mxu0 }
 0x99d   : > { %v7384_v4 = vpop.f32.mrb[86].mxu0 }
 0x99e   : > { %v5334_v13 = vpop.f32.mrb[87].mxu0 }
 0x9b7   : > { %v7388_v17 = vpop.f32.mrb[84].mxu1 }
 0x9b8   : > { %v5339_v27 = vpop.f32.mrb[85].mxu1 }
 0x9b9   : > { %v7390_v9 = vpop.f32.mrb[86].mxu1 }
 0x9ba   : > { %v5340_v63 = vpop.f32.mrb[87].mxu1 }
 0x9bb   : > { %v7394_v52 = vpop.f32.mrb[88].mxu0 }
 0x9bc   : > { %v5345_v29 = vpop.f32.mrb[89].mxu0 }
 0x9bd   : > { %v7396_v18 = vpop.f32.mrb[90].mxu0 }
 0x9be   : > { %v5346_v35 = vpop.f32.mrb[91].mxu0 }
 0x9bf   : > { %v7400_v16 = vpop.f32.mrb[88].mxu1 }
 0x9c0   : > { %v5351_v6 = vpop.f32.mrb[89].mxu1 }
 0x9c1   : > { %v7402_v12 = vpop.f32.mrb[90].mxu1 }
 0x9c2   : > { %v5352_v43 = vpop.f32.mrb[91].mxu1 }
 0x9c3   : > { %v7406_v49 = vpop.f32.mrb[92].mxu0 }
 0x9c4   : > { %v5357_v8 = vpop.f32.mrb[93].mxu0 }
 0x9c5   : > { %v7408_v39 = vpop.f32.mrb[94].mxu0 }
 0x9c6   : > { %v5358_v62 = vpop.f32.mrb[95].mxu0 }
 0x9c7   : > { %v7412_v0 = vpop.f32.mrb[92].mxu1 }
 0x9c8   : > { %v5363_v57 = vpop.f32.mrb[93].mxu1 }
 0x9c9   : > { %v7414_v26 = vpop.f32.mrb[94].mxu1 }
 0x9ca   : > { %v5364_v38 = vpop.f32.mrb[95].mxu1 }
 0x9d0   : > { %v3151_v13 = vpop.f32.mrb[96].mxu1 }
 0x9d1   : > { %v3464_v27 = vmul.f32 0.5, %v3151_v13  ;;  %v5375_v63 = vpop.f32.mrb[97].mxu1 }
 0x9d2   : > { %v3154_v29 = vpop.f32.mrb[98].mxu1 }
 0x9d3   : > { %v7420_v35 = vsel %vm485_vm3, %v3464_v27, -1e+30  ;;  %v3465_v6 = vmul.f32 0.5, %v3154_v29  ;;  %v5376_v43 = vpop.f32.mrb[99].mxu1 }
 0x9d4   : > { %v3492_v8 = vsel %vm365_vm1, %v7420_v35, -inf }
 0x9d5   : > { %v7426_v62 = vsel %vm485_vm3, %v3465_v6, -1e+30  ;;  %3493 = vmax.xlane.f32.xlu0 %v3492_v8 }
 0x9d6   : > { %v3495_v57 = vsel %vm365_vm1, %v7426_v62, -inf }
 0x9d7   : > { %3496 = vmax.xlane.f32.xlu1 %v3495_v57 }
 0x9d8   : > { %v3253_v38 = vpop.f32.mrb[100].mxu1 }
 0x9d9   : > { %v3468_v13 = vmul.f32 0.5, %v3253_v38  ;;  %v5387_v63 = vpop.f32.mrb[101].mxu1 }
 0x9da   : > { %v3256_v34 = vpop.f32.mrb[102].mxu1 }
 0x9db   : > { %v7432_v27 = vsel %vm485_vm3, %v3468_v13, -1e+30  ;;  %v5388_v29 = vpop.f32.mrb[103].mxu1 }
 0x9dc   : > { %v3504_v43 = vsel %vm365_vm1, %v7432_v27, -inf }
 0x9dd   : > { %3505 = vmax.xlane.f32.xlu1 %v3504_v43 }
 0xa04   : > { %v7436_v6 = vpop.f32.mrb[96].mxu0 }
 0xa05   : > { %7994 = vst [vmem:[#allocation24_spill] sm:$0xff] %v7436_v6  ;;  %v5369_v8 = vpop.f32.mrb[97].mxu0  ;;  %v3355_v24 = vpop.f32.mrb[104].mxu1 }
 0xa06   : > { %v7438_v60 = vpop.f32.mrb[98].mxu0  ;;  %v5399_v57 = vpop.f32.mrb[105].mxu1 }
 0xa07   : > { %7995 = vst [vmem:[#allocation25_spill] sm:$0xff] %v7438_v60  ;;  %v5370_v63 = vpop.f32.mrb[99].mxu0  ;;  %v3358_v28 = vpop.f32.mrb[106].mxu1 }
 0xa08   : > { %v5400_v21 = vpop.f32.mrb[107].mxu1  ;;  %v3469_v63 = vmul.f32 0.5, %v3256_v34 }
 0xa0c   : > { %v3202_v13 = vpop.f32.mrb[100].mxu0 }
 0xa0d   : > { %v3466_v33 = vmul.f32 0.5, %v3202_v13  ;;  %v5381_v29 = vpop.f32.mrb[101].mxu0  ;;  %v3457_v32 = vpop.f32.mrb[108].mxu1 }
 0xa0e   : > { %v3205_v1 = vpop.f32.mrb[102].mxu0  ;;  %v5411_v45 = vpop.f32.mrb[109].mxu1 }
 0xa0f   : > { %v7444_v43 = vsel %vm485_vm3, %v3466_v33, -1e+30  ;;  %v3467_v8 = vmul.f32 0.5, %v3205_v1  ;;  %v5382_v42 = vpop.f32.mrb[103].mxu0  ;;  %v3460_v36 = vpop.f32.mrb[110].mxu1 }
 0xa10   : > { %v5412_v57 = vpop.f32.mrb[111].mxu1  ;;  %v3498_v38 = vsel %vm365_vm1, %v7444_v43, -inf  ;;  %v7456_v33 = vsel %vm485_vm3, %v3469_v63, -1e+30  ;;  %v3472_v42 = vmul.f32 0.5, %v3355_v24  ;;  %v3473_v24 = vmul.f32 0.5, %v3358_v28 }
 0xa11   : > { %v7450_v21 = vsel %vm485_vm3, %v3467_v8, -1e+30  ;;  %3499 = vmax.xlane.f32.xlu0 %v3498_v38  ;;  %v3507_v38 = vsel %vm365_vm1, %v7456_v33, -inf }
 0xa12   : > { %v3501_v45 = vsel %vm365_vm1, %v7450_v21, -inf  ;;  %v7468_v63 = vsel %vm485_vm3, %v3472_v42, -1e+30  ;;  %v3476_v42 = vmul.f32 0.5, %v3457_v32 }
 0xa14   : > { %v3304_v13 = vpop.f32.mrb[104].mxu0  ;;  %v7492_v32 = vsel %vm485_vm3, %v3476_v42, -1e+30 }
 0xa15   : > { %v3470_v1 = vmul.f32 0.5, %v3304_v13  ;;  %3502 = vmax.xlane.f32.xlu0 %v3501_v45  ;;  %v5393_v29 = vpop.f32.mrb[105].mxu0 }
 0xa16   : > { %v3307_v57 = vpop.f32.mrb[106].mxu0  ;;  %v7480_v29 = vsel %vm485_vm3, %v3473_v24, -1e+30  ;;  %v3477_v24 = vmul.f32 0.5, %v3460_v36 }
 0xa17   : > { %v7460_v34 = vsel %vm485_vm3, %v3470_v1, -1e+30  ;;  %v3471_v8 = vmul.f32 0.5, %v3307_v57  ;;  %v5394_v53 = vpop.f32.mrb[107].mxu0  ;;  %v3519_v60 = vsel %vm365_vm1, %v7480_v29, -inf }
 0xa18   : > { %v3510_v25 = vsel %vm365_vm1, %v7460_v34, -inf  ;;  %v3516_v53 = vsel %vm365_vm1, %v7468_v63, -inf }
 0xa19   : > { %v7472_v13 = vsel %vm485_vm3, %v3471_v8, -1e+30  ;;  %3508 = vmax.xlane.f32.xlu0 %v3507_v38  ;;  %3511 = vmax.xlane.f32.xlu1 %v3510_v25 }
 0xa1a   : > { %v3513_v1 = vsel %vm365_vm1, %v7472_v13, -inf }
 0xa1c   : > { %v3406_v45 = vpop.f32.mrb[108].mxu0 }
 0xa1d   : > { %v3474_v57 = vmul.f32 0.5, %v3406_v45  ;;  %3517 = vmax.xlane.f32.xlu1 %v3516_v53  ;;  %3514 = vmax.xlane.f32.xlu0 %v3513_v1  ;;  %v5405_v28 = vpop.f32.mrb[109].mxu0  ;;  %v7504_v1 = vsel %vm485_vm3, %v3477_v24, -1e+30 }
 0xa1e   : > { %v3409_v8 = vpop.f32.mrb[110].mxu0  ;;  %v3531_v36 = vsel %vm365_vm1, %v7504_v1, -inf }
 0xa1f   : > { %v7484_v25 = vsel %vm485_vm3, %v3474_v57, -1e+30  ;;  %v3475_v38 = vmul.f32 0.5, %v3409_v8  ;;  %v5406_v6 = vpop.f32.mrb[111].mxu0 }
 0xa20   : > { %v3522_v7 = vsel %vm365_vm1, %v7484_v25, -inf  ;;  %v3528_v6 = vsel %vm365_vm1, %v7492_v32, -inf }
 0xa21   : > { %v7496_v45 = vsel %vm485_vm3, %v3475_v38, -1e+30  ;;  %3520 = vmax.xlane.f32.xlu0 %v3519_v60  ;;  %3523 = vmax.xlane.f32.xlu1 %v3522_v7 }
 0xa22   : > { %v3525_v53 = vsel %vm365_vm1, %v7496_v45, -inf }
 0xa25   : > { %3529 = vmax.xlane.f32.xlu1 %v3528_v6  ;;  %3526 = vmax.xlane.f32.xlu0 %v3525_v53 }
 0xa29   : > { %3532 = vmax.xlane.f32.xlu0 %v3531_v36 }
 0xa36   : > { %3747 = vrot.lane.b32.xlu1 %v6337_v30, %s6089_s27 }
 0xa3f   : > { %3700 = vrot.lane.b32.xlu0 %v6333_v23, %s6089_s27 }
 0xa62   : > { %v3494_v7 = vpop.xlane.xlu0 %3493 }
 0xa63   : > { %v3534_v60 = vsub.f32 %v7420_v35, %v3494_v7 }
 0xa64   : > { %v3497_v42 = vpop.xlane.xlu1 %3496 }
 0xa65   : > { %v3548_v57 = vmul.f32 1.442695, %v3534_v60  ;;  %v3535_v11 = vsub.f32 %v7426_v62, %v3497_v42 }
 0xa67   : > { %5855 = vpow2.f32 %v3548_v57  ;;  %v3550_v28 = vmul.f32 1.442695, %v3535_v11 }
 0xa69   : > { %5857 = vpow2.f32 %v3550_v28 }
 0xa6a   : > { %v3506_v30 = vpop.xlane.xlu1 %3505 }
 0xa6b   : > { %v3538_v35 = vsub.f32 %v7432_v27, %v3506_v30 }
 0xa6d   : > { %v3556_v53 = vmul.f32 1.442695, %v3538_v35 }
 0xa71   : > { %v7514_v8 = vpop.eup %5855 }
 0xa72   : > { %v3576_v38 = vsel %vm365_vm1, %v7514_v8, 0.0 }
 0xa73   : > { %v7518_v24 = vpop.eup %5857  ;;  %3577 = vadd.xlane.f32.xlu1 %v3576_v38 }
 0xa74   : > { %v3579_v23 = vsel %vm365_vm1, %v7518_v24, 0.0 }
 0xa75   : > { %3580 = vadd.xlane.f32.xlu0 %v3579_v23 }
 0xa9e   : > { %v3500_v6 = vpop.xlane.xlu0 %3499 }
 0xa9f   : > { %v3536_v62 = vsub.f32 %v7444_v43, %v3500_v6 }
 0xaa1   : > { %v3552_v36 = vmul.f32 1.442695, %v3536_v62 }
 0xaa2   : > { %v3503_v7 = vpop.xlane.xlu0 %3502 }
 0xaa3   : > { %5859 = vpow2.f32 %v3552_v36  ;;  %v3537_v60 = vsub.f32 %v7450_v21, %v3503_v7 }
 0xaa4   : > { %5861 = vpow2.f32 %v3556_v53 }
 0xaa5   : > { %v3554_v42 = vmul.f32 1.442695, %v3537_v60 }
 0xaa6   : > { %v3509_v57 = vpop.xlane.xlu0 %3508  ;;  %v3512_v11 = vpop.xlane.xlu1 %3511 }
 0xaa7   : > { %5863 = vpow2.f32 %v3554_v42  ;;  %v3539_v28 = vsub.f32 %v7456_v33, %v3509_v57  ;;  %v3540_v38 = vsub.f32 %v7460_v34, %v3512_v11 }
 0xaa9   : > { %v3558_v23 = vmul.f32 1.442695, %v3539_v28  ;;  %v3560_v27 = vmul.f32 1.442695, %v3540_v38 }
 0xaaa   : > { %v3518_v30 = vpop.xlane.xlu1 %3517  ;;  %v3515_v41 = vpop.xlane.xlu0 %3514 }
 0xaab   : > { %5865 = vpow2.f32 %v3558_v23  ;;  %v3542_v43 = vsub.f32 %v7468_v63, %v3518_v30  ;;  %v3541_v35 = vsub.f32 %v7472_v13, %v3515_v41 }
 0xaac   : > { %5867 = vpow2.f32 %v3560_v27 }
 0xaad   : > { %v7529_v21 = vpop.eup %5859  ;;  %v3564_v6 = vmul.f32 1.442695, %v3542_v43  ;;  %v3562_v62 = vmul.f32 1.442695, %v3541_v35 }
 0xaae   : > { %v3521_v53 = vpop.xlane.xlu0 %3520  ;;  %v3582_v33 = vsel %vm365_vm1, %v7529_v21, 0.0  ;;  %v7533_v36 = vpop.eup %5861 }
 0xaaf   : > { %5869 = vpow2.f32 %v3564_v6  ;;  %v3543_v34 = vsub.f32 %v7480_v29, %v3521_v53  ;;  %3583 = vadd.xlane.f32.xlu1 %v3582_v33  ;;  %v3588_v13 = vsel %vm365_vm1, %v7533_v36, 0.0 }
 0xab0   : > { %5871 = vpow2.f32 %v3562_v62  ;;  %v3524_v62 = vpop.xlane.xlu1 %3523 }
 0xab1   : > { %v7536_v7 = vpop.eup %5863  ;;  %v3566_v63 = vmul.f32 1.442695, %v3543_v34  ;;  %v3544_v53 = vsub.f32 %v7484_v25, %v3524_v62  ;;  %v7996_v62 = vpack.i.bf16 %v7058_v55, %v7056_v3  ;;  %v7998_v55 = vpack.i.bf16 %v7408_v39, %v7406_v49 }
 0xab2   : > { %v3527_v41 = vpop.xlane.xlu0 %3526  ;;  %v3585_v60 = vsel %vm365_vm1, %v7536_v7, 0.0 }
 0xab3   : > { %5873 = vpow2.f32 %v3566_v63  ;;  %3589 = vadd.xlane.f32.xlu1 %v3588_v13  ;;  %3586 = vadd.xlane.f32.xlu0 %v3585_v60  ;;  %v3568_v63 = vmul.f32 1.442695, %v3544_v53  ;;  %v3545_v13 = vsub.f32 %v7496_v45, %v3527_v41 }
 0xab4   : > { %v3530_v33 = vpop.xlane.xlu1 %3529 }
 0xab5   : > { %v7542_v42 = vpop.eup %5865  ;;  %v3546_v34 = vsub.f32 %v7492_v32, %v3530_v33  ;;  %5875 = vpow2.f32 %v3568_v63 }
 0xab6   : > { %v7544_v57 = vpop.eup %5867  ;;  %v3533_v29 = vpop.xlane.xlu0 %3532  ;;  %v3591_v11 = vsel %vm365_vm1, %v7542_v42, 0.0 }
 0xab7   : > { %v3594_v28 = vsel %vm365_vm1, %v7544_v57, 0.0  ;;  %3592 = vadd.xlane.f32.xlu0 %v3591_v11  ;;  %v3572_v60 = vmul.f32 1.442695, %v3546_v34  ;;  %v3570_v11 = vmul.f32 1.442695, %v3545_v13 }
 0xab8   : > { %3595 = vadd.xlane.f32.xlu1 %v3594_v28  ;;  %v3547_v28 = vsub.f32 %v7504_v1, %v3533_v29 }
 0xab9   : > { %v7550_v38 = vpop.eup %5869  ;;  %5877 = vpow2.f32 %v3572_v60  ;;  %v7997_v60 = vpack.i.bf16 %v7064_v50, %v7062_v5  ;;  %v7999_v5 = vpack.i.bf16 %v7402_v12, %v7400_v16  ;;  %v8001_v50 = vpack.i.bf16 %v7040_v14, %v7038_v40 }
 0xaba   : > { %v7552_v23 = vpop.eup %5871  ;;  %v3701_v27 = vpop.permute.xlu0 %3700  ;;  %v3600_v30 = vsel %vm365_vm1, %v7550_v38, 0.0  ;;  %5879 = vpow2.f32 %v3570_v11  ;;  %v8002_v16 = vpack.i.bf16 %v7384_v4, %v7382_v46  ;;  %v8003_v12 = vpack.i.bf16 %v7046_v2, %v7044_v22 }
 0xabb   : > { %v3597_v43 = vsel %vm365_vm1, %v7552_v23, 0.0  ;;  %5420 = vmatpush3.bf16.msra.mxu1 %v3701_v27 }
 0xabc   : > { %3601 = vadd.xlane.f32.xlu1 %v3600_v30  ;;  %3598 = vadd.xlane.f32.xlu0 %v3597_v43  ;;  %v3748_v30 = vpop.permute.xlu1 %3747 }
 0xabd   : > { %v7558_v35 = vpop.eup %5873  ;;  %5431 = vmatprep.subr.bf16.mxu1 %v7993_v54 }
 0xabe   : > { %v3603_v6 = vsel %vm365_vm1, %v7558_v35, 0.0 }
 0xabf   : > { %v7571_v27 = vpop.eup %5875 }
 0xac0   : > { %3604 = vadd.xlane.f32.xlu0 %v3603_v6  ;;  %v3606_v25 = vsel %vm365_vm1, %v7571_v27, 0.0 }
 0xacd   : > { %3841 = vrot.lane.b32.xlu1 %v6345_v44, %s6089_s27  ;;  %v3574_v44 = vmul.f32 1.442695, %v3547_v28 }
 0xacf   : > { %5881 = vpow2.f32 %v3574_v44 }
 0xad6   : > { %3794 = vrot.lane.b32.xlu0 %v6341_v37, %s6089_s27  ;;  %v7573_v37 = vpop.eup %5877 }
 0xad7   : > { %v7577_v32 = vpop.eup %5879  ;;  %v3612_v45 = vsel %vm365_vm1, %v7573_v37, 0.0 }
 0xad8   : > { %v3609_v1 = vsel %vm365_vm1, %v7577_v32, 0.0 }
 0xad9   : > { %v7583_v41 = vpop.eup %5881 }
 0xada   : > { %v3615_v29 = vsel %vm365_vm1, %v7583_v41, 0.0 }
 0xaf1   : > { %3607 = vadd.xlane.f32.xlu1 %v3606_v25 }
 0xaf5   : > { %3613 = vadd.xlane.f32.xlu1 %v3612_v45  ;;  %3610 = vadd.xlane.f32.xlu0 %v3609_v1 }
 0xaf9   : > { %3616 = vadd.xlane.f32.xlu0 %v3615_v29 }
 0xb00   : > { %v3578_v43 = vpop.xlane.xlu1 %3577 }
 0xb01   : > { %5883 = vrcp.f32 %v3578_v43 }
 0xb02   : > { %v3581_v6 = vpop.xlane.xlu0 %3580 }
 0xb03   : > { %5885 = vrcp.f32 %v3581_v6 }
 0xb06   : > { %3888 = vrot.lane.b32.xlu1 %v6349_v51, %s6089_s27 }
 0xb0a   : > { %5574 = vrot.lane.b32.xlu1 %v7996_v62, %s6090_s29 }
 0xb0b   : > { %v5884_v53 = vpop.eup %5883 }
 0xb0c   : > { %v3632_v33 = vmul.f32 %v5884_v53, %v7514_v8 }
 0xb0d   : > { %v5886_v34 = vpop.eup %5885 }
 0xb0e   : > { %v4904_v63 = vpack.c.bf16 %v3632_v33, %v3632_v33  ;;  %v3633_v13 = vmul.f32 %v5886_v34, %v7518_v24  ;;  %5589 = vrot.lane.b32.xlu1 %v7997_v60, %s6090_s29 }
 0xb0f   : > { %3935 = vrot.lane.b32.xlu0 %v6353_v58, %s6089_s27  ;;  %v8000_v58 = vpack.i.bf16 %v7070_v48, %v7068_v56  ;;  %v8004_v56 = vpack.i.bf16 %v7390_v9, %v7388_v17  ;;  %s7836_s27 = scalar_lea.hbm %s7960_s6, %s4960_s7 }
 0xb10   : > { %4185 = vst.msk [vmem:[%s6594_s20 + $0x18] sm:$0xf] %vm4178_vm4, %v4904_v63  ;;  %v4905_v51 = vpack.c.bf16 %v3633_v13, %v3633_v13  ;;  %v3646_v3 = vpack.c.bf16 %v3633_v13, %v3632_v33 }
 0xb12   : > { %4186 = vst.msk [vmem:[%s6594_s20 + $0x1c] sm:$0xf] %vm4178_vm4, %v4905_v51  ;;  %5599 = vrot.lane.b32.xlu1 %v7998_v55, %s6091_s17  ;;  %5416 = vmatmul.mubr.msk.bf16.vlgmr.msra.gmra.mrb[112].mxu0 %vm365_vm1, %v3646_v3 }
 0xb13   : > { %5426 = vmatpush3.bf16.msra.mxu0 %v3748_v30  ;;  %5579 = vrot.lane.b32.xlu0 %v7999_v5, %s6091_s17 }
 0xb14   : > { %5427 = vmatprep.mubr.msk.bf16.mxu0 %vm6078_vm0, %v7993_v54  ;;  %5437 = vmatprep.subr.bf16.mxu0 %v7993_v54 }
 0xb16   : > { %5609 = vrot.lane.b32.xlu1 %v8000_v58, %s6090_s29 }
 0xb17   : > { %5584 = vrot.lane.b32.xlu0 %v8001_v50, %s6090_s29 }
 0xb1b   : > { %5594 = vrot.lane.b32.xlu0 %v8002_v16, %s6091_s17 }
 0xb1f   : > { %5604 = vrot.lane.b32.xlu0 %v8003_v12, %s6090_s29 }
 0xb23   : > { %5614 = vrot.lane.b32.xlu0 %v8004_v56, %s6091_s17 }
 0xb3c   : > { %v3584_v48 = vpop.xlane.xlu1 %3583 }
 0xb3d   : > { %5887 = vrcp.f32 %v3584_v48 }
 0xb40   : > { %v3590_v49 = vpop.xlane.xlu1 %3589  ;;  %v3587_v40 = vpop.xlane.xlu0 %3586 }
 0xb41   : > { %5889 = vrcp.f32 %v3590_v49 }
 0xb42   : > { %5891 = vrcp.f32 %v3587_v40 }
 0xb44   : > { %v3593_v14 = vpop.xlane.xlu0 %3592 }
 0xb45   : > { %v3596_v46 = vpop.xlane.xlu1 %3595  ;;  %5893 = vrcp.f32 %v3593_v14 }
 0xb46   : > { %5895 = vrcp.f32 %v3596_v46 }
 0xb47   : > { %v5888_v4 = vpop.eup %5887 }
 0xb48   : > { %v3634_v22 = vmul.f32 %v5888_v4, %v7529_v21 }
 0xb49   : > { %v3602_v2 = vpop.xlane.xlu1 %3601  ;;  %v3599_v39 = vpop.xlane.xlu0 %3598 }
 0xb4a   : > { %v4912_v8 = vpack.c.bf16 %v3634_v22, %v3634_v22  ;;  %5897 = vrcp.f32 %v3602_v2 }
 0xb4b   : > { %v5890_v17 = vpop.eup %5889  ;;  %5899 = vrcp.f32 %v3599_v39 }
 0xb4c   : > { %v5892_v9 = vpop.eup %5891  ;;  %4193 = vst.msk [vmem:[%s6594_s20 + $0x38] sm:$0xf] %vm4178_vm4, %v4912_v8  ;;  %v3636_v24 = vmul.f32 %v5890_v17, %v7533_v36 }
 0xb4d   : > { %v3635_v11 = vmul.f32 %v5892_v9, %v7536_v7  ;;  %v3605_v28 = vpop.xlane.xlu0 %3604 }
 0xb4e   : > { %v4920_v44 = vpack.c.bf16 %v3636_v24, %v3636_v24  ;;  %5901 = vrcp.f32 %v3605_v28 }
 0xb4f   : > { %v5894_v25 = vpop.eup %5893  ;;  %v4913_v21 = vpack.c.bf16 %v3635_v11, %v3635_v11  ;;  %v3647_v45 = vpack.c.bf16 %v3635_v11, %v3634_v22 }
 0xb50   : > { %v5896_v1 = vpop.eup %5895  ;;  %4201 = vst.msk [vmem:[%s6594_s20 + $0x58] sm:$0xf] %vm4178_vm4, %v4920_v44  ;;  %v3637_v29 = vmul.f32 %v5894_v25, %v7542_v42  ;;  %v3842_v42 = vpop.permute.xlu1 %3841 }
 0xb51   : > { %4194 = vst.msk [vmem:[%s6594_s20 + $0x3c] sm:$0xf] %vm4178_vm4, %v4913_v21  ;;  %v3638_v30 = vmul.f32 %v5896_v1, %v7544_v57  ;;  %5422 = vmatmul.mubr.msk.bf16.vlgmr.msra.gmra.mrb[112].mxu1 %vm365_vm1, %v3647_v45  ;;  %v3795_v36 = vpop.permute.xlu0 %3794 }
 0xb52   : > { %v4921_v7 = vpack.c.bf16 %v3637_v29, %v3637_v29  ;;  %5432 = vmatpush3.bf16.msra.mxu1 %v3795_v36  ;;  %v3648_v43 = vpack.c.bf16 %v3637_v29, %v3636_v24  ;;  %5433 = vmatprep.mubr.msk.bf16.mxu1 %vm6078_vm0, %v7993_v54 }
 0xb53   : > { %v4928_v6 = vpack.c.bf16 %v3638_v30, %v3638_v30  ;;  %5443 = vmatprep.subr.bf16.mxu1 %v7993_v54 }
 0xb54   : > { %v5898_v62 = vpop.eup %5897  ;;  %4202 = vst.msk [vmem:[%s6594_s20 + $0x5c] sm:$0xf] %vm4178_vm4, %v4921_v7  ;;  %5428 = vmatmul.mubr.msk.bf16.vlgmr.msra.gmra.mrb[116].mxu0 %vm365_vm1, %v3648_v43 }
 0xb55   : > { %v5900_v57 = vpop.eup %5899  ;;  %4209 = vst.msk [vmem:[%s6594_s20 + $0x78] sm:$0xf] %vm4178_vm4, %v4928_v6  ;;  %v3640_v53 = vmul.f32 %v5898_v62, %v7550_v38  ;;  %5438 = vmatpush3.bf16.msra.mxu0 %v3842_v42  ;;  %5439 = vmatprep.mubr.msk.bf16.mxu0 %vm6078_vm0, %v7993_v54  ;;  %v5686_v42 = vld [vmem:[%s7957_s3] sm:$0xff]  }
 0xb56   : > { %v3639_v33 = vmul.f32 %v5900_v57, %v7552_v23  ;;  %5449 = vmatprep.subr.bf16.mxu0 %v7993_v54 }
 0xb57   : > { %v4936_v34 = vpack.c.bf16 %v3640_v53, %v3640_v53 }
 0xb58   : > { %v5902_v63 = vpop.eup %5901  ;;  %v4929_v13 = vpack.c.bf16 %v3639_v33, %v3639_v33  ;;  %v3649_v60 = vpack.c.bf16 %v3639_v33, %v3638_v30 }
 0xb59   : > { %4217 = vst.msk [vmem:[%s6594_s20 + $0x98] sm:$0xf] %vm4178_vm4, %v4936_v34  ;;  %v3641_v51 = vmul.f32 %v5902_v63, %v7558_v35 }
 0xb5a   : > { %4210 = vst.msk [vmem:[%s6594_s20 + $0x7c] sm:$0xf] %vm4178_vm4, %v4929_v13  ;;  %5434 = vmatmul.mubr.msk.bf16.vlgmr.msra.gmra.mrb[116].mxu1 %vm365_vm1, %v3649_v60 }
 0xb5b   : > { %v4937_v38 = vpack.c.bf16 %v3641_v51, %v3641_v51  ;;  %v3650_v3 = vpack.c.bf16 %v3641_v51, %v3640_v53  ;;  %5445 = vmatprep.mubr.msk.bf16.mxu1 %vm6078_vm0, %v7993_v54 }
 0xb5d   : > { %4218 = vst.msk [vmem:[%s6594_s20 + $0x9c] sm:$0xf] %vm4178_vm4, %v4937_v38  ;;  %5440 = vmatmul.mubr.msk.bf16.vlgmr.msra.gmra.mrb[120].mxu0 %vm365_vm1, %v3650_v3 }
 0xb5e   : > { %5451 = vmatprep.mubr.msk.bf16.mxu0 %vm6078_vm0, %v7993_v54 }
 0xb7e   : > { %v3608_v23 = vpop.xlane.xlu1 %3607 }
 0xb7f   : > { %5903 = vrcp.f32 %v3608_v23 }
 0xb82   : > { %v3614_v55 = vpop.xlane.xlu1 %3613  ;;  %v3611_v35 = vpop.xlane.xlu0 %3610 }
 0xb83   : > { %5905 = vrcp.f32 %v3614_v55 }
 0xb84   : > { %5907 = vrcp.f32 %v3611_v35 }
 0xb86   : > { %v3889_v5 = vpop.permute.xlu1 %3888  ;;  %v3617_v58 = vpop.xlane.xlu0 %3616 }
 0xb87   : > { %5909 = vrcp.f32 %v3617_v58  ;;  %5444 = vmatpush3.bf16.msra.mxu1 %v3889_v5  ;;  %v8005_v58 = vpack.i.bf16 %v7052_v61, %v7050_v20  ;;  %v8007_v20 = vpack.i.bf16 %v7414_v26, %v7412_v0  ;;  %v8008_v61 = vpack.i.bf16 %v7088_v10, %v7086_v15  ;;  %v8010_v26 = vld [vmem:[#allocation14_spill] sm:$0xff] }
 0xb88   : > { %5485 = vmatprep.subr.bf16.mxu1 %v7993_v54 }
 0xb89   : > { %v5904_v50 = vpop.eup %5903 }
 0xb8a   : > { %v3642_v16 = vmul.f32 %v5904_v50, %v7571_v27  ;;  %v5575_v12 = vpop.permute.xlu1 %5574  ;;  %v3936_v56 = vpop.permute.xlu0 %3935 }
 0xb8b   : > { %5450 = vmatpush3.bf16.msra.mxu0 %v3936_v56  ;;  %v5577_v49 = vunpack.i.h.bf16 %v5575_v12  ;;  %v5576_v14 = vunpack.i.l.bf16 %v5575_v12 }
 0xb8c   : > { %v4944_v48 = vpack.c.bf16 %v3642_v16, %v3642_v16  ;;  %5455 = vmatprep.subr.bf16.mxu0 %v7993_v54 }
 0xb8d   : > { %v5906_v40 = vpop.eup %5905  ;;  %v4410_v8 = vsel %vm489_vm2, %v6716_v59, %v5577_v49  ;;  %v4409_v11 = vsel %vm489_vm2, %v6714_v31, %v5576_v14  ;;  %v8006_v49 = vpack.i.bf16 %v7396_v18, %v7394_v52 }
 0xb8e   : > { %v5908_v46 = vpop.eup %5907  ;;  %4225 = vst.msk [vmem:[%s6594_s20 + $0xb8] sm:$0xf] %vm4178_vm4, %v4944_v48  ;;  %v3644_v4 = vmul.f32 %v5906_v40, %v7573_v37  ;;  %v5580_v22 = vpop.permute.xlu0 %5579 }
 0xb8f   : > { %v3643_v27 = vmul.f32 %v5908_v46, %v7577_v32  ;;  %v5582_v2 = vunpack.i.h.bf16 %v5580_v22  ;;  %v5581_v17 = vunpack.i.l.bf16 %v5580_v22 }
 0xb90   : > { %v4952_v39 = vpack.c.bf16 %v3644_v4, %v3644_v4 }
 0xb91   : > { %v5910_v9 = vpop.eup %5909  ;;  %v4945_v24 = vpack.c.bf16 %v3643_v27, %v3643_v27  ;;  %v7687_v28 = vsel %vm4417_vm5, %v4410_v8, %v5582_v2  ;;  %v7693_v32 = vsel %vm4417_vm5, %v4409_v11, %v5581_v17  ;;  %v3651_v44 = vpack.c.bf16 %v3643_v27, %v3642_v16 }
 0xb92   : > { %4233 = vst.msk [vmem:[%s6594_s20 + $0xd8] sm:$0xf] %vm4178_vm4, %v4952_v39  ;;  %v3645_v37 = vmul.f32 %v5910_v9, %v7583_v41  ;;  %v7695_v25 = vpop.permute.xlu0 %5584  ;;  %v8009_v39 = vld [vmem:[#allocation15_spill] sm:$0xff] }
 0xb93   : > { %4226 = vst.msk [vmem:[%s6594_s20 + $0xbc] sm:$0xf] %vm4178_vm4, %v4945_v24  ;;  %5446 = vmatmul.mubr.msk.bf16.vlgmr.msra.gmra.mrb[120].mxu1 %vm365_vm1, %v3651_v44  ;;  %v5587_v52 = vunpack.i.h.bf16 %v7695_v25  ;;  %v5586_v18 = vunpack.i.l.bf16 %v7695_v25 }
 0xb94   : > { %v4953_v59 = vpack.c.bf16 %v3645_v37, %v3645_v37  ;;  %v3652_v21 = vpack.c.bf16 %v3645_v37, %v3644_v4  ;;  %5469 = vmatprep.mubr.msk.bf16.mxu1 %vm6078_vm0, %v7993_v54  ;;  %5486 = vmatpush3.bf16.msra.mxu1 %v5686_v42 }
 0xb95   : > { %v4404_v0 = vsel %vm489_vm2, %v8009_v39, %v5587_v52  ;;  %v4403_v8 = vsel %vm489_vm2, %v8010_v26, %v5586_v18  ;;  %v8016_v39 = vld [vmem:[#allocation19_spill] sm:$0xff]  ;;  %v8017_v26 = vld [vmem:[#allocation18_spill] sm:$0xff] }
 0xb96   : > { %4234 = vst.msk [vmem:[%s6594_s20 + $0xdc] sm:$0xf] %vm4178_vm4, %v4953_v59  ;;  %5452 = vmatmul.mubr.msk.bf16.vlgmr.msra.gmra.mrb[124].mxu0 %vm365_vm1, %v3652_v21  ;;  %v7705_v31 = vpop.permute.xlu0 %5594 }
 0xb97   : > { %5457 = vmatprep.mubr.msk.bf16.mxu0 %vm6078_vm0, %v7993_v54  ;;  %5456 = vmatpush3.bf16.msra.mxu0 %v5686_v42  ;;  %v5597_v22 = vunpack.i.h.bf16 %v7705_v31  ;;  %v5596_v27 = vunpack.i.l.bf16 %v7705_v31  ;;  %v5590_v42 = vpop.permute.xlu1 %5589 }
 0xb99   : > { %v4418_v15 = vsel %vm4417_vm5, %v4403_v8, %v5596_v27  ;;  %v4419_v10 = vsel %vm4417_vm5, %v4404_v0, %v5597_v22 }
 0xb9a   : > { %v5605_v41 = vpop.permute.xlu0 %5604 }
 0xb9b   : > { %v5607_v45 = vunpack.i.h.bf16 %v5605_v41  ;;  %v5606_v1 = vunpack.i.l.bf16 %v5605_v41 }
 0xb9d   : > { %v4406_v29 = vsel %vm489_vm2, %v6708_v19, %v5607_v45  ;;  %v4405_v30 = vsel %vm489_vm2, %v6706_v47, %v5606_v1 }
 0xb9e   : > { %v5615_v36 = vpop.permute.xlu0 %5614 }
 0xb9f   : > { %v5617_v7 = vunpack.i.h.bf16 %v5615_v36  ;;  %v5616_v43 = vunpack.i.l.bf16 %v5615_v36  ;;  %v8011_v36 = vld [vmem:[#allocation25_spill] sm:$0xff] }
 0xba1   : > { %v7714_v6 = vsel %vm4417_vm5, %v4405_v30, %v5616_v43  ;;  %v7717_v62 = vsel %vm4417_vm5, %v4406_v29, %v5617_v7  ;;  %v8012_v7 = vld [vmem:[#allocation24_spill] sm:$0xff] }
 0xba2   : > { %v8013_v43 = vpack.i.bf16 %v8011_v36, %v8012_v7 }
 0xbe5   : > { %v3693_v57 = vpop.f32.mrb[112].mxu0 }
 0xbe6   : > { %v5417_v19 = vpop.f32.mrb[113].mxu0 }
 0xbe7   : > { %v3696_v53 = vpop.f32.mrb[114].mxu0 }
 0xbe8   : > { %v5618_v33 = vpack.i.bf16 %v3696_v53, %v3693_v57  ;;  %v5418_v47 = vpop.f32.mrb[115].mxu0  ;;  %v5600_v57 = vpop.permute.xlu1 %5599 }
 0xbe9   : > { %v5602_v18 = vunpack.i.h.bf16 %v5600_v57  ;;  %v5601_v22 = vunpack.i.l.bf16 %v5600_v57 }
 0xbea   : > { %5619 = vrot.lane.b32.xlu0 %v5618_v33, %s6092_s30 }
 0xc24   : > { %v3740_v34 = vpop.f32.mrb[112].mxu1 }
 0xc25   : > { %v5423_v63 = vpop.f32.mrb[113].mxu1 }
 0xc26   : > { %v3743_v13 = vpop.f32.mrb[114].mxu1 }
 0xc27   : > { %v5633_v60 = vpack.i.bf16 %v3743_v13, %v3740_v34  ;;  %v5424_v51 = vpop.f32.mrb[115].mxu1  ;;  %v3787_v38 = vpop.f32.mrb[116].mxu0 }
 0xc28   : > { %v5429_v3 = vpop.f32.mrb[117].mxu0 }
 0xc29   : > { %5634 = vrot.lane.b32.xlu0 %v5633_v60, %s6092_s30  ;;  %v3790_v23 = vpop.f32.mrb[118].mxu0  ;;  %v5610_v60 = vpop.permute.xlu1 %5609 }
 0xc2a   : > { %v5668_v55 = vpack.i.bf16 %v3790_v23, %v3787_v38  ;;  %v5430_v35 = vpop.f32.mrb[119].mxu0 }
 0xc2d   : > { %v3834_v5 = vpop.f32.mrb[116].mxu1  ;;  %5639 = vrot.lane.b32.xlu0 %v8005_v58, %s6090_s29 }
 0xc2e   : > { %v5435_v50 = vpop.f32.mrb[117].mxu1 }
 0xc2f   : > { %v3837_v16 = vpop.f32.mrb[118].mxu1 }
 0xc30   : > { %v5623_v12 = vpack.i.bf16 %v3837_v16, %v3834_v5  ;;  %v5436_v56 = vpop.f32.mrb[119].mxu1  ;;  %v3881_v48 = vpop.f32.mrb[120].mxu0 }
 0xc31   : > { %5654 = vrot.lane.b32.xlu0 %v8006_v49, %s6091_s17  ;;  %v5441_v40 = vpop.f32.mrb[121].mxu0  ;;  %v8015_v56 = vld [vmem:[#allocation16_spill] sm:$0xff] }
 0xc32   : > { %5624 = vrot.lane.b32.xlu1 %v5623_v12, %s6092_s30  ;;  %v3884_v14 = vpop.f32.mrb[122].mxu0 }
 0xc33   : > { %v5643_v46 = vpack.i.bf16 %v3884_v14, %v3881_v48  ;;  %v5442_v4 = vpop.f32.mrb[123].mxu0 }
 0xc34   : > { %v5592_v4 = vunpack.i.h.bf16 %v5590_v42 }
 0xc35   : > { %5669 = vrot.lane.b32.xlu0 %v5668_v55, %s6092_s30 }
 0xc36   : > { %5629 = vrot.lane.b32.xlu1 %v8007_v20, %s6091_s17  ;;  %v5591_v20 = vunpack.i.l.bf16 %v5590_v42  ;;  %v4412_v0 = vsel %vm489_vm2, %v8016_v39, %v5592_v4 }
 0xc38   : > { %v4411_v8 = vsel %vm489_vm2, %v8017_v26, %v5591_v20 }
 0xc3a   : > { %5644 = vrot.lane.b32.xlu1 %v5643_v46, %s6092_s30 }
 0xc3e   : > { %5649 = vrot.lane.b32.xlu1 %v8008_v61, %s6090_s29 }
 0xc5c   : > { %v5620_v2 = vpop.permute.xlu0 %5619 }
 0xc5d   : > { %v5622_v17 = vunpack.i.h.bf16 %v5620_v2  ;;  %v5621_v9 = vunpack.i.l.bf16 %v5620_v2 }
 0xc5f   : > { %v4434_v24 = vsel %vm4432_vm6, %v4419_v10, %v5622_v17  ;;  %v4433_v11 = vsel %vm4432_vm6, %v4418_v15, %v5621_v9  ;;  %v4426_v15 = vsel %vm4417_vm5, %v4411_v8, %v5601_v22  ;;  %v4427_v10 = vsel %vm4417_vm5, %v4412_v0, %v5602_v18 }
 0xc60   : > { %v4447_v37 = vpack.c.bf16 %v4434_v24, %v4433_v11 }
 0xc62   : > { %5458 = vmatmul.mubr.msk.bf16.vlgmr.msra.gmra.mrb[128].mxu0 %vm365_vm1, %v4447_v37 }
 0xc63   : > { %5461 = vmatprep.mubr.msk.bf16.mxu0 %vm6078_vm0, %v7993_v54 }
 0xc66   : > { %v3928_v44 = vpop.f32.mrb[120].mxu1 }
 0xc67   : > { %v5447_v25 = vpop.f32.mrb[121].mxu1 }
 0xc68   : > { %v3931_v59 = vpop.f32.mrb[122].mxu1  ;;  %v5612_v25 = vunpack.i.h.bf16 %v5610_v60 }
 0xc69   : > { %v3975_v21 = vpop.f32.mrb[124].mxu0  ;;  %v5658_v31 = vpack.i.bf16 %v3931_v59, %v3928_v44  ;;  %v5448_v41 = vpop.f32.mrb[123].mxu1  ;;  %v5611_v59 = vunpack.i.l.bf16 %v5610_v60 }
 0xc6a   : > { %v5453_v45 = vpop.f32.mrb[125].mxu0 }
 0xc6b   : > { %v3978_v1 = vpop.f32.mrb[126].mxu0  ;;  %5659 = vrot.lane.b32.xlu1 %v5658_v31, %s6092_s30  ;;  %v8018_v45 = vld [vmem:[#allocation21_spill] sm:$0xff] }
 0xc6c   : > { %v5673_v29 = vpack.i.bf16 %v3978_v1, %v3975_v21  ;;  %v5454_v30 = vpop.f32.mrb[127].mxu0  ;;  %v4414_v1 = vsel %vm489_vm2, %v8018_v45, %v5612_v25 }
 0xc6f   : > { %5664 = vrot.lane.b32.xlu1 %v8013_v43, %s6091_s17 }
 0xc73   : > { %5674 = vrot.lane.b32.xlu1 %v5673_v29, %s6092_s30  ;;  %v8019_v29 = vld [vmem:[#allocation20_spill] sm:$0xff]  ;;  %s5969_s30 = scalar_lea.vmem %s7839_s10, 3584 }
 0xc74   : > { %v4413_v30 = vsel %vm489_vm2, %v8019_v29, %v5611_v59  ;;  %p5970_p4 = scmp.ne.s32.totalorder %s7839_s10, %s5969_s30  ;;  %p5977_p11 = scmp.lt.s32.totalorder %s5975_s26, %s5969_s30 }
 0xc76   : > { %p5971_p6 = pnand %p5970_p4, %p6226_p12  ;;  %p5978_p3 = por %p5977_p11, %p5976_p10 }
 0xc78   : > { %p5972_p8 = pneg %p5971_p6 }
 0xc7a   : > { %p5979_p7 = pnand %p5978_p3, %p5972_p8 }
 0xc9b   : > { %v5635_v19 = vpop.permute.xlu0 %5634 }
 0xc9c   : > { %v5637_v53 = vunpack.i.h.bf16 %v5635_v19  ;;  %v5636_v33 = vunpack.i.l.bf16 %v5635_v19 }
 0xc9e   : > { %v4436_v47 = vsel %vm4432_vm6, %v7717_v62, %v5637_v53  ;;  %v4435_v34 = vsel %vm4432_vm6, %v7714_v6, %v5636_v33  ;;  %v8014_v62 = vld [vmem:[#allocation17_spill] sm:$0xff] }
 0xc9f   : > { %v4448_v63 = vpack.c.bf16 %v4436_v47, %v4435_v34  ;;  %v5640_v13 = vpop.permute.xlu0 %5639 }
 0xca0   : > { %v5642_v51 = vunpack.i.h.bf16 %v5640_v13  ;;  %v5641_v3 = vunpack.i.l.bf16 %v5640_v13 }
 0xca1   : > { %5462 = vmatmul.mubr.msk.bf16.gmra.mrb[132].mxu0 %vm365_vm1, %v4448_v63 }
 0xca2   : > { %5465 = vmatprep.mubr.msk.bf16.mxu0 %vm6078_vm0, %v7993_v54  ;;  %v4408_v50 = vsel %vm489_vm2, %v8014_v62, %v5642_v51  ;;  %v4407_v48 = vsel %vm489_vm2, %v8015_v56, %v5641_v3  ;;  %v8020_v51 = vld [vmem:[#allocation23_spill] sm:$0xff]  ;;  %v8021_v3 = vld [vmem:[#allocation22_spill] sm:$0xff] }
 0xca3   : > { %v5655_v38 = vpop.permute.xlu0 %5654 }
 0xca4   : > { %v5625_v23 = vpop.permute.xlu1 %5624  ;;  %v5657_v5 = vunpack.i.h.bf16 %v5655_v38  ;;  %v5656_v58 = vunpack.i.l.bf16 %v5655_v38 }
 0xca5   : > { %v5627_v55 = vunpack.i.h.bf16 %v5625_v23  ;;  %v5626_v35 = vunpack.i.l.bf16 %v5625_v23 }
 0xca6   : > { %v4422_v61 = vsel %vm4417_vm5, %v4407_v48, %v5656_v58  ;;  %v4423_v52 = vsel %vm4417_vm5, %v4408_v50, %v5657_v5 }
 0xca7   : > { %v4439_v6 = vsel %vm4432_vm6, %v7693_v32, %v5626_v35  ;;  %v4440_v16 = vsel %vm4432_vm6, %v7687_v28, %v5627_v55  ;;  %v5670_v12 = vpop.permute.xlu0 %5669 }
 0xca8   : > { %v4450_v49 = vpack.c.bf16 %v4440_v16, %v4439_v6  ;;  %v5630_v40 = vpop.permute.xlu1 %5629  ;;  %v5672_v14 = vunpack.i.h.bf16 %v5670_v12  ;;  %v5671_v46 = vunpack.i.l.bf16 %v5670_v12  ;;  %v7822_v6 = vld [vmem:[%s7958_s4] ss:$0 sm:$0xff] }
 0xca9   : > { %v5632_v21 = vunpack.i.h.bf16 %v5630_v40  ;;  %v5631_v31 = vunpack.i.l.bf16 %v5630_v40 }
 0xcaa   : > { %v4438_v32 = vsel %vm4432_vm6, %v4423_v52, %v5672_v14  ;;  %v4437_v28 = vsel %vm4432_vm6, %v4422_v61, %v5671_v46  ;;  %5470 = vmatmul.mubr.msk.bf16.vlgmr.msra.gmra.mrb[124].mxu1 %vm365_vm1, %v4450_v49 }
 0xcab   : > { %v4449_v27 = vpack.c.bf16 %v4438_v32, %v4437_v28  ;;  %5473 = vmatprep.mubr.msk.bf16.mxu1 %vm6078_vm0, %v7993_v54  ;;  %v4429_v43 = vsel %vm4417_vm5, %v4414_v1, %v5632_v21  ;;  %v4428_v42 = vsel %vm4417_vm5, %v4413_v30, %v5631_v31 }
 0xcac   : > { %v5645_v2 = vpop.permute.xlu1 %5644 }
 0xcad   : > { %v5647_v17 = vunpack.i.h.bf16 %v5645_v2  ;;  %v5646_v9 = vunpack.i.l.bf16 %v5645_v2  ;;  %5466 = vmatmul.mubr.msk.bf16.gmra.mrb[136].mxu0 %vm365_vm1, %v4449_v27 }
 0xcaf   : > { %v4442_v24 = vsel %vm4432_vm6, %v4427_v10, %v5647_v17  ;;  %v4441_v11 = vsel %vm4432_vm6, %v4426_v15, %v5646_v9 }
 0xcb0   : > { %v4451_v37 = vpack.c.bf16 %v4442_v24, %v4441_v11  ;;  %v5650_v44 = vpop.permute.xlu1 %5649 }
 0xcb1   : > { %v5652_v47 = vunpack.i.h.bf16 %v5650_v44  ;;  %v5651_v34 = vunpack.i.l.bf16 %v5650_v44 }
 0xcb2   : > { %5474 = vmatmul.mubr.msk.bf16.gmra.mrb[128].mxu1 %vm365_vm1, %v4451_v37 }
 0xcb3   : > { %5477 = vmatprep.mubr.msk.bf16.mxu1 %vm6078_vm0, %v7993_v54  ;;  %v4416_v38 = vsel %vm489_vm2, %v8020_v51, %v5652_v47  ;;  %v4415_v23 = vsel %vm489_vm2, %v8021_v3, %v5651_v34 }
 0xcdd   : > { %v5660_v41 = vpop.permute.xlu1 %5659 }
 0xcde   : > { %v5662_v36 = vunpack.i.h.bf16 %v5660_v41  ;;  %v5661_v7 = vunpack.i.l.bf16 %v5660_v41 }
 0xce0   : > { %v4444_v57 = vsel %vm4432_vm6, %v4429_v43, %v5662_v36  ;;  %v4443_v19 = vsel %vm4432_vm6, %v4428_v42, %v5661_v7 }
 0xce1   : > { %v4452_v53 = vpack.c.bf16 %v4444_v57, %v4443_v19  ;;  %v5665_v33 = vpop.permute.xlu1 %5664 }
 0xce2   : > { %v5667_v63 = vunpack.i.h.bf16 %v5665_v33  ;;  %v5666_v13 = vunpack.i.l.bf16 %v5665_v33 }
 0xce3   : > { %5478 = vmatmul.mubr.msk.bf16.gmra.mrb[132].mxu1 %vm365_vm1, %v4452_v53 }
 0xce4   : > { %5481 = vmatprep.mubr.msk.bf16.mxu1 %vm6078_vm0, %v7993_v54  ;;  %v4430_v5 = vsel %vm4417_vm5, %v4415_v23, %v5666_v13  ;;  %v4431_v58 = vsel %vm4417_vm5, %v4416_v38, %v5667_v63 }
 0xce5   : > { %v5675_v60 = vpop.permute.xlu1 %5674 }
 0xce6   : > { %v5677_v55 = vunpack.i.h.bf16 %v5675_v60  ;;  %v5676_v35 = vunpack.i.l.bf16 %v5675_v60 }
 0xce8   : > { %v4446_v62 = vsel %vm4432_vm6, %v4431_v58, %v5677_v55  ;;  %v4445_v50 = vsel %vm4432_vm6, %v4430_v5, %v5676_v35 }
 0xce9   : > { %v4453_v54 = vpack.c.bf16 %v4446_v62, %v4445_v50 }
 0xceb   : > { %5482 = vmatmul.mubr.msk.bf16.gmra.mrb[136].mxu1 %vm365_vm1, %v4453_v54 }
 0xd35   : > { %v4524_v16 = vpop.f32.mrb[128].mxu0 }
 0xd36   : > { %v4525_v12 = vadd.f32 %v7822_v6, %v4524_v16  ;;  %v5459_v56 = vpop.f32.mrb[129].mxu0 }
 0xd37   : > { %v4527_v48 = vpop.f32.mrb[130].mxu0 }
 0xd38   : > { %4579 = vst.msk [vmem:[%s7825_s12] sm:$0xff] %vm365_vm1, %v4525_v12  ;;  %v4528_v49 = vadd.f32 %v7822_v6, %v4527_v48  ;;  %v5460_v40 = vpop.f32.mrb[131].mxu0 }
 0xd3a   : > { %4580 = vst.msk [vmem:[%s7825_s12 + $0x8] sm:$0xff] %vm365_vm1, %v4528_v49 }
 0xd3b   : > { %5982 = shalt.err (!%p5979_p7)
}
 0xd3c   : > { %s5983_s20 = scalar_lea.hbm %s7836_s27, 3584  ;;  %s5987_s8 = scalar_lea.hbm %s7960_s6, 7168 }
 0xd3d   : > { %p5984_p9 = scmp.ne.s32.totalorder %s7836_s27, %s5983_s20  ;;  %p5988_p5 = scmp.lt.u32.totalorder %s7836_s27, %s7960_s6 }
 0xd3e   : > { %p5989_p13 = scmp.lt.u32.totalorder %s5987_s8, %s5983_s20  ;;  %p5991_p4 = scmp.lt.u32.totalorder %s5983_s20, %s7836_s27 }
 0xd3f   : > { %p5985_p1 = pnand %p5984_p9, %p6226_p12 }
 0xd40   : > { %p5990_p2 = por %p5989_p13, %p5988_p5 }
 0xd41   : > { %p5986_p0 = pneg %p5985_p1 }
 0xd42   : > { %p5992_p6 = por %p5991_p4, %p5990_p2 }
 0xd44   : > { %p5993_p8 = pnand %p5992_p6, %p5986_p0 }
 0xd46   : > { %5996 = shalt.err (!%p5993_p8)
}
 0xd47   : > { %s6094_s30 = smov 64   ;;  %s6095_s7 = smov [#allocation7]  }
 0xd48   : > { %5498 = dma.vmem_to_hbm [thread:$0]  (%p6226_p12), %s7839_s10, 3584, %s7836_s27, %s4599_s19, %s6094_s30, %s6094_s30, %s6090_s29  }
 0xd49   : > { %s4959_s29 = smul.u32 1792, %s6153_s25  ;;  %s4613_s27 = sshll.u32 %s7825_s12, 4  ;;  %s7907_s27 = int_to_ptr.vmem [resolvable:$true] %s4613_s27 }
 0xd4a   : > { %s4594_s25 = scalar_lea.sflag [#allocation4], %s6277_s15  ;;  %s5997_s20 = scalar_lea.vmem %s7907_s27, 1792 }
 0xd4b   : > { %s7902_s26 = scalar_lea.hbm %s7959_s5, %s4959_s29  ;;  %p5998_p10 = scmp.ne.s32.totalorder %s7907_s27, %s5997_s20 }
 0xd4c   : > { %s6001_s11 = sshll.u32 %s6095_s7, 4  ;;  %s6002_s11 = int_to_ptr.vmem [resolvable:$false] %s6001_s11 }
 0xd4d   : > { %p5999_p11 = pnand %p5998_p10, %p6226_p12  ;;  %s6003_s8 = scalar_lea.vmem %s6002_s11, 3584 }
 0xd4e   : > { %p6004_p7 = scmp.lt.s32.totalorder %s7907_s27, %s6002_s11  ;;  %p6005_p9 = scmp.lt.s32.totalorder %s6003_s8, %s5997_s20 }
 0xd4f   : > { %p6000_p3 = pneg %p5999_p11 }
 0xd50   : > { %p6006_p1 = por %p6005_p9, %p6004_p7 }
 0xd52   : > { %p6007_p0 = pnand %p6006_p1, %p6000_p3 }
 0xd74   : > { %v4532_v14 = vpop.f32.mrb[132].mxu0 }
 0xd75   : > { %v4533_v46 = vadd.f32 %v7822_v6, %v4532_v14  ;;  %v5463_v4 = vpop.f32.mrb[133].mxu0 }
 0xd76   : > { %v4535_v20 = vpop.f32.mrb[134].mxu0 }
 0xd77   : > { %4581 = vst.msk [vmem:[%s7825_s12 + $0x10] sm:$0xff] %vm365_vm1, %v4533_v46  ;;  %v4536_v61 = vadd.f32 %v7822_v6, %v4535_v20  ;;  %v5464_v52 = vpop.f32.mrb[135].mxu0 }
 0xd79   : > { %4582 = vst.msk [vmem:[%s7825_s12 + $0x18] sm:$0xff] %vm365_vm1, %v4536_v61 }
 0xd7d   : > { %v4548_v18 = vpop.f32.mrb[124].mxu1 }
 0xd7e   : > { %v4549_v22 = vadd.f32 %v7822_v6, %v4548_v18  ;;  %v5471_v32 = vpop.f32.mrb[125].mxu1 }
 0xd7f   : > { %v4551_v28 = vpop.f32.mrb[126].mxu1 }
 0xd80   : > { %4585 = vst.msk [vmem:[%s7825_s12 + $0x30] sm:$0xff] %vm365_vm1, %v4549_v22  ;;  %v4552_v27 = vadd.f32 %v7822_v6, %v4551_v28  ;;  %v5472_v2 = vpop.f32.mrb[127].mxu1  ;;  %v4540_v39 = vpop.f32.mrb[136].mxu0 }
 0xd81   : > { %v4541_v0 = vadd.f32 %v7822_v6, %v4540_v39  ;;  %v5467_v26 = vpop.f32.mrb[137].mxu0 }
 0xd82   : > { %4586 = vst.msk [vmem:[%s7825_s12 + $0x38] sm:$0xff] %vm365_vm1, %v4552_v27  ;;  %v4543_v8 = vpop.f32.mrb[138].mxu0 }
 0xd83   : > { %4583 = vst.msk [vmem:[%s7825_s12 + $0x20] sm:$0xff] %vm365_vm1, %v4541_v0  ;;  %v4544_v17 = vadd.f32 %v7822_v6, %v4543_v8  ;;  %v5468_v9 = vpop.f32.mrb[139].mxu0 }
 0xd85   : > { %4584 = vst.msk [vmem:[%s7825_s12 + $0x28] sm:$0xff] %vm365_vm1, %v4544_v17  ;;  %v4556_v15 = vpop.f32.mrb[128].mxu1 }
 0xd86   : > { %v4557_v10 = vadd.f32 %v7822_v6, %v4556_v15  ;;  %v5475_v24 = vpop.f32.mrb[129].mxu1 }
 0xd87   : > { %v4559_v11 = vpop.f32.mrb[130].mxu1 }
 0xd88   : > { %4587 = vst.msk [vmem:[%s7825_s12 + $0x40] sm:$0xff] %vm365_vm1, %v4557_v10  ;;  %v4560_v37 = vadd.f32 %v7822_v6, %v4559_v11  ;;  %v5476_v44 = vpop.f32.mrb[131].mxu1 }
 0xd8a   : > { %4588 = vst.msk [vmem:[%s7825_s12 + $0x48] sm:$0xff] %vm365_vm1, %v4560_v37 }
 0xdb6   : > { %v4564_v25 = vpop.f32.mrb[132].mxu1 }
 0xdb7   : > { %v4565_v59 = vadd.f32 %v7822_v6, %v4564_v25  ;;  %v5479_v21 = vpop.f32.mrb[133].mxu1 }
 0xdb8   : > { %v4567_v31 = vpop.f32.mrb[134].mxu1 }
 0xdb9   : > { %4589 = vst.msk [vmem:[%s7825_s12 + $0x50] sm:$0xff] %vm365_vm1, %v4565_v59  ;;  %v4568_v41 = vadd.f32 %v7822_v6, %v4567_v31  ;;  %v5480_v45 = vpop.f32.mrb[135].mxu1 }
 0xdbb   : > { %4590 = vst.msk [vmem:[%s7825_s12 + $0x58] sm:$0xff] %vm365_vm1, %v4568_v41 }
 0xdbe   : > { %v4572_v1 = vpop.f32.mrb[136].mxu1 }
 0xdbf   : > { %v4573_v29 = vadd.f32 %v7822_v6, %v4572_v1  ;;  %v5483_v30 = vpop.f32.mrb[137].mxu1 }
 0xdc0   : > { %v4575_v36 = vpop.f32.mrb[138].mxu1 }
 0xdc1   : > { %4591 = vst.msk [vmem:[%s7825_s12 + $0x60] sm:$0xff] %vm365_vm1, %v4573_v29  ;;  %v4576_v7 = vadd.f32 %v7822_v6, %v4575_v36  ;;  %v5484_v43 = vpop.f32.mrb[139].mxu1 }
 0xdc3   : > { %4592 = vst.msk [vmem:[%s7825_s12 + $0x68] sm:$0xff] %vm365_vm1, %v4576_v7 }
 0xdc4   : > { %6010 = shalt.err (!%p6007_p0)
}
 0xdc5   : > { %s6011_s12 = scalar_lea.hbm %s7902_s26, 1792  ;;  %s6015_s30 = scalar_lea.hbm %s7959_s5, 3584 }
 0xdc6   : > { %p6012_p5 = scmp.ne.s32.totalorder %s7902_s26, %s6011_s12  ;;  %p6016_p4 = scmp.lt.u32.totalorder %s7902_s26, %s7959_s5 }
 0xdc7   : > { %p6017_p6 = scmp.lt.u32.totalorder %s6015_s30, %s6011_s12  ;;  %p6019_p10 = scmp.lt.u32.totalorder %s6011_s12, %s7902_s26 }
 0xdc8   : > { %p6013_p13 = pnand %p6012_p5, %p6226_p12 }
 0xdc9   : > { %p6018_p8 = por %p6017_p6, %p6016_p4 }
 0xdca   : > { %p6014_p2 = pneg %p6013_p13 }
 0xdcb   : > { %p6020_p11 = por %p6019_p10, %p6018_p8 }
 0xdcd   : > { %p6021_p3 = pnand %p6020_p11, %p6014_p2 }
 0xdcf   : > { %6024 = shalt.err (!%p6021_p3)
}
 0xdd0   : > { %s6096_s19 = smov 128  }
 0xdd1   : > { %5497 = dma.vmem_to_hbm [thread:$0]  (%p6226_p12), %s7907_s27, 1792, %s7902_s26, %s4594_s25, %s6096_s19, %s6096_s19, %s6091_s17  }
 0xdd2 PF: > { %s4645_s20 = sand.u32 1, %s6059_s21   ;;  %p8022_p7 = scmp.ne.s32.totalorder %s7971_s28, 0 }
 0xdd3   : > { %p8023_p9 = scmp.ge.s32.totalorder %s6071_s24, 2  ;;  %s4646_s7 = scalar_lea.sflag [#allocation4], %s4645_s20 }
 0xdd5   : > { %p5510_p1 = pnand %p8023_p9, %p8022_p7 }
 0xdd7   : > { %6050 = dma.done.wait (!%p5510_p1), %s4646_s7, 1792  }
 0xdd8   : > { %6052 = vsyncadd (!%p5510_p1), %s4646_s7, 4294965504  ;;  %s4655_s11 = scalar_lea.sflag [#allocation9], %s4645_s20 }
 0xdd9   : > { %6054 = dma.done.wait (!%p5510_p1), %s4655_s11, 3584  }
 0xdda   : > { %6056 = vsyncadd (!%p5510_p1), %s4655_s11, 4294963712  ;;  %p24_p12 = scmp.ge.s32.totalorder %s6188_s9, 4   ;;  %s8024_s21 = smov %s6063_s22 }
 0xddb   : > { %s8025_s22 = smov %s6067_s23  ;;  %s8026_s23 = smov %s6222_s13 }
 0xddc   : > { %s8027_s24 = smov %s6188_s9  ;;  %26 = sbr.rel (!%p24_p12) target bundleno = 8 (0x8), region = 106 }
 0xde3   :  { %4660 = vsyncpa [#allocation3], 1 }
 0xde4   :  { %4662 = vsyncpa [#allocation3 + $0x1], 1 }
 0xde5   :  { %4663 = vsyncpa [#allocation6], 1 }
 0xde6   :  { %4664 = vsyncpa [#allocation4], 1 }
 0xde7   :  { %4666 = vsyncpa [#allocation4 + $0x1], 1 }
 0xde8   :  { %4667 = vsyncpa [#allocation9], 1 }
 0xde9   :  { %4669 = vsyncpa [#allocation9 + $0x1], 1 }

</bundles_post_ra>
